<compile_context>
chip_gen: v6e
topology: v6e:2x2x1
jax: 0.10.0
libtpu: 0.0.40
codegen_flags: <defaults>
</compile_context>

<pallas_src>
import functools

import jax
import jax.numpy as jnp
from jax import lax
from jax.experimental import pallas as pl
from jax.experimental.pallas import tpu as pltpu


def _mha_fused_kernel(x_ref, wqkv_ref, wproj_ref, bproj_ref, o_ref, cat_ref,
                      *, num_heads, head_size, scale):
    """Fused MHA forward for a (b_blk, T, C) block of batch rows.

    x_ref    : (b_blk, T, C)   bf16
    wqkv_ref : (C, 3C)         bf16, columns laid out [Q heads | K heads | V heads]
    wproj_ref: (C, C)          bf16
    bproj_ref: (1, C)          f32
    o_ref    : (b_blk, T, C)   output dtype
    cat_ref  : (b_blk*T, C)    f32 VMEM scratch (lane-dense head-concat buffer)
    """
    b_blk, T, C = x_ref.shape
    M = b_blk * T
    hs = head_size

    # Fused QKV projection for all heads & folded batch rows: one wide MXU matmul.
    xm = x_ref[...].reshape(M, C)                                          # bf16
    qkv = jnp.dot(xm, wqkv_ref[...], preferred_element_type=jnp.float32)   # (M, 3C) f32

    # Lane-dense (128-boundary) slices; fold the C**-0.5 scale into q once.
    q_all = (qkv[:, :C] * scale).astype(jnp.bfloat16)                      # (M, C)
    k_all = qkv[:, C:2 * C].astype(jnp.bfloat16)                           # (M, C)
    v_all = qkv[:, 2 * C:3 * C].astype(jnp.bfloat16)                       # (M, C)
    # TODO(synk): a single relayout pass to (H, M, hs) slabs would remove the
    # 3*H sub-128-lane column extracts in the head loop; kept simple/portable here.

    # Causal mask (every row has >=1 unmasked entry).
    row = lax.broadcasted_iota(jnp.int32, (T, T), 0)
    col = lax.broadcasted_iota(jnp.int32, (T, T), 1)
    causal = col <= row

    for b in range(b_blk):                        # static unroll (b_blk, H small)
        r0 = b * T
        for h in range(num_heads):
            c0 = h * hs
            q = q_all[r0:r0 + T, c0:c0 + hs]                               # (T, hs)
            k = k_all[r0:r0 + T, c0:c0 + hs]
            v = v_all[r0:r0 + T, c0:c0 + hs]

            # q @ k^T without materializing a transpose of k.
            wei = lax.dot_general(q, k, (((1,), (1,)), ((), ())),
                                  preferred_element_type=jnp.float32)      # (T, T)
            wei = jnp.where(causal, wei, -1e30)        # finite bias (tile-safe)
            wei = wei - jnp.max(wei, axis=-1, keepdims=True)
            p = jnp.exp(wei)
            # TODO(synk): for long T compute exp in bf16 (EUP-bound on v6e/v7x)
            # and switch to KV-tiled online softmax; full (T,T) kept for small T.
            inv_den = pl.reciprocal(jnp.sum(p, axis=-1, keepdims=True),
                                    approx=True)
            p = (p * inv_den).astype(jnp.bfloat16)     # softmax, bf16 for the MXU
            # TODO(synk): attention dropout (p=0.2) omitted — eval-mode identity.

            head_out = jnp.dot(p, v, preferred_element_type=jnp.float32)   # (T, hs)
            cat_ref[r0:r0 + T, c0:c0 + hs] = head_out  # write into concat scratch

    # Output projection fused into the same kernel (VMEM-resident input).
    cat = cat_ref[...].astype(jnp.bfloat16)                                # (M, C)
    proj = (jnp.dot(cat, wproj_ref[...], preferred_element_type=jnp.float32)
            + bproj_ref[...])
    # TODO(synk): residual dropout (p=0.2) omitted — eval-mode identity.
    o_ref[...] = proj.reshape(b_blk, T, C).astype(o_ref.dtype)


def pack_mha_params(wq, wk, wv, w_proj, b_proj):
    """One-time packing (call outside the per-step jit path).

    (H, C, hs) per-head weights -> (C, 3C) bf16 W_qkv; W_proj -> bf16;
    b_proj -> (1, C) f32.
    """
    H, C, hs = wq.shape
    assert H * hs == C

    def pack(w):                       # (H, C, hs) -> (C, H*hs)
        return jnp.transpose(w, (1, 0, 2)).reshape(C, H * hs)

    w_qkv = jnp.concatenate([pack(wq), pack(wk), pack(wv)], axis=-1)       # (C, 3C)
    return (w_qkv.astype(jnp.bfloat16),
            w_proj.astype(jnp.bfloat16),
            b_proj.reshape(1, C).astype(jnp.float32))


def _choose_batch_block(B):
    # Fold batch rows into each grid step (bigger matmul M, fewer step overheads)
    # while keeping >=2 "parallel" steps when possible so v7x's 2 TCs both work.
    if B >= 2 and B % 2 == 0:
        return B // 2
    return 1


def multi_head_attention(x, w_qkv, w_proj, b_proj, *, num_heads):
    """x: (B, T, C) f32; w_qkv: (C, 3C) bf16; w_proj: (C, C) bf16; b_proj: (1, C) f32."""
    B, T, C = x.shape
    assert C % num_heads == 0
    hs = C // num_heads

    b_blk = _choose_batch_block(B)
    num_steps = B // b_blk
    M = b_blk * T

    # Working-set-sized VMEM cap (double-buffered blocks + in-kernel temporaries),
    # with generous headroom; keeps v7x's smaller 64 MiB VMEM safe as T scales.
    est = (2 * (M * C * 2 + 3 * C * C * 2 + C * C * 2 + C * 4 + M * C * 4)
           + M * 3 * C * 4 + 2 * T * T * 4 + M * C * 4)
    vmem_limit = int(min(max(8 * (1 << 20), 8 * est), 100 * (1 << 20)))

    kernel = functools.partial(
        _mha_fused_kernel,
        num_heads=num_heads, head_size=hs, scale=float(C) ** -0.5)

    return pl.pallas_call(
        kernel,
        out_shape=jax.ShapeDtypeStruct((B, T, C), x.dtype),
        grid=(num_steps,),
        in_specs=[
            pl.BlockSpec((b_blk, T, C), lambda i: (i, 0, 0)),
            pl.BlockSpec((C, 3 * C), lambda i: (0, 0)),    # constant -> DMA'd once
            pl.BlockSpec((C, C), lambda i: (0, 0)),        # constant -> DMA'd once
            pl.BlockSpec((1, C), lambda i: (0, 0)),        # constant -> DMA'd once
        ],
        out_specs=pl.BlockSpec((b_blk, T, C), lambda i: (i, 0, 0)),
        scratch_shapes=[pltpu.VMEM((M, C), jnp.float32)],  # head-concat buffer
        compiler_params=pltpu.CompilerParams(
            dimension_semantics=("parallel",),             # >=2 steps -> both v7x TCs
            vmem_limit_bytes=vmem_limit,
        ),
    )(x.astype(jnp.bfloat16), w_qkv, w_proj, b_proj)


def _reference(x, wq, wk, wv, w_proj, b_proj):
    """Pure-JAX f32 reference matching the PyTorch forward (dropout in eval mode)."""
    B, T, C = x.shape
    H = wq.shape[0]
    mask = jnp.tril(jnp.ones((T, T), dtype=bool))
    outs = []
    for h in range(H):
        q = x @ wq[h]
        k = x @ wk[h]
        v = x @ wv[h]
        wei = (q @ jnp.swapaxes(k, -2, -1)) * (float(C) ** -0.5)
        wei = jnp.where(mask, wei, -jnp.inf)
        wei = jax.nn.softmax(wei, axis=-1)
        outs.append(wei @ v)
    cat = jnp.concatenate(outs, axis=-1)
    return cat @ w_proj + b_proj


if __name__ == "__main__":
    # Small shapes consistent with the module: n_embd = num_heads * head_size.
    B, T = 4, 64
    n_embd, num_heads = 128, 4
    head_size = n_embd // num_heads

    key = jax.random.PRNGKey(0)
    kx, kq, kk, kv, kpw, kpb = jax.random.split(key, 6)

    x = jax.random.normal(kx, (B, T, n_embd), dtype=jnp.float32)

    # nn.Linear default init: U(-1/sqrt(fan_in), 1/sqrt(fan_in)); bias-free q/k/v.
    bound = 1.0 / (n_embd ** 0.5)
    wq = jax.random.uniform(kq, (num_heads, n_embd, head_size), jnp.float32, -bound, bound)
    wk = jax.random.uniform(kk, (num_heads, n_embd, head_size), jnp.float32, -bound, bound)
    wv = jax.random.uniform(kv, (num_heads, n_embd, head_size), jnp.float32, -bound, bound)
    w_proj = jax.random.uniform(kpw, (n_embd, n_embd), jnp.float32, -bound, bound)
    b_proj = jax.random.uniform(kpb, (n_embd,), jnp.float32, -bound, bound)

    # One-time weight packing / bf16 casts, outside the per-call jit path.
    w_qkv_p, w_proj_p, b_proj_p = jax.block_until_ready(
        pack_mha_params(wq, wk, wv, w_proj, b_proj))

    mha = jax.jit(functools.partial(multi_head_attention, num_heads=num_heads))
    out = jax.block_until_ready(mha(x, w_qkv_p, w_proj_p, b_proj_p))

    ref = _reference(x, wq, wk, wv, w_proj, b_proj)
    assert out.shape == (B, T, n_embd)
    # bf16 MXU operands + approximate (EUP) softmax reciprocal -> loosened tolerance.
    assert jnp.allclose(out, ref, atol=1e-2, rtol=1e-2), "mismatch vs reference"

    print("KERNEL_OK")
</pallas_src>

<mosaic_0001>
module attributes {stable_mosaic.version = 11 : i64} {
  func.func @_mha_fused_kernel(%arg0: i32, %arg1: memref<2x64x128xbf16, #tpu.memory_space<vmem>>, %arg2: memref<128x384xbf16, #tpu.memory_space<vmem>>, %arg3: memref<128x128xbf16, #tpu.memory_space<vmem>>, %arg4: memref<1x128xf32, #tpu.memory_space<vmem>>, %arg5: memref<2x64x128xf32, #tpu.memory_space<vmem>>, %arg6: memref<128x128xf32, #tpu.memory_space<vmem>>) attributes {dimension_semantics = [#tpu.dimension_semantics<parallel>], iteration_bounds = array<i64: 2>, scalar_prefetch = 0 : i64, scratch_operands = 1 : i64, tpu.core_type = #tpu.core_type<tc>, window_params = [{transform_indices = @transform_0, window_bounds = array<i64: 2, 64, 128>}, {pipeline_mode = #tpu.pipeline_mode<synchronous>, transform_indices = @transform_1, window_bounds = array<i64: 128, 384>}, {pipeline_mode = #tpu.pipeline_mode<synchronous>, transform_indices = @transform_2, window_bounds = array<i64: 128, 128>}, {pipeline_mode = #tpu.pipeline_mode<synchronous>, transform_indices = @transform_3, window_bounds = array<i64: 1, 128>}, {transform_indices = @transform_4, window_bounds = array<i64: 2, 64, 128>}]} {
    %c0 = arith.constant 0 : index
    %c0_0 = arith.constant 0 : index
    %c0_1 = arith.constant 0 : index
    %0 = vector.load %arg1[%c0, %c0_0, %c0_1] : memref<2x64x128xbf16, #tpu.memory_space<vmem>>, vector<2x64x128xbf16>
    %1 = vector.shape_cast %0 : vector<2x64x128xbf16> to vector<128x128xbf16>
    %c0_2 = arith.constant 0 : index
    %c0_3 = arith.constant 0 : index
    %2 = vector.load %arg2[%c0_2, %c0_3] : memref<128x384xbf16, #tpu.memory_space<vmem>>, vector<128x384xbf16>
    %cst = arith.constant dense<0.000000e+00> : vector<128x384xf32>
    %3 = tpu.matmul %1, %2, %cst {dimension_numbers = #tpu.dot_dimension_numbers<[1], [0], [0], [1], [0, 0, 1, 1], [], []>} : vector<128x128xbf16>, vector<128x384xbf16>, vector<128x384xf32> -> vector<128x384xf32>
    %4 = vector.extract_strided_slice %3 {offsets = [0, 0], sizes = [128, 128], strides = [1, 1]} : vector<128x384xf32> to vector<128x128xf32>
    %cst_4 = arith.constant 0.0883883461 : f32
    %5 = vector.broadcast %cst_4 : f32 to vector<128x128xf32>
    %6 = arith.mulf %4, %5 : vector<128x128xf32>
    %7 = arith.truncf %6 : vector<128x128xf32> to vector<128x128xbf16>
    %8 = vector.extract_strided_slice %3 {offsets = [0, 128], sizes = [128, 128], strides = [1, 1]} : vector<128x384xf32> to vector<128x128xf32>
    %9 = arith.truncf %8 : vector<128x128xf32> to vector<128x128xbf16>
    %10 = vector.extract_strided_slice %3 {offsets = [0, 256], sizes = [128, 128], strides = [1, 1]} : vector<128x384xf32> to vector<128x128xf32>
    %11 = arith.truncf %10 : vector<128x128xf32> to vector<128x128xbf16>
    %12 = tpu.iota {dimensions = array<i32: 0>} : vector<64x64xi32>
    %13 = tpu.iota {dimensions = array<i32: 1>} : vector<64x64xi32>
    %14 = arith.cmpi sle, %13, %12 : vector<64x64xi32>
    %15 = vector.extract_strided_slice %7 {offsets = [0, 0], sizes = [64, 32], strides = [1, 1]} : vector<128x128xbf16> to vector<64x32xbf16>
    %16 = vector.extract_strided_slice %9 {offsets = [0, 0], sizes = [64, 32], strides = [1, 1]} : vector<128x128xbf16> to vector<64x32xbf16>
    %17 = vector.extract_strided_slice %11 {offsets = [0, 0], sizes = [64, 32], strides = [1, 1]} : vector<128x128xbf16> to vector<64x32xbf16>
    %cst_5 = arith.constant dense<0.000000e+00> : vector<64x64xf32>
    %18 = tpu.matmul %15, %16, %cst_5 {dimension_numbers = #tpu.dot_dimension_numbers<[1], [1], [0], [0], [0, 0, 1, 0], [], []>} : vector<64x32xbf16>, vector<64x32xbf16>, vector<64x64xf32> -> vector<64x64xf32>
    %cst_6 = arith.constant -1.000000e+30 : f32
    %19 = vector.broadcast %cst_6 : f32 to vector<64x64xf32>
    %20 = arith.select %14, %18, %19 : vector<64x64xi1>, vector<64x64xf32>
    %cst_7 = arith.constant dense<0xFF800000> : vector<64xf32>
    %21 = vector.multi_reduction <maximumf>, %20, %cst_7 [1] : vector<64x64xf32> to vector<64xf32>
    %22 = vector.shape_cast %21 : vector<64xf32> to vector<64x1xf32>
    %23 = vector.broadcast %22 : vector<64x1xf32> to vector<64x64xf32>
    %24 = arith.subf %20, %23 : vector<64x64xf32>
    %25 = math.exp %24 : vector<64x64xf32>
    %cst_8 = arith.constant dense<0.000000e+00> : vector<64xf32>
    %26 = vector.multi_reduction <add>, %25, %cst_8 [1] : vector<64x64xf32> to vector<64xf32>
    %27 = vector.shape_cast %26 : vector<64xf32> to vector<64x1xf32>
    %28 = tpu.reciprocal %27 {approx = true} : vector<64x1xf32> -> vector<64x1xf32>
    %29 = vector.broadcast %28 : vector<64x1xf32> to vector<64x64xf32>
    %30 = arith.mulf %25, %29 : vector<64x64xf32>
    %31 = arith.truncf %30 : vector<64x64xf32> to vector<64x64xbf16>
    %cst_9 = arith.constant dense<0.000000e+00> : vector<64x32xf32>
    %32 = tpu.matmul %31, %17, %cst_9 {dimension_numbers = #tpu.dot_dimension_numbers<[1], [0], [0], [1], [0, 0, 1, 1], [], []>} : vector<64x64xbf16>, vector<64x32xbf16>, vector<64x32xf32> -> vector<64x32xf32>
    %c0_10 = arith.constant 0 : index
    %c0_11 = arith.constant 0 : index
    %33 = vector.load %arg6[%c0_10, %c0_11] : memref<128x128xf32, #tpu.memory_space<vmem>>, vector<64x32xf32>
    tpu.vector_store %arg6[%c0_10, %c0_11], %32 {strides = array<i32>} : memref<128x128xf32, #tpu.memory_space<vmem>>, vector<64x32xf32>,
    %34 = vector.extract_strided_slice %7 {offsets = [0, 32], sizes = [64, 32], strides = [1, 1]} : vector<128x128xbf16> to vector<64x32xbf16>
    %35 = vector.extract_strided_slice %9 {offsets = [0, 32], sizes = [64, 32], strides = [1, 1]} : vector<128x128xbf16> to vector<64x32xbf16>
    %36 = vector.extract_strided_slice %11 {offsets = [0, 32], sizes = [64, 32], strides = [1, 1]} : vector<128x128xbf16> to vector<64x32xbf16>
    %cst_12 = arith.constant dense<0.000000e+00> : vector<64x64xf32>
    %37 = tpu.matmul %34, %35, %cst_12 {dimension_numbers = #tpu.dot_dimension_numbers<[1], [1], [0], [0], [0, 0, 1, 0], [], []>} : vector<64x32xbf16>, vector<64x32xbf16>, vector<64x64xf32> -> vector<64x64xf32>
    %cst_13 = arith.constant -1.000000e+30 : f32
    %38 = vector.broadcast %cst_13 : f32 to vector<64x64xf32>
    %39 = arith.select %14, %37, %38 : vector<64x64xi1>, vector<64x64xf32>
    %cst_14 = arith.constant dense<0xFF800000> : vector<64xf32>
    %40 = vector.multi_reduction <maximumf>, %39, %cst_14 [1] : vector<64x64xf32> to vector<64xf32>
    %41 = vector.shape_cast %40 : vector<64xf32> to vector<64x1xf32>
    %42 = vector.broadcast %41 : vector<64x1xf32> to vector<64x64xf32>
    %43 = arith.subf %39, %42 : vector<64x64xf32>
    %44 = math.exp %43 : vector<64x64xf32>
    %cst_15 = arith.constant dense<0.000000e+00> : vector<64xf32>
    %45 = vector.multi_reduction <add>, %44, %cst_15 [1] : vector<64x64xf32> to vector<64xf32>
    %46 = vector.shape_cast %45 : vector<64xf32> to vector<64x1xf32>
    %47 = tpu.reciprocal %46 {approx = true} : vector<64x1xf32> -> vector<64x1xf32>
    %48 = vector.broadcast %47 : vector<64x1xf32> to vector<64x64xf32>
    %49 = arith.mulf %44, %48 : vector<64x64xf32>
    %50 = arith.truncf %49 : vector<64x64xf32> to vector<64x64xbf16>
    %cst_16 = arith.constant dense<0.000000e+00> : vector<64x32xf32>
    %51 = tpu.matmul %50, %36, %cst_16 {dimension_numbers = #tpu.dot_dimension_numbers<[1], [0], [0], [1], [0, 0, 1, 1], [], []>} : vector<64x64xbf16>, vector<64x32xbf16>, vector<64x32xf32> -> vector<64x32xf32>
    %c0_17 = arith.constant 0 : index
    %c32 = arith.constant 32 : index
    %52 = vector.load %arg6[%c0_17, %c32] : memref<128x128xf32, #tpu.memory_space<vmem>>, vector<64x32xf32>
    tpu.vector_store %arg6[%c0_17, %c32], %51 {strides = array<i32>} : memref<128x128xf32, #tpu.memory_space<vmem>>, vector<64x32xf32>,
    %53 = vector.extract_strided_slice %7 {offsets = [0, 64], sizes = [64, 32], strides = [1, 1]} : vector<128x128xbf16> to vector<64x32xbf16>
    %54 = vector.extract_strided_slice %9 {offsets = [0, 64], sizes = [64, 32], strides = [1, 1]} : vector<128x128xbf16> to vector<64x32xbf16>
    %55 = vector.extract_strided_slice %11 {offsets = [0, 64], sizes = [64, 32], strides = [1, 1]} : vector<128x128xbf16> to vector<64x32xbf16>
    %cst_18 = arith.constant dense<0.000000e+00> : vector<64x64xf32>
    %56 = tpu.matmul %53, %54, %cst_18 {dimension_numbers = #tpu.dot_dimension_numbers<[1], [1], [0], [0], [0, 0, 1, 0], [], []>} : vector<64x32xbf16>, vector<64x32xbf16>, vector<64x64xf32> -> vector<64x64xf32>
    %cst_19 = arith.constant -1.000000e+30 : f32
    %57 = vector.broadcast %cst_19 : f32 to vector<64x64xf32>
    %58 = arith.select %14, %56, %57 : vector<64x64xi1>, vector<64x64xf32>
    %cst_20 = arith.constant dense<0xFF800000> : vector<64xf32>
    %59 = vector.multi_reduction <maximumf>, %58, %cst_20 [1] : vector<64x64xf32> to vector<64xf32>
    %60 = vector.shape_cast %59 : vector<64xf32> to vector<64x1xf32>
    %61 = vector.broadcast %60 : vector<64x1xf32> to vector<64x64xf32>
    %62 = arith.subf %58, %61 : vector<64x64xf32>
    %63 = math.exp %62 : vector<64x64xf32>
    %cst_21 = arith.constant dense<0.000000e+00> : vector<64xf32>
    %64 = vector.multi_reduction <add>, %63, %cst_21 [1] : vector<64x64xf32> to vector<64xf32>
    %65 = vector.shape_cast %64 : vector<64xf32> to vector<64x1xf32>
    %66 = tpu.reciprocal %65 {approx = true} : vector<64x1xf32> -> vector<64x1xf32>
    %67 = vector.broadcast %66 : vector<64x1xf32> to vector<64x64xf32>
    %68 = arith.mulf %63, %67 : vector<64x64xf32>
    %69 = arith.truncf %68 : vector<64x64xf32> to vector<64x64xbf16>
    %cst_22 = arith.constant dense<0.000000e+00> : vector<64x32xf32>
    %70 = tpu.matmul %69, %55, %cst_22 {dimension_numbers = #tpu.dot_dimension_numbers<[1], [0], [0], [1], [0, 0, 1, 1], [], []>} : vector<64x64xbf16>, vector<64x32xbf16>, vector<64x32xf32> -> vector<64x32xf32>
    %c0_23 = arith.constant 0 : index
    %c64 = arith.constant 64 : index
    %71 = vector.load %arg6[%c0_23, %c64] : memref<128x128xf32, #tpu.memory_space<vmem>>, vector<64x32xf32>
    tpu.vector_store %arg6[%c0_23, %c64], %70 {strides = array<i32>} : memref<128x128xf32, #tpu.memory_space<vmem>>, vector<64x32xf32>,
    %72 = vector.extract_strided_slice %7 {offsets = [0, 96], sizes = [64, 32], strides = [1, 1]} : vector<128x128xbf16> to vector<64x32xbf16>
    %73 = vector.extract_strided_slice %9 {offsets = [0, 96], sizes = [64, 32], strides = [1, 1]} : vector<128x128xbf16> to vector<64x32xbf16>
    %74 = vector.extract_strided_slice %11 {offsets = [0, 96], sizes = [64, 32], strides = [1, 1]} : vector<128x128xbf16> to vector<64x32xbf16>
    %cst_24 = arith.constant dense<0.000000e+00> : vector<64x64xf32>
    %75 = tpu.matmul %72, %73, %cst_24 {dimension_numbers = #tpu.dot_dimension_numbers<[1], [1], [0], [0], [0, 0, 1, 0], [], []>} : vector<64x32xbf16>, vector<64x32xbf16>, vector<64x64xf32> -> vector<64x64xf32>
    %cst_25 = arith.constant -1.000000e+30 : f32
    %76 = vector.broadcast %cst_25 : f32 to vector<64x64xf32>
    %77 = arith.select %14, %75, %76 : vector<64x64xi1>, vector<64x64xf32>
    %cst_26 = arith.constant dense<0xFF800000> : vector<64xf32>
    %78 = vector.multi_reduction <maximumf>, %77, %cst_26 [1] : vector<64x64xf32> to vector<64xf32>
    %79 = vector.shape_cast %78 : vector<64xf32> to vector<64x1xf32>
    %80 = vector.broadcast %79 : vector<64x1xf32> to vector<64x64xf32>
    %81 = arith.subf %77, %80 : vector<64x64xf32>
    %82 = math.exp %81 : vector<64x64xf32>
    %cst_27 = arith.constant dense<0.000000e+00> : vector<64xf32>
    %83 = vector.multi_reduction <add>, %82, %cst_27 [1] : vector<64x64xf32> to vector<64xf32>
    %84 = vector.shape_cast %83 : vector<64xf32> to vector<64x1xf32>
    %85 = tpu.reciprocal %84 {approx = true} : vector<64x1xf32> -> vector<64x1xf32>
    %86 = vector.broadcast %85 : vector<64x1xf32> to vector<64x64xf32>
    %87 = arith.mulf %82, %86 : vector<64x64xf32>
    %88 = arith.truncf %87 : vector<64x64xf32> to vector<64x64xbf16>
    %cst_28 = arith.constant dense<0.000000e+00> : vector<64x32xf32>
    %89 = tpu.matmul %88, %74, %cst_28 {dimension_numbers = #tpu.dot_dimension_numbers<[1], [0], [0], [1], [0, 0, 1, 1], [], []>} : vector<64x64xbf16>, vector<64x32xbf16>, vector<64x32xf32> -> vector<64x32xf32>
    %c0_29 = arith.constant 0 : index
    %c96 = arith.constant 96 : index
    %90 = vector.load %arg6[%c0_29, %c96] : memref<128x128xf32, #tpu.memory_space<vmem>>, vector<64x32xf32>
    tpu.vector_store %arg6[%c0_29, %c96], %89 {strides = array<i32>} : memref<128x128xf32, #tpu.memory_space<vmem>>, vector<64x32xf32>,
    %91 = vector.extract_strided_slice %7 {offsets = [64, 0], sizes = [64, 32], strides = [1, 1]} : vector<128x128xbf16> to vector<64x32xbf16>
    %92 = vector.extract_strided_slice %9 {offsets = [64, 0], sizes = [64, 32], strides = [1, 1]} : vector<128x128xbf16> to vector<64x32xbf16>
    %93 = vector.extract_strided_slice %11 {offsets = [64, 0], sizes = [64, 32], strides = [1, 1]} : vector<128x128xbf16> to vector<64x32xbf16>
    %cst_30 = arith.constant dense<0.000000e+00> : vector<64x64xf32>
    %94 = tpu.matmul %91, %92, %cst_30 {dimension_numbers = #tpu.dot_dimension_numbers<[1], [1], [0], [0], [0, 0, 1, 0], [], []>} : vector<64x32xbf16>, vector<64x32xbf16>, vector<64x64xf32> -> vector<64x64xf32>
    %cst_31 = arith.constant -1.000000e+30 : f32
    %95 = vector.broadcast %cst_31 : f32 to vector<64x64xf32>
    %96 = arith.select %14, %94, %95 : vector<64x64xi1>, vector<64x64xf32>
    %cst_32 = arith.constant dense<0xFF800000> : vector<64xf32>
    %97 = vector.multi_reduction <maximumf>, %96, %cst_32 [1] : vector<64x64xf32> to vector<64xf32>
    %98 = vector.shape_cast %97 : vector<64xf32> to vector<64x1xf32>
    %99 = vector.broadcast %98 : vector<64x1xf32> to vector<64x64xf32>
    %100 = arith.subf %96, %99 : vector<64x64xf32>
    %101 = math.exp %100 : vector<64x64xf32>
    %cst_33 = arith.constant dense<0.000000e+00> : vector<64xf32>
    %102 = vector.multi_reduction <add>, %101, %cst_33 [1] : vector<64x64xf32> to vector<64xf32>
    %103 = vector.shape_cast %102 : vector<64xf32> to vector<64x1xf32>
    %104 = tpu.reciprocal %103 {approx = true} : vector<64x1xf32> -> vector<64x1xf32>
    %105 = vector.broadcast %104 : vector<64x1xf32> to vector<64x64xf32>
    %106 = arith.mulf %101, %105 : vector<64x64xf32>
    %107 = arith.truncf %106 : vector<64x64xf32> to vector<64x64xbf16>
    %cst_34 = arith.constant dense<0.000000e+00> : vector<64x32xf32>
    %108 = tpu.matmul %107, %93, %cst_34 {dimension_numbers = #tpu.dot_dimension_numbers<[1], [0], [0], [1], [0, 0, 1, 1], [], []>} : vector<64x64xbf16>, vector<64x32xbf16>, vector<64x32xf32> -> vector<64x32xf32>
    %c64_35 = arith.constant 64 : index
    %c0_36 = arith.constant 0 : index
    %109 = vector.load %arg6[%c64_35, %c0_36] : memref<128x128xf32, #tpu.memory_space<vmem>>, vector<64x32xf32>
    tpu.vector_store %arg6[%c64_35, %c0_36], %108 {strides = array<i32>} : memref<128x128xf32, #tpu.memory_space<vmem>>, vector<64x32xf32>,
    %110 = vector.extract_strided_slice %7 {offsets = [64, 32], sizes = [64, 32], strides = [1, 1]} : vector<128x128xbf16> to vector<64x32xbf16>
    %111 = vector.extract_strided_slice %9 {offsets = [64, 32], sizes = [64, 32], strides = [1, 1]} : vector<128x128xbf16> to vector<64x32xbf16>
    %112 = vector.extract_strided_slice %11 {offsets = [64, 32], sizes = [64, 32], strides = [1, 1]} : vector<128x128xbf16> to vector<64x32xbf16>
    %cst_37 = arith.constant dense<0.000000e+00> : vector<64x64xf32>
    %113 = tpu.matmul %110, %111, %cst_37 {dimension_numbers = #tpu.dot_dimension_numbers<[1], [1], [0], [0], [0, 0, 1, 0], [], []>} : vector<64x32xbf16>, vector<64x32xbf16>, vector<64x64xf32> -> vector<64x64xf32>
    %cst_38 = arith.constant -1.000000e+30 : f32
    %114 = vector.broadcast %cst_38 : f32 to vector<64x64xf32>
    %115 = arith.select %14, %113, %114 : vector<64x64xi1>, vector<64x64xf32>
    %cst_39 = arith.constant dense<0xFF800000> : vector<64xf32>
    %116 = vector.multi_reduction <maximumf>, %115, %cst_39 [1] : vector<64x64xf32> to vector<64xf32>
    %117 = vector.shape_cast %116 : vector<64xf32> to vector<64x1xf32>
    %118 = vector.broadcast %117 : vector<64x1xf32> to vector<64x64xf32>
    %119 = arith.subf %115, %118 : vector<64x64xf32>
    %120 = math.exp %119 : vector<64x64xf32>
    %cst_40 = arith.constant dense<0.000000e+00> : vector<64xf32>
    %121 = vector.multi_reduction <add>, %120, %cst_40 [1] : vector<64x64xf32> to vector<64xf32>
    %122 = vector.shape_cast %121 : vector<64xf32> to vector<64x1xf32>
    %123 = tpu.reciprocal %122 {approx = true} : vector<64x1xf32> -> vector<64x1xf32>
    %124 = vector.broadcast %123 : vector<64x1xf32> to vector<64x64xf32>
    %125 = arith.mulf %120, %124 : vector<64x64xf32>
    %126 = arith.truncf %125 : vector<64x64xf32> to vector<64x64xbf16>
    %cst_41 = arith.constant dense<0.000000e+00> : vector<64x32xf32>
    %127 = tpu.matmul %126, %112, %cst_41 {dimension_numbers = #tpu.dot_dimension_numbers<[1], [0], [0], [1], [0, 0, 1, 1], [], []>} : vector<64x64xbf16>, vector<64x32xbf16>, vector<64x32xf32> -> vector<64x32xf32>
    %c64_42 = arith.constant 64 : index
    %c32_43 = arith.constant 32 : index
    %128 = vector.load %arg6[%c64_42, %c32_43] : memref<128x128xf32, #tpu.memory_space<vmem>>, vector<64x32xf32>
    tpu.vector_store %arg6[%c64_42, %c32_43], %127 {strides = array<i32>} : memref<128x128xf32, #tpu.memory_space<vmem>>, vector<64x32xf32>,
    %129 = vector.extract_strided_slice %7 {offsets = [64, 64], sizes = [64, 32], strides = [1, 1]} : vector<128x128xbf16> to vector<64x32xbf16>
    %130 = vector.extract_strided_slice %9 {offsets = [64, 64], sizes = [64, 32], strides = [1, 1]} : vector<128x128xbf16> to vector<64x32xbf16>
    %131 = vector.extract_strided_slice %11 {offsets = [64, 64], sizes = [64, 32], strides = [1, 1]} : vector<128x128xbf16> to vector<64x32xbf16>
    %cst_44 = arith.constant dense<0.000000e+00> : vector<64x64xf32>
    %132 = tpu.matmul %129, %130, %cst_44 {dimension_numbers = #tpu.dot_dimension_numbers<[1], [1], [0], [0], [0, 0, 1, 0], [], []>} : vector<64x32xbf16>, vector<64x32xbf16>, vector<64x64xf32> -> vector<64x64xf32>
    %cst_45 = arith.constant -1.000000e+30 : f32
    %133 = vector.broadcast %cst_45 : f32 to vector<64x64xf32>
    %134 = arith.select %14, %132, %133 : vector<64x64xi1>, vector<64x64xf32>
    %cst_46 = arith.constant dense<0xFF800000> : vector<64xf32>
    %135 = vector.multi_reduction <maximumf>, %134, %cst_46 [1] : vector<64x64xf32> to vector<64xf32>
    %136 = vector.shape_cast %135 : vector<64xf32> to vector<64x1xf32>
    %137 = vector.broadcast %136 : vector<64x1xf32> to vector<64x64xf32>
    %138 = arith.subf %134, %137 : vector<64x64xf32>
    %139 = math.exp %138 : vector<64x64xf32>
    %cst_47 = arith.constant dense<0.000000e+00> : vector<64xf32>
    %140 = vector.multi_reduction <add>, %139, %cst_47 [1] : vector<64x64xf32> to vector<64xf32>
    %141 = vector.shape_cast %140 : vector<64xf32> to vector<64x1xf32>
    %142 = tpu.reciprocal %141 {approx = true} : vector<64x1xf32> -> vector<64x1xf32>
    %143 = vector.broadcast %142 : vector<64x1xf32> to vector<64x64xf32>
    %144 = arith.mulf %139, %143 : vector<64x64xf32>
    %145 = arith.truncf %144 : vector<64x64xf32> to vector<64x64xbf16>
    %cst_48 = arith.constant dense<0.000000e+00> : vector<64x32xf32>
    %146 = tpu.matmul %145, %131, %cst_48 {dimension_numbers = #tpu.dot_dimension_numbers<[1], [0], [0], [1], [0, 0, 1, 1], [], []>} : vector<64x64xbf16>, vector<64x32xbf16>, vector<64x32xf32> -> vector<64x32xf32>
    %c64_49 = arith.constant 64 : index
    %c64_50 = arith.constant 64 : index
    %147 = vector.load %arg6[%c64_49, %c64_50] : memref<128x128xf32, #tpu.memory_space<vmem>>, vector<64x32xf32>
    tpu.vector_store %arg6[%c64_49, %c64_50], %146 {strides = array<i32>} : memref<128x128xf32, #tpu.memory_space<vmem>>, vector<64x32xf32>,
    %148 = vector.extract_strided_slice %7 {offsets = [64, 96], sizes = [64, 32], strides = [1, 1]} : vector<128x128xbf16> to vector<64x32xbf16>
    %149 = vector.extract_strided_slice %9 {offsets = [64, 96], sizes = [64, 32], strides = [1, 1]} : vector<128x128xbf16> to vector<64x32xbf16>
    %150 = vector.extract_strided_slice %11 {offsets = [64, 96], sizes = [64, 32], strides = [1, 1]} : vector<128x128xbf16> to vector<64x32xbf16>
    %cst_51 = arith.constant dense<0.000000e+00> : vector<64x64xf32>
    %151 = tpu.matmul %148, %149, %cst_51 {dimension_numbers = #tpu.dot_dimension_numbers<[1], [1], [0], [0], [0, 0, 1, 0], [], []>} : vector<64x32xbf16>, vector<64x32xbf16>, vector<64x64xf32> -> vector<64x64xf32>
    %cst_52 = arith.constant -1.000000e+30 : f32
    %152 = vector.broadcast %cst_52 : f32 to vector<64x64xf32>
    %153 = arith.select %14, %151, %152 : vector<64x64xi1>, vector<64x64xf32>
    %cst_53 = arith.constant dense<0xFF800000> : vector<64xf32>
    %154 = vector.multi_reduction <maximumf>, %153, %cst_53 [1] : vector<64x64xf32> to vector<64xf32>
    %155 = vector.shape_cast %154 : vector<64xf32> to vector<64x1xf32>
    %156 = vector.broadcast %155 : vector<64x1xf32> to vector<64x64xf32>
    %157 = arith.subf %153, %156 : vector<64x64xf32>
    %158 = math.exp %157 : vector<64x64xf32>
    %cst_54 = arith.constant dense<0.000000e+00> : vector<64xf32>
    %159 = vector.multi_reduction <add>, %158, %cst_54 [1] : vector<64x64xf32> to vector<64xf32>
    %160 = vector.shape_cast %159 : vector<64xf32> to vector<64x1xf32>
    %161 = tpu.reciprocal %160 {approx = true} : vector<64x1xf32> -> vector<64x1xf32>
    %162 = vector.broadcast %161 : vector<64x1xf32> to vector<64x64xf32>
    %163 = arith.mulf %158, %162 : vector<64x64xf32>
    %164 = arith.truncf %163 : vector<64x64xf32> to vector<64x64xbf16>
    %cst_55 = arith.constant dense<0.000000e+00> : vector<64x32xf32>
    %165 = tpu.matmul %164, %150, %cst_55 {dimension_numbers = #tpu.dot_dimension_numbers<[1], [0], [0], [1], [0, 0, 1, 1], [], []>} : vector<64x64xbf16>, vector<64x32xbf16>, vector<64x32xf32> -> vector<64x32xf32>
    %c64_56 = arith.constant 64 : index
    %c96_57 = arith.constant 96 : index
    %166 = vector.load %arg6[%c64_56, %c96_57] : memref<128x128xf32, #tpu.memory_space<vmem>>, vector<64x32xf32>
    tpu.vector_store %arg6[%c64_56, %c96_57], %165 {strides = array<i32>} : memref<128x128xf32, #tpu.memory_space<vmem>>, vector<64x32xf32>,
    %c0_58 = arith.constant 0 : index
    %c0_59 = arith.constant 0 : index
    %167 = vector.load %arg6[%c0_58, %c0_59] : memref<128x128xf32, #tpu.memory_space<vmem>>, vector<128x128xf32>
    %168 = arith.truncf %167 : vector<128x128xf32> to vector<128x128xbf16>
    %c0_60 = arith.constant 0 : index
    %c0_61 = arith.constant 0 : index
    %169 = vector.load %arg3[%c0_60, %c0_61] : memref<128x128xbf16, #tpu.memory_space<vmem>>, vector<128x128xbf16>
    %cst_62 = arith.constant dense<0.000000e+00> : vector<128x128xf32>
    %170 = tpu.matmul %168, %169, %cst_62 {dimension_numbers = #tpu.dot_dimension_numbers<[1], [0], [0], [1], [0, 0, 1, 1], [], []>} : vector<128x128xbf16>, vector<128x128xbf16>, vector<128x128xf32> -> vector<128x128xf32>
    %c0_63 = arith.constant 0 : index
    %c0_64 = arith.constant 0 : index
    %171 = vector.load %arg4[%c0_63, %c0_64] : memref<1x128xf32, #tpu.memory_space<vmem>>, vector<1x128xf32>
    %172 = vector.broadcast %171 : vector<1x128xf32> to vector<128x128xf32>
    %173 = arith.addf %170, %172 : vector<128x128xf32>
    %174 = vector.shape_cast %173 : vector<128x128xf32> to vector<2x64x128xf32>
    %c0_65 = arith.constant 0 : index
    %c0_66 = arith.constant 0 : index
    %c0_67 = arith.constant 0 : index
    %175 = vector.load %arg5[%c0_65, %c0_66, %c0_67] : memref<2x64x128xf32, #tpu.memory_space<vmem>>, vector<2x64x128xf32>
    tpu.vector_store %arg5[%c0_65, %c0_66, %c0_67], %174 {strides = array<i32>} : memref<2x64x128xf32, #tpu.memory_space<vmem>>, vector<2x64x128xf32>,
    return
  }
  func.func @transform_0(%arg0: i32) -> (i32, i32, i32) {
    %c0_i32 = arith.constant 0 : i32
    %c0_i32_0 = arith.constant 0 : i32
    %c0_i32_1 = arith.constant 0 : i32
    return %arg0, %c0_i32, %c0_i32_0 : i32, i32, i32
  }
  func.func @transform_1(%arg0: i32) -> (i32, i32) {
    %c0_i32 = arith.constant 0 : i32
    %c0_i32_0 = arith.constant 0 : i32
    %c0_i32_1 = arith.constant 0 : i32
    return %c0_i32, %c0_i32_0 : i32, i32
  }
  func.func @transform_2(%arg0: i32) -> (i32, i32) {
    %c0_i32 = arith.constant 0 : i32
    %c0_i32_0 = arith.constant 0 : i32
    %c0_i32_1 = arith.constant 0 : i32
    return %c0_i32, %c0_i32_0 : i32, i32
  }
  func.func @transform_3(%arg0: i32) -> (i32, i32) {
    %c0_i32 = arith.constant 0 : i32
    %c0_i32_0 = arith.constant 0 : i32
    %c0_i32_1 = arith.constant 0 : i32
    return %c0_i32, %c0_i32_0 : i32, i32
  }
  func.func @transform_4(%arg0: i32) -> (i32, i32, i32) {
    %c0_i32 = arith.constant 0 : i32
    %c0_i32_0 = arith.constant 0 : i32
    %c0_i32_1 = arith.constant 0 : i32
    return %arg0, %c0_i32, %c0_i32_0 : i32, i32, i32
  }
}

</mosaic_0001>

<bundles_post_ra>
// kernel: multi_head_attention.1
= control target key start
LH: loop header
LB: loop body
LE: loop exit
PB: predicated region body
PF: predicated region fallthrough
CT: control target
= control target key end

     0   :  { %9 = vsyncpa [#allocation4], 0  ;;  %s6100_s0 = inlined_call_operand.vmem [shape: bf16[4,64,128], index: 0, kind: input, shape index: {}]   ;;  %s6101_s1 = inlined_call_operand.vmem [shape: bf16[128,384], index: 1, kind: input, shape index: {}]   ;;  %s6102_s2 = inlined_call_operand.vmem [shape: bf16[128,128], index: 2, kind: input, shape index: {}]   ;;  %s6103_s3 = inlined_call_operand.vmem [shape: f32[1,128], index: 3, kind: input, shape index: {}]   ;;  %s6104_s4 = inlined_call_operand.hbm [shape: f32[4,64,128], index: 4, kind: output, shape index: {}]  }
   0x1   :  { %11 = vsyncpa [#allocation4 + $0x1], 0  ;;  %s4655_s15 = smov 0   ;;  %s4657_s16 = smov 0  }
   0x2   :  { %s4659_s17 = smov 0   ;;  %s4661_s18 = smov 0  }
   0x3 LB: > { %s4676_s19 = sadd.s32 4294967295, %s4621_s18   ;;  %s3562_s20 = sadd.s32 4294967294, %s4621_s18   ;;  %s4621_s18 = sphi %s4661_s18, %s6198_s18   ;;  %s4617_s17 = sphi %s4659_s17, %s6197_s17   ;;  %s4613_s16 = sphi %s4657_s16, %s6196_s16   ;;  %s4609_s15 = sphi %s4655_s15, %s6195_s15  }
   0x4   : > { %s4680_s21 = sadd.s32 1, %s4621_s18   ;;  %s113_s22 = sadd.s32 1, %s4617_s17 }
   0x5   : > { %s110_s23 = ssub.s32 %s4621_s18, %s4680_s21  ;;  %p123_p0 = scmp.ne.s32.totalorder %s4617_s17, %s4613_s16 }
   0x6   : > { %p111_p1 = scmp.eq.s32.totalorder %s110_s23, 0  ;;  %p124_p2 = scmp.eq.s32.totalorder %s4676_s19, 1 }
   0x7   : > { %p129_p3 = scmp.ne.s32.totalorder %s4613_s16, %s4609_s15  ;;  %p130_p4 = scmp.eq.s32.totalorder %s3562_s20, 1 }
   0x8   : > { %s4691_s24 = scalar_select %p111_p1, %s4617_s17, %s113_s22  }
   0x9   : > { %p4693_p5 = por %p124_p2, %p123_p0  ;;  %p4697_p6 = por %p130_p4, %p129_p3 }
   0xa   : > { %p3565_p7 = scmp.ge.s32.totalorder %s4621_s18, 1  ;;  %p167_p8 = scmp.lt.s32.totalorder %s4621_s18, 3 }
   0xc   : > { %p168_p9 = pnand %p3565_p7, %p167_p8 }
   0xe   : > { %171 = sbr.rel (%p168_p9) target bundleno = 4455 (0x1167), region = 36 }
  0x13   : > { %v4257_v0 = vld [vmem:[%s6101_s1 + $0xac] ss:$12 sps:$4 sm:$0xff]   ;;  %s3567_s29 = sshll.u32 %s4676_s19, 1  ;;  %v4259_v1 = vld [vmem:[%s6101_s1 + $0xa8] ss:$12 sps:$4 sm:$0xff]   ;;  %v4623_v2 = vmov 0  }
  0x14   : > { %459 = vmatprep.mubr.bf16.mxu0 %v4623_v2  ;;  %p195_p10 = scmp.lt.s32.totalorder %s3567_s29, 3  ;;  %499 = vmatprep.mubr.bf16.mxu1 %v4623_v2  ;;  %v4260_v3 = vld [vmem:[%s6101_s1 + $0x94] ss:$12 sps:$4 sm:$0xff]   ;;  %v4262_v4 = vld [vmem:[%s6101_s1 + $0x90] ss:$12 sps:$4 sm:$0xff]   ;;  %vm696_vm0 = vcmask 261120  }
  0x15   : > { %427 = vmatprep.subr.bf16.mxu0 %v4257_v0  ;;  %4164 = vmatprep.subr.bf16.mxu1 %v4257_v0  ;;  %v4263_v5 = vld [vmem:[%s6101_s1 + $0x7c] ss:$12 sps:$4 sm:$0xff]   ;;  %v4265_v6 = vld [vmem:[%s6101_s1 + $0x78] ss:$12 sps:$4 sm:$0xff]   ;;  %v4268_v8 = vld [vmem:[%s6101_s1 + $0x60] ss:$12 sps:$4 sm:$0xff]  }
  0x16   : > { %428 = vmatpush1.bf16.msra.mxu0 %v4259_v1  ;;  %s6200_s29 = smov (!%p195_p10, %s3567_s29), 3  ;;  %4172 = vmatpush1.bf16.msra.mxu1 %v4259_v1  ;;  %v4266_v7 = vld [vmem:[%s6101_s1 + $0x64] ss:$12 sps:$4 sm:$0xff]   ;;  %v4269_v9 = vld [vmem:[%s6101_s1 + $0x4c] ss:$12 sps:$4 sm:$0xff]   ;;  %s4625_s5 = smov 64  }
  0x17   : > { %429 = vmatprep.subr.bf16.mxu0 %v4260_v3  ;;  %4165 = vmatprep.subr.bf16.mxu1 %v4260_v3  ;;  %s3681_s12 = sshll.u32 %s6200_s29, 5  ;;  %v4271_v10 = vld [vmem:[%s6101_s1 + $0x48] ss:$12 sps:$4 sm:$0xff]   ;;  %v4274_v12 = vld [vmem:[%s6101_s1 + $0x30] ss:$12 sps:$4 sm:$0xff]   ;;  %vm794_vm2 = vcmask 523264  }
  0x18   : > { %s4730_s28 = scalar_lea.vmem %s6100_s0, %s3681_s12  ;;  %v4272_v11 = vld [vmem:[%s6101_s1 + $0x34] ss:$12 sps:$4 sm:$0xff]   ;;  %v4275_v13 = vld [vmem:[%s6101_s1 + $0x1c] ss:$12 sps:$4 sm:$0xff]   ;;  %v4277_v14 = vld [vmem:[%s6101_s1 + $0x18] ss:$12 sps:$4 sm:$0xff]  }
  0x19   : > { %v4278_v15 = vld [vmem:[%s6101_s1 + $0x4] ss:$12 sps:$4 sm:$0xff]   ;;  %v4280_v16 = vld [vmem:[%s6101_s1] ss:$12 sps:$4 sm:$0xff]   ;;  %v4290_v24 = vld [vmem:[%s6101_s1 + $0x68] ss:$12 sps:$4 sm:$0xff]  }
  0x1a   : > { %430 = vmatpush1.bf16.msra.mxu0 %v4262_v4  ;;  %4173 = vmatpush1.bf16.msra.mxu1 %v4262_v4  ;;  %v4286_v17 = vld [vmem:[%s6101_s1 + $0xb0] ss:$12 sps:$4 sm:$0xff]   ;;  %v4281_v18 = vld [vmem:[%s4730_s28] sm:$0xff]   ;;  %v4282_v22 = vld [vmem:[%s4730_s28 + $0x8] sm:$0xff]   ;;  %s4626_s6 = smov 32   ;;  %vm1310_vm10 = vcmask 523520  }
  0x1b   : > { %431 = vmatprep.subr.bf16.mxu0 %v4263_v5  ;;  %4166 = vmatprep.subr.bf16.mxu1 %v4263_v5  ;;  %v4285_v19 = vld [vmem:[%s4730_s28 + $0x20] sm:$0xff]   ;;  %v4288_v23 = vld [vmem:[%s4730_s28 + $0x28] sm:$0xff]   ;;  %v4292_v25 = vld [vmem:[%s6101_s1 + $0x50] ss:$12 sps:$4 sm:$0xff]   ;;  %vm1645_vm11 = vcmask 785920   ;;  %vm1980_vm12 = vcmask 1048320  }
  0x1c   : > { %v4287_v20 = vld [vmem:[%s6101_s1 + $0x98] ss:$12 sps:$4 sm:$0xff]   ;;  %v4289_v21 = vld [vmem:[%s6101_s1 + $0x80] ss:$12 sps:$4 sm:$0xff]   ;;  %v4283_v26 = vld [vmem:[%s4730_s28 + $0x10] sm:$0xff]   ;;  %s191_s8 = sand.u32 1, %s4613_s16  }
  0x1d   : > { %v4291_v27 = vld [vmem:[%s4730_s28 + $0x30] sm:$0xff]   ;;  %v4293_v28 = vld [vmem:[%s6101_s1 + $0x38] ss:$12 sps:$4 sm:$0xff]   ;;  %v4295_v29 = vld [vmem:[%s6101_s1 + $0x20] ss:$12 sps:$4 sm:$0xff]   ;;  %s3566_s9 = sshll.u32 %s191_s8, 7 }
  0x1e   : > { %432 = vmatpush1.bf16.msra.mxu0 %v4265_v6  ;;  %4174 = vmatpush1.bf16.msra.mxu1 %v4265_v6  ;;  %v4284_v30 = vld [vmem:[%s4730_s28 + $0x18] sm:$0xff]   ;;  %v4296_v32 = vld [vmem:[%s6101_s1 + $0x8] ss:$12 sps:$4 sm:$0xff]   ;;  %s4627_s23 = smov [#allocation3]  }
  0x1f   : > { %433 = vmatprep.subr.bf16.mxu0 %v4266_v7  ;;  %4167 = vmatprep.subr.bf16.mxu1 %v4266_v7  ;;  %v4294_v31 = vld [vmem:[%s4730_s28 + $0x38] sm:$0xff]   ;;  %s4624_s28 = smov 96   ;;  %s4565_s27 = sshll.u32 %s4627_s23, 4  ;;  %s4566_s27 = int_to_ptr.vmem [resolvable:$false] %s4565_s27 }
  0x20   : > { %s4567_s30 = scalar_lea.vmem %s4566_s27, 4096 }
  0x22   : > { %434 = vmatpush1.bf16.msra.mxu0 %v4268_v8  ;;  %4175 = vmatpush1.bf16.msra.mxu1 %v4268_v8 }
  0x23   : > { %435 = vmatprep.subr.bf16.mxu0 %v4269_v9  ;;  %4168 = vmatprep.subr.bf16.mxu1 %v4269_v9 }
  0x26   : > { %436 = vmatpush1.bf16.msra.mxu0 %v4271_v10  ;;  %4176 = vmatpush1.bf16.msra.mxu1 %v4271_v10 }
  0x27   : > { %437 = vmatprep.subr.bf16.mxu0 %v4272_v11  ;;  %4169 = vmatprep.subr.bf16.mxu1 %v4272_v11 }
  0x2a   : > { %438 = vmatpush1.bf16.msra.mxu0 %v4274_v12  ;;  %4177 = vmatpush1.bf16.msra.mxu1 %v4274_v12 }
  0x2b   : > { %439 = vmatprep.subr.bf16.mxu0 %v4275_v13  ;;  %4170 = vmatprep.subr.bf16.mxu1 %v4275_v13 }
  0x2e   : > { %440 = vmatpush1.bf16.msra.mxu0 %v4277_v14  ;;  %4178 = vmatpush1.bf16.msra.mxu1 %v4277_v14 }
  0x2f   : > { %441 = vmatprep.subr.bf16.mxu0 %v4278_v15  ;;  %4171 = vmatprep.subr.bf16.mxu1 %v4278_v15 }
  0x32   : > { %442 = vmatpush1.bf16.msra.mxu0 %v4280_v16  ;;  %4179 = vmatpush1.bf16.msra.mxu1 %v4280_v16 }
  0x33   : > { %3844 = vmatprep.subr.bf16.mxu1 %v4286_v17 }
  0x35   : > { %460 = vmatmul.mubr.bf16.vlgmr.msra.gmra.mxu0 %v4281_v18  ;;  %500 = vmatmul.mubr.bf16.vlgmr.msra.gmra.mxu1 %v4285_v19 }
  0x36   : > { %469 = vmatprep.mubr.bf16.mxu0 %v4623_v2  ;;  %3845 = vmatpush3.bf16.msra.mxu1 %v4286_v17 }
  0x37   : > { %3846 = vmatprep.subr.bf16.mxu1 %v4287_v20  ;;  %509 = vmatprep.mubr.bf16.mxu1 %v4623_v2 }
  0x3a   : > { %3847 = vmatpush3.bf16.msra.mxu1 %v4287_v20 }
  0x3b   : > { %3848 = vmatprep.subr.bf16.mxu1 %v4289_v21 }
  0x3d   : > { %470 = vmatmul.mubr.bf16.gmra.mxu0 %v4282_v22  ;;  %510 = vmatmul.mubr.bf16.gmra.mxu1 %v4288_v23 }
  0x3e   : > { %479 = vmatprep.mubr.bf16.mxu0 %v4623_v2  ;;  %3849 = vmatpush3.bf16.msra.mxu1 %v4289_v21 }
  0x3f   : > { %3850 = vmatprep.subr.bf16.mxu1 %v4290_v24  ;;  %519 = vmatprep.mubr.bf16.mxu1 %v4623_v2 }
  0x42   : > { %3851 = vmatpush3.bf16.msra.mxu1 %v4290_v24 }
  0x43   : > { %3852 = vmatprep.subr.bf16.mxu1 %v4292_v25 }
  0x45   : > { %480 = vmatmul.mubr.bf16.gmra.mxu0 %v4283_v26  ;;  %520 = vmatmul.mubr.bf16.gmra.mxu1 %v4291_v27 }
  0x46   : > { %489 = vmatprep.mubr.bf16.mxu0 %v4623_v2  ;;  %3853 = vmatpush3.bf16.msra.mxu1 %v4292_v25 }
  0x47   : > { %3854 = vmatprep.subr.bf16.mxu1 %v4293_v28  ;;  %529 = vmatprep.mubr.bf16.mxu1 %v4623_v2 }
  0x4a   : > { %3855 = vmatpush3.bf16.msra.mxu1 %v4293_v28 }
  0x4b   : > { %3856 = vmatprep.subr.bf16.mxu1 %v4295_v29 }
  0x4d   : > { %490 = vmatmul.mubr.bf16.gmra.mxu0 %v4284_v30  ;;  %530 = vmatmul.mubr.bf16.gmra.mxu1 %v4294_v31 }
  0x4e   : > { %3857 = vmatpush3.bf16.msra.mxu1 %v4295_v29  ;;  %3860 = vmatprep.mubr.bf16.mxu1 %v4281_v18 }
  0x4f   : > { %3858 = vmatprep.subr.bf16.mxu1 %v4296_v32 }
  0x52   : > { %3859 = vmatpush3.bf16.msra.mxu1 %v4296_v32 }
  0x55   : > { %3861 = vmatmul.mubr.bf16.vlgmr.msra.gmra.mxu1 %v4282_v22 }
  0x56   : > { %3864 = vmatprep.mubr.bf16.mxu1 %v4283_v26 }
  0x5d   : > { %3865 = vmatmul.mubr.bf16.gmra.mxu1 %v4284_v30 }
  0x5e   : > { %3868 = vmatprep.mubr.bf16.mxu1 %v4285_v19 }
  0x65   : > { %3869 = vmatmul.mubr.bf16.gmra.mxu1 %v4288_v23 }
  0x66   : > { %3872 = vmatprep.mubr.bf16.mxu1 %v4291_v27 }
  0x6d   : > { %3873 = vmatmul.mubr.bf16.gmra.mxu1 %v4294_v31 }
  0xf5   : > { %v461_v33 = vpop.f32.mrf.mxu0  ;;  %v501_v61 = vpop.f32.mrf.mxu1 }
  0xf6   : > { %v637_v36 = vmul.f32 0.088388346, %v461_v33  ;;  %v645_v2 = vmul.f32 0.088388346, %v501_v61 }
  0xf7   : > { %v463_v34 = vpop.f32.mrf.mxu0  ;;  %v503_v1 = vpop.f32.mrf.mxu1 }
  0xf9   : > { %v465_v35 = vpop.f32.mrf.mxu0  ;;  %v505_v3 = vpop.f32.mrf.mxu1 }
  0xfa   : > { %v638_v37 = vmul.f32 0.088388346, %v465_v35  ;;  %v646_v5 = vmul.f32 0.088388346, %v505_v3 }
  0xfb   : > { %v467_v38 = vpop.f32.mrf.mxu0  ;;  %v507_v6 = vpop.f32.mrf.mxu1 }
  0xfc   : > { %v4797_v39 = vpack.c.bf16 %v638_v37, %v637_v36  ;;  %v4805_v47 = vpack.c.bf16 %v467_v38, %v463_v34  ;;  %v4847_v8 = vpack.c.bf16 %v646_v5, %v645_v2  ;;  %v4849_v9 = vpack.c.bf16 %v507_v6, %v503_v1 }
  0xfd   : > { %v471_v40 = vpop.f32.mrf.mxu0  ;;  %v511_v11 = vpop.f32.mrf.mxu1 }
  0xfe   : > { %3884 = vmatprep.mubr.msk.bf16.mxu1 %vm696_vm0, %v4797_v39  ;;  %v639_v62 = vmul.f32 0.088388346, %v471_v40  ;;  %6123 = vst [vmem:[#allocation6_spill] sm:$0xff] %v4847_v8  ;;  %6124 = vst [vmem:[#allocation7_spill] sm:$0xff] %v4849_v9  ;;  %v647_v14 = vmul.f32 0.088388346, %v511_v11 }
  0xff   : > { %v473_v41 = vpop.f32.mrf.mxu0  ;;  %v513_v13 = vpop.f32.mrf.mxu1  ;;  %v710_v20 = vsel %vm696_vm0, %v4805_v47, 0 }
 0x101   : > { %v475_v42 = vpop.f32.mrf.mxu0  ;;  %v515_v15 = vpop.f32.mrf.mxu1 }
 0x102   : > { %v640_v59 = vmul.f32 0.088388346, %v475_v42  ;;  %v648_v16 = vmul.f32 0.088388346, %v515_v15 }
 0x103   : > { %v477_v43 = vpop.f32.mrf.mxu0  ;;  %v517_v17 = vpop.f32.mrf.mxu1 }
 0x104   : > { %v4801_v44 = vpack.c.bf16 %v477_v43, %v473_v41  ;;  %v4835_v0 = vpack.c.bf16 %v640_v59, %v639_v62  ;;  %v4863_v18 = vpack.c.bf16 %v648_v16, %v647_v14  ;;  %v4865_v19 = vpack.c.bf16 %v517_v17, %v513_v13 }
 0x105   : > { %v481_v45 = vpop.f32.mrf.mxu0  ;;  %v521_v21 = vpop.f32.mrf.mxu1 }
 0x106   : > { %990 = vrot.lane.b32.xlu1 %v4801_v44, %s4624_s28  ;;  %v641_v58 = vmul.f32 0.088388346, %v481_v45  ;;  %v713_v10 = vsel %vm696_vm0, %v4801_v44, 0  ;;  %6125 = vst [vmem:[#allocation8_spill] sm:$0xff] %v4863_v18  ;;  %6126 = vst [vmem:[#allocation9_spill] sm:$0xff] %v4865_v19 }
 0x107   : > { %v483_v46 = vpop.f32.mrf.mxu0  ;;  %v523_v22 = vpop.f32.mrf.mxu1  ;;  %v649_v23 = vmul.f32 0.088388346, %v521_v21 }
 0x109   : > { %v485_v48 = vpop.f32.mrf.mxu0  ;;  %v525_v24 = vpop.f32.mrf.mxu1 }
 0x10a   : > { %988 = vrot.lane.b32.xlu1 %v4805_v47, %s4624_s28  ;;  %v642_v57 = vmul.f32 0.088388346, %v485_v48  ;;  %v650_v25 = vmul.f32 0.088388346, %v525_v24 }
 0x10b   : > { %v487_v49 = vpop.f32.mrf.mxu0  ;;  %v527_v26 = vpop.f32.mrf.mxu1 }
 0x10c   : > { %v4817_v56 = vpack.c.bf16 %v487_v49, %v483_v46  ;;  %v4827_v60 = vpack.c.bf16 %v642_v57, %v641_v58  ;;  %v4871_v27 = vpack.c.bf16 %v650_v25, %v649_v23  ;;  %v4873_v28 = vpack.c.bf16 %v527_v26, %v523_v22 }
 0x10d   : > { %v491_v50 = vpop.f32.mrf.mxu0  ;;  %v531_v29 = vpop.f32.mrf.mxu1 }
 0x10e   : > { %v716_v63 = vsel %vm696_vm0, %v4817_v56, 0  ;;  %v643_v7 = vmul.f32 0.088388346, %v491_v50  ;;  %6127 = vst [vmem:[#allocation10_spill] sm:$0xff] %v4871_v27  ;;  %6128 = vst [vmem:[#allocation11_spill] sm:$0xff] %v4873_v28 }
 0x10f   : > { %v493_v51 = vpop.f32.mrf.mxu0  ;;  %v533_v30 = vpop.f32.mrf.mxu1  ;;  %v651_v31 = vmul.f32 0.088388346, %v531_v29 }
 0x111   : > { %v495_v52 = vpop.f32.mrf.mxu0  ;;  %v535_v32 = vpop.f32.mrf.mxu1 }
 0x112   : > { %v644_v4 = vmul.f32 0.088388346, %v495_v52  ;;  %v652_v33 = vmul.f32 0.088388346, %v535_v32 }
 0x113   : > { %v497_v53 = vpop.f32.mrf.mxu0  ;;  %v537_v34 = vpop.f32.mrf.mxu1 }
 0x114   : > { %v4809_v54 = vpack.c.bf16 %v497_v53, %v493_v51  ;;  %v4853_v12 = vpack.c.bf16 %v644_v4, %v643_v7  ;;  %v4879_v35 = vpack.c.bf16 %v652_v33, %v651_v31  ;;  %v4881_v36 = vpack.c.bf16 %v537_v34, %v533_v30 }
 0x115   : > { %v3862_v37 = vpop.f32.mrf.mxu1  ;;  %v677_v33 = vlaneseq }
 0x116   : > { %1333 = vrot.lane.b32.xlu1 %v4809_v54, %s4625_s5  ;;  %994 = vrot.lane.b32.xlu0 %v4809_v54, %s4624_s28  ;;  %v719_v55 = vsel %vm696_vm0, %v4809_v54, 0  ;;  %6129 = vst [vmem:[#allocation12_spill] sm:$0xff] %v4879_v35  ;;  %6130 = vst [vmem:[#allocation13_spill] sm:$0xff] %v4881_v36 }
 0x117   : > { %4180 = vmatprep.subr.msk.bf16.mxu1 %vm696_vm0, %v4809_v54  ;;  %v574_v38 = vpop.f32.mrf.mxu1  ;;  %v678_v34 = vshrl.u32 %v677_v33, 7 }
 0x118   : > { %3877 = vmatpush3.bf16.xpose.msra.mxu1 %v719_v55 }
 0x119   : > { %4181 = vmatprep.subr.msk.bf16.mxu1 %vm696_vm0, %v4817_v56  ;;  %v3863_v40 = vpop.f32.mrf.mxu1 }
 0x11a   : > { %1331 = vrot.lane.b32.xlu1 %v4817_v56, %s4625_s5  ;;  %992 = vrot.lane.b32.xlu0 %v4817_v56, %s4624_s28  ;;  %v4885_v41 = vpack.c.bf16 %v3863_v40, %v3862_v37  ;;  %v680_v37 = vadd.s32 16, %v678_v34 }
 0x11b   : > { %v577_v42 = vpop.f32.mrf.mxu1 }
 0x11c   : > { %6131 = vst [vmem:[#allocation14_spill] sm:$0xff] %v4885_v41  ;;  %v4887_v43 = vpack.c.bf16 %v577_v42, %v574_v38  ;;  %v687_v38 = vand.u32 127, %v677_v33 }
 0x11d   : > { %v3866_v45 = vpop.f32.mrf.mxu1 }
 0x11e   : > { %980 = vrot.lane.b32.xlu1 %v4827_v60, %s4624_s28  ;;  %976 = vrot.lane.b32.xlu0 %v4797_v39, %s4624_s28  ;;  %6132 = vst [vmem:[#allocation15_spill] sm:$0xff] %v4887_v43  ;;  %vm4949_vm1 = vcmp.le.s32.totalorder %v687_v38, %v680_v37  ;;  %vm4953_vm3 = vcmp.le.s32.totalorder %v687_v38, %v678_v34 }
 0x11f   : > { %v590_v46 = vpop.f32.mrf.mxu1 }
 0x120   : > { %3879 = vmatpush3.bf16.xpose.msra.mxu1 %v716_v63 }
 0x121   : > { %4182 = vmatprep.subr.msk.bf16.mxu1 %vm696_vm0, %v4801_v44  ;;  %v3867_v48 = vpop.f32.mrf.mxu1 }
 0x122   : > { %1327 = vrot.lane.b32.xlu1 %v4805_v47, %s4625_s5  ;;  %978 = vrot.lane.b32.xlu0 %v4835_v0, %s4624_s28  ;;  %v4893_v49 = vpack.c.bf16 %v3867_v48, %v3866_v45 }
 0x123   : > { %v593_v50 = vpop.f32.mrf.mxu1 }
 0x124   : > { %6133 = vst [vmem:[#allocation16_spill] sm:$0xff] %v4893_v49  ;;  %v4901_v51 = vpack.c.bf16 %v593_v50, %v590_v46  ;;  %v681_v50 = vadd.s32 24, %v678_v34 }
 0x125   : > { %v3870_v52 = vpop.f32.mrf.mxu1 }
 0x126   : > { %1321 = vrot.lane.b32.xlu1 %v4835_v0, %s4625_s5  ;;  %1329 = vrot.lane.b32.xlu0 %v4801_v44, %s4625_s5  ;;  %6134 = vst [vmem:[#allocation17_spill] sm:$0xff] %v4901_v51  ;;  %vm4970_vm4 = vcmp.le.s32.totalorder %v687_v38, %v681_v50 }
 0x127   : > { %v606_v53 = vpop.f32.mrf.mxu1 }
 0x128   : > { %3881 = vmatpush3.bf16.xpose.msra.mxu1 %v713_v10 }
 0x129   : > { %4183 = vmatprep.subr.msk.bf16.mxu1 %vm696_vm0, %v4805_v47  ;;  %v3871_v55 = vpop.f32.mrf.mxu1 }
 0x12a   : > { %1325 = vrot.lane.b32.xlu1 %v4853_v12, %s4625_s5  ;;  %982 = vrot.lane.b32.xlu0 %v4853_v12, %s4624_s28  ;;  %v4908_v57 = vpack.c.bf16 %v3871_v55, %v3870_v52  ;;  %v679_v52 = vadd.s32 8, %v678_v34 }
 0x12b   : > { %v609_v58 = vpop.f32.mrf.mxu1 }
 0x12c   : > { %v4913_v59 = vpack.c.bf16 %v609_v58, %v606_v53  ;;  %vm4974_vm5 = vcmp.le.s32.totalorder %v687_v38, %v679_v52 }
 0x12d   : > { %v3874_v61 = vpop.f32.mrf.mxu1 }
 0x12e   : > { %1319 = vrot.lane.b32.xlu0 %v4797_v39, %s4625_s5  ;;  %1189 = vrot.lane.b32.xlu1 %v4887_v43, %s4624_s28 }
 0x12f   : > { %v4916_v62 = vpop.f32.mrf.mxu1 }
 0x130   : > { %3883 = vmatpush3.bf16.xpose.msra.mxu1 %v710_v20 }
 0x131   : > { %3892 = vmatprep.subr.bf16.mxu1 %v4893_v49  ;;  %v3875_v63 = vpop.f32.mrf.mxu1 }
 0x132   : > { %1323 = vrot.lane.b32.xlu0 %v4827_v60, %s4625_s5  ;;  %1195 = vrot.lane.b32.xlu1 %v4893_v49, %s4624_s28  ;;  %v4919_v1 = vpack.c.bf16 %v3875_v63, %v3874_v61  ;;  %v684_v63 = vadd.s32 48, %v678_v34 }
 0x133   : > { %v4945_v40 = vpop.f32.mrf.mxu1 }
 0x134   : > { %vm4980_vm6 = vcmp.le.s32.totalorder %v687_v38, %v684_v63 }
 0x136   : > { %1191 = vrot.lane.b32.xlu0 %v4885_v41, %s4624_s28  ;;  %1530 = vrot.lane.b32.xlu1 %v4893_v49, %s4625_s5 }
 0x137   : > { %3885 = vmatmul.mubr.msk.bf16.vlgmr.msra.gmra.mxu1 %vm696_vm0, %v4835_v0 }
 0x138   : > { %3888 = vmatprep.mubr.msk.bf16.mxu1 %vm696_vm0, %v4827_v60  ;;  %3893 = vmatpush3.bf16.msra.mxu1 %v4893_v49 }
 0x139   : > { %3894 = vmatprep.subr.bf16.mxu1 %v4901_v51 }
 0x13a   : > { %1193 = vrot.lane.b32.xlu1 %v4901_v51, %s4624_s28 }
 0x13c   : > { %3895 = vmatpush3.bf16.msra.mxu1 %v4901_v51 }
 0x13d   : > { %3896 = vmatprep.subr.bf16.mxu1 %v4885_v41 }
 0x13e   : > { %1528 = vrot.lane.b32.xlu1 %v4901_v51, %s4625_s5 }
 0x13f   : > { %3889 = vmatmul.mubr.msk.bf16.gmra.mxu1 %vm696_vm0, %v4853_v12 }
 0x140   : > { %3897 = vmatpush3.bf16.msra.mxu1 %v4885_v41 }
 0x141   : > { %3898 = vmatprep.subr.bf16.mxu1 %v4887_v43 }
 0x144   : > { %3899 = vmatpush3.bf16.msra.mxu1 %v4887_v43 }
 0x178   : > { %v991_v7 = vpop.permute.xlu1 %990 }
 0x179   : > { %v1012_v11 = vsel %vm696_vm0, %v991_v7, 0 }
 0x17c   : > { %v989_v10 = vpop.permute.xlu1 %988 }
 0x17d   : > { %v1009_v15 = vsel %vm696_vm0, %v989_v10, 0 }
 0x188   : > { %v995_v2 = vpop.permute.xlu0 %994  ;;  %v1334_v13 = vpop.permute.xlu1 %1333 }
 0x189   : > { %4184 = vmatprep.subr.msk.bf16.mxu0 %vm696_vm0, %v995_v2  ;;  %v1018_v3 = vsel %vm696_vm0, %v995_v2, 0  ;;  %v1357_v21 = vsel %vm696_vm0, %v1334_v13, 0 }
 0x18a   : > { %3909 = vmatpush3.bf16.xpose.msra.mxu0 %v1018_v3 }
 0x18c   : > { %v993_v4 = vpop.permute.xlu0 %992  ;;  %v1332_v16 = vpop.permute.xlu1 %1331 }
 0x18d   : > { %4185 = vmatprep.subr.msk.bf16.mxu0 %vm696_vm0, %v993_v4  ;;  %v1015_v6 = vsel %vm696_vm0, %v993_v4, 0  ;;  %v1354_v24 = vsel %vm696_vm0, %v1332_v16, 0 }
 0x190   : > { %v977_v5 = vpop.permute.xlu0 %976  ;;  %v981_v20 = vpop.permute.xlu1 %980 }
 0x191   : > { %3916 = vmatprep.mubr.msk.bf16.mxu0 %vm696_vm0, %v977_v5 }
 0x192   : > { %3911 = vmatpush3.bf16.xpose.msra.mxu0 %v1015_v6 }
 0x193   : > { %4186 = vmatprep.subr.msk.bf16.mxu0 %vm696_vm0, %v991_v7 }
 0x194   : > { %v979_v14 = vpop.permute.xlu0 %978  ;;  %v1328_v26 = vpop.permute.xlu1 %1327 }
 0x195   : > { %v1348_v29 = vsel %vm696_vm0, %v1328_v26, 0 }
 0x198   : > { %v1330_v17 = vpop.permute.xlu0 %1329  ;;  %v1322_v30 = vpop.permute.xlu1 %1321 }
 0x199   : > { %v1351_v25 = vsel %vm696_vm0, %v1330_v17, 0 }
 0x19a   : > { %3913 = vmatpush3.bf16.xpose.msra.mxu0 %v1012_v11  ;;  %v682_v11 = vadd.s32 32, %v678_v34 }
 0x19b   : > { %4187 = vmatprep.subr.msk.bf16.mxu0 %vm696_vm0, %v989_v10 }
 0x19c   : > { %v983_v22 = vpop.permute.xlu0 %982  ;;  %v1326_v32 = vpop.permute.xlu1 %1325  ;;  %vm4998_vm7 = vcmp.le.s32.totalorder %v687_v38, %v682_v11 }
 0x1a0   : > { %v1320_v23 = vpop.permute.xlu0 %1319  ;;  %v4947_v42 = vpop.permute.xlu1 %1189 }
 0x1a2   : > { %3915 = vmatpush3.bf16.xpose.msra.mxu0 %v1009_v15 }
 0x1a3   : > { %4188 = vmatprep.subr.msk.bf16.mxu0 %vm696_vm0, %v1334_v13  ;;  %v685_v13 = vadd.s32 56, %v678_v34 }
 0x1a4   : > { %v1324_v31 = vpop.permute.xlu0 %1323  ;;  %v4961_v55 = vpop.permute.xlu1 %1195 }
 0x1a5   : > { %3924 = vmatprep.subr.bf16.mxu1 %v4961_v55  ;;  %vm5004_vm8 = vcmp.le.s32.totalorder %v687_v38, %v685_v13 }
 0x1a9   : > { %3917 = vmatmul.mubr.msk.bf16.vlgmr.msra.gmra.mxu0 %vm696_vm0, %v979_v14 }
 0x1aa   : > { %3920 = vmatprep.mubr.msk.bf16.mxu0 %vm696_vm0, %v981_v20  ;;  %3941 = vmatpush3.bf16.xpose.msra.mxu0 %v1357_v21  ;;  %v683_v20 = vadd.s32 40, %v678_v34 }
 0x1ab   : > { %4189 = vmatprep.subr.msk.bf16.mxu0 %vm696_vm0, %v1332_v16 }
 0x1ac   : > { %vm5010_vm9 = vcmp.le.s32.totalorder %v687_v38, %v683_v20 }
 0x1b1   : > { %3921 = vmatmul.mubr.msk.bf16.gmra.mxu0 %vm696_vm0, %v983_v22 }
 0x1b2   : > { %3943 = vmatpush3.bf16.xpose.msra.mxu0 %v1354_v24  ;;  %3948 = vmatprep.mubr.msk.bf16.mxu0 %vm696_vm0, %v1320_v23 }
 0x1b3   : > { %4190 = vmatprep.subr.msk.bf16.mxu0 %vm696_vm0, %v1330_v17 }
 0x1ba   : > { %3945 = vmatpush3.bf16.xpose.msra.mxu0 %v1351_v25  ;;  %v6147_v25 = vmov 0 }
 0x1bb   : > { %4191 = vmatprep.subr.msk.bf16.mxu0 %vm696_vm0, %v1328_v26  ;;  %v6148_v25 = vsel %vm5004_vm8, 4294967295, %v6147_v25 }
 0x1bc   : > { %6149 = vst [vmem:[#allocation18_spill] sm:$0xff] %v6148_v25 }
 0x1c2   : > { %3947 = vmatpush3.bf16.xpose.msra.mxu0 %v1348_v29 }
 0x1c9   : > { %3949 = vmatmul.mubr.msk.bf16.vlgmr.msra.gmra.mxu0 %vm696_vm0, %v1322_v30  ;;  %v6150_v30 = vmov 0 }
 0x1ca   : > { %3952 = vmatprep.mubr.msk.bf16.mxu0 %vm696_vm0, %v1324_v31  ;;  %v6151_v30 = vsel %vm5010_vm9, 4294967295, %v6150_v30 }
 0x1cb   : > { %6152 = vst [vmem:[#allocation19_spill] sm:$0xff] %v6151_v30 }
 0x1d1   : > { %3953 = vmatmul.mubr.msk.bf16.gmra.mxu0 %vm696_vm0, %v1326_v32 }
 0x1f7   : > { %v3886_v46 = vpop.f32.mrf.mxu1 }
 0x1f8   : > { %v4959_v53 = vsel %vm4949_vm1, %v3886_v46, -1e+30 }
 0x1f9   : > { %v755_v58 = vpop.f32.mrf.mxu1  ;;  %v801_v61 = vsel %vm794_vm2, %v4959_v53, -inf }
 0x1fa   : > { %v4968_v2 = vsel %vm4953_vm3, %v755_v58, -1e+30  ;;  %802 = vmax.xlane.f32.xlu0 %v801_v61 }
 0x1fb   : > { %v3887_v4 = vpop.f32.mrf.mxu1  ;;  %v795_v7 = vsel %vm794_vm2, %v4968_v2, -inf }
 0x1fc   : > { %v4986_v14 = vsel %vm4970_vm4, %v3887_v4, -1e+30 }
 0x1fd   : > { %v758_v6 = vpop.f32.mrf.mxu1  ;;  %v804_v24 = vsel %vm794_vm2, %v4986_v14, -inf }
 0x1fe   : > { %v4990_v15 = vsel %vm4974_vm5, %v758_v6, -1e+30  ;;  %796 = vmax.xlane.f32.xlu0 %v795_v7 }
 0x1ff   : > { %v3890_v16 = vpop.f32.mrf.mxu1  ;;  %v798_v17 = vsel %vm794_vm2, %v4990_v15, -inf }
 0x200   : > { %v4996_v21 = vsel %vm4980_vm6, %v3890_v16, -1e+30  ;;  %799 = vmax.xlane.f32.xlu1 %v798_v17 }
 0x201   : > { %v771_v23 = vpop.f32.mrf.mxu1  ;;  %v813_v29 = vsel %vm794_vm2, %v4996_v21, -inf }
 0x202   : > { %805 = vmax.xlane.f32.xlu0 %v804_v24  ;;  %v5016_v31 = vsel %vm4998_vm7, %v771_v23, -1e+30 }
 0x203   : > { %v3891_v26 = vpop.f32.mrf.mxu1  ;;  %v807_v38 = vsel %vm794_vm2, %v5016_v31, -inf }
 0x204   : > { %v5020_v32 = vsel %vm5004_vm8, %v3891_v26, -1e+30  ;;  %814 = vmax.xlane.f32.xlu1 %v813_v29 }
 0x205   : > { %v774_v33 = vpop.f32.mrf.mxu1  ;;  %v816_v34 = vsel %vm794_vm2, %v5020_v32, -inf }
 0x206   : > { %v5026_v37 = vsel %vm5010_vm9, %v774_v33, -1e+30  ;;  %817 = vmax.xlane.f32.xlu0 %v816_v34 }
 0x207   : > { %v810_v46 = vsel %vm794_vm2, %v5026_v37, -inf }
 0x208   : > { %808 = vmax.xlane.f32.xlu1 %v807_v38 }
 0x20a   : > { %811 = vmax.xlane.f32.xlu0 %v810_v46 }
 0x269   : > { %v3918_v50 = vpop.f32.mrf.mxu0 }
 0x26a   : > { %v5034_v52 = vsel %vm4949_vm1, %v3918_v50, -1e+30 }
 0x26b   : > { %v1054_v58 = vpop.f32.mrf.mxu0  ;;  %v1099_v61 = vsel %vm794_vm2, %v5034_v52, -inf }
 0x26c   : > { %v5040_v63 = vsel %vm4953_vm3, %v1054_v58, -1e+30  ;;  %1100 = vmax.xlane.f32.xlu1 %v1099_v61  ;;  %v5074_v58 = vpop.permute.xlu1 %1530 }
 0x26d   : > { %v3919_v4 = vpop.f32.mrf.mxu0  ;;  %v1093_v11 = vsel %vm794_vm2, %v5040_v63, -inf }
 0x26e   : > { %v5044_v6 = vsel %vm4970_vm4, %v3919_v4, -1e+30 }
 0x26f   : > { %v1057_v7 = vpop.f32.mrf.mxu0  ;;  %v1102_v13 = vsel %vm794_vm2, %v5044_v6, -inf }
 0x270   : > { %v5052_v16 = vsel %vm4974_vm5, %v1057_v7, -1e+30  ;;  %1094 = vmax.xlane.f32.xlu1 %v1093_v11  ;;  %1103 = vmax.xlane.f32.xlu0 %v1102_v13  ;;  %v5082_v7 = vpop.permute.xlu0 %1191  ;;  %v5084_v11 = vpop.permute.xlu1 %1193 }
 0x271   : > { %v3922_v17 = vpop.f32.mrf.mxu0  ;;  %v1096_v26 = vsel %vm794_vm2, %v5052_v16, -inf }
 0x272   : > { %v5056_v20 = vsel %vm4980_vm6, %v3922_v17, -1e+30 }
 0x273   : > { %v1070_v23 = vpop.f32.mrf.mxu0  ;;  %v1111_v24 = vsel %vm794_vm2, %v5056_v20, -inf }
 0x274   : > { %v5064_v29 = vsel %vm4998_vm7, %v1070_v23, -1e+30  ;;  %1112 = vmax.xlane.f32.xlu1 %v1111_v24  ;;  %1097 = vmax.xlane.f32.xlu0 %v1096_v26  ;;  %v5086_v17 = vpop.permute.xlu1 %1528 }
 0x275   : > { %v3923_v33 = vpop.f32.mrf.mxu0  ;;  %v1105_v46 = vsel %vm794_vm2, %v5064_v29, -inf }
 0x276   : > { %v5068_v34 = vsel %vm5004_vm8, %v3923_v33, -1e+30 }
 0x277   : > { %v1073_v38 = vpop.f32.mrf.mxu0  ;;  %v1114_v50 = vsel %vm794_vm2, %v5068_v34, -inf }
 0x278   : > { %v5078_v61 = vsel %vm5010_vm9, %v1073_v38, -1e+30  ;;  %1106 = vmax.xlane.f32.xlu1 %v1105_v46  ;;  %1115 = vmax.xlane.f32.xlu0 %v1114_v50 }
 0x279   : > { %v1108_v4 = vsel %vm794_vm2, %v5078_v61, -inf }
 0x27c   : > { %1109 = vmax.xlane.f32.xlu0 %v1108_v4 }
 0x283   : > { %v803_v13 = vpop.xlane.xlu0 %802 }
 0x287   : > { %v797_v23 = vpop.xlane.xlu0 %796 }
 0x289   : > { %v800_v24 = vpop.xlane.xlu1 %799  ;;  %v3950_v26 = vpop.f32.mrf.mxu0 }
 0x28a   : > { %v5090_v33 = vsel %vm4949_vm1, %v3950_v26, -1e+30  ;;  %v820_v38 = vsub.f32 %v4990_v15, %v800_v24 }
 0x28b   : > { %v806_v46 = vpop.xlane.xlu0 %805  ;;  %v1393_v50 = vpop.f32.mrf.mxu0  ;;  %v1438_v4 = vsel %vm794_vm2, %v5090_v33, -inf }
 0x28c   : > { %v822_v35 = vsub.f32 %v4986_v14, %v806_v46  ;;  %v5098_v27 = vsel %vm4953_vm3, %v1393_v50, -1e+30  ;;  %1439 = vmax.xlane.f32.xlu1 %v1438_v4  ;;  %v829_v9 = vmul.f32 1.442695, %v820_v38 }
 0x28d   : > { %v3951_v18 = vpop.f32.mrf.mxu0  ;;  %v1432_v19 = vsel %vm794_vm2, %v5098_v27, -inf }
 0x28e   : > { %v833_v8 = vmul.f32 1.442695, %v822_v35  ;;  %v5102_v26 = vsel %vm4970_vm4, %v3951_v18, -1e+30 }
 0x28f   : > { %v818_v15 = vpop.xlane.xlu0 %817  ;;  %v1396_v24 = vpop.f32.mrf.mxu0  ;;  %v1441_v14 = vsel %vm794_vm2, %v5102_v26, -inf }
 0x290   : > { %4305 = vpow2.f32 %v833_v8  ;;  %v826_v46 = vsub.f32 %v5020_v32, %v818_v15  ;;  %v5111_v50 = vsel %vm4974_vm5, %v1396_v24, -1e+30  ;;  %1433 = vmax.xlane.f32.xlu1 %v1432_v19  ;;  %1442 = vmax.xlane.f32.xlu0 %v1441_v14 }
 0x291   : > { %v3954_v18 = vpop.f32.mrf.mxu0  ;;  %4307 = vpow2.f32 %v829_v9  ;;  %v1435_v28 = vsel %vm794_vm2, %v5111_v50, -inf }
 0x292   : > { %v841_v35 = vmul.f32 1.442695, %v826_v46 }
 0x293   : > { %v812_v38 = vpop.xlane.xlu0 %811  ;;  %v1409_v4 = vpop.f32.mrf.mxu0 }
 0x294   : > { %v824_v36 = vsub.f32 %v5026_v37, %v812_v38  ;;  %1436 = vmax.xlane.f32.xlu0 %v1435_v28  ;;  %4309 = vpow2.f32 %v841_v35 }
 0x295   : > { %v3955_v8 = vpop.f32.mrf.mxu0 }
 0x296   : > { %v5118_v32 = vsel %vm5004_vm8, %v3955_v8, -1e+30  ;;  %v837_v15 = vmul.f32 1.442695, %v824_v36 }
 0x297   : > { %v1412_v19 = vpop.f32.mrf.mxu0  ;;  %v1453_v9 = vsel %vm794_vm2, %v5118_v32, -inf }
 0x298   : > { %v5124_v24 = vsel %vm5010_vm9, %v1412_v19, -1e+30  ;;  %1454 = vmax.xlane.f32.xlu0 %v1453_v9  ;;  %4311 = vpow2.f32 %v837_v15  ;;  %v821_v19 = vsub.f32 %v4959_v53, %v803_v13  ;;  %v815_v9 = vpop.xlane.xlu1 %814 }
 0x299   : > { %v1447_v28 = vsel %vm794_vm2, %v5124_v24, -inf }
 0x29c   : > { %1448 = vmax.xlane.f32.xlu0 %v1447_v28  ;;  %v831_v28 = vmul.f32 1.442695, %v821_v19  ;;  %v809_v51 = vpop.xlane.xlu1 %808 }
 0x29d   : > { %v5128_v37 = vpop.eup %4305  ;;  %v823_v30 = vsub.f32 %v5016_v31, %v809_v51 }
 0x29e   : > { %v852_v14 = vsel %vm794_vm2, %v5128_v37, 0.0  ;;  %v5132_v36 = vpop.eup %4307  ;;  %4313 = vpow2.f32 %v831_v28 }
 0x29f   : > { %v846_v46 = vsel %vm794_vm2, %v5132_v36, 0.0 }
 0x2a0   : > { %853 = vadd.xlane.f32.xlu0 %v852_v14  ;;  %v819_v14 = vsub.f32 %v4968_v2, %v797_v23  ;;  %v5158_v2 = vsel %vm4998_vm7, %v1409_v4, -1e+30 }
 0x2a1   : > { %1526 = vrot.lane.b32.xlu1 %v4885_v41, %s4625_s5  ;;  %v5138_v35 = vpop.eup %4309 }
 0x2a2   : > { %v864_v38 = vsel %vm794_vm2, %v5138_v35, 0.0  ;;  %v827_v41 = vmul.f32 1.442695, %v819_v14 }
 0x2a4   : > { %847 = vadd.xlane.f32.xlu0 %v846_v46  ;;  %v825_v46 = vsub.f32 %v4996_v21, %v815_v9  ;;  %4315 = vpow2.f32 %v827_v41  ;;  %v1444_v41 = vsel %vm794_vm2, %v5158_v2, -inf }
 0x2a5   : > { %v5142_v8 = vpop.eup %4311 }
 0x2a6   : > { %v858_v15 = vsel %vm794_vm2, %v5142_v8, 0.0  ;;  %v839_v49 = vmul.f32 1.442695, %v825_v46 }
 0x2a8   : > { %865 = vadd.xlane.f32.xlu0 %v864_v38  ;;  %v5152_v38 = vsel %vm4980_vm6, %v3954_v18, -1e+30  ;;  %4317 = vpow2.f32 %v839_v49 }
 0x2a9   : > { %v1450_v53 = vsel %vm794_vm2, %v5152_v38, -inf }
 0x2ab   : > { %v5162_v21 = vpop.eup %4313 }
 0x2ac   : > { %859 = vadd.xlane.f32.xlu0 %v858_v15  ;;  %v835_v15 = vmul.f32 1.442695, %v823_v30  ;;  %v849_v51 = vsel %vm794_vm2, %v5162_v21, 0.0 }
 0x2ae   : > { %4319 = vpow2.f32 %v835_v15 }
 0x2b1   : > { %v5166_v49 = vpop.eup %4315 }
 0x2b2   : > { %v843_v30 = vsel %vm794_vm2, %v5166_v49, 0.0 }
 0x2b5   : > { %v5170_v31 = vpop.eup %4317 }
 0x2b6   : > { %v861_v13 = vsel %vm794_vm2, %v5170_v31, 0.0 }
 0x2bb   : > { %v5174_v23 = vpop.eup %4319 }
 0x2bc   : > { %v855_v18 = vsel %vm794_vm2, %v5174_v23, 0.0 }
 0x2c5   : > { %1451 = vmax.xlane.f32.xlu1 %v1450_v53 }
 0x2c9   : > { %1445 = vmax.xlane.f32.xlu1 %v1444_v41 }
 0x2cd   : > { %850 = vadd.xlane.f32.xlu1 %v849_v51 }
 0x2d1   : > { %844 = vadd.xlane.f32.xlu1 %v843_v30 }
 0x2d5   : > { %862 = vadd.xlane.f32.xlu1 %v861_v13 }
 0x2d9   : > { %856 = vadd.xlane.f32.xlu1 %v855_v18 }
 0x2f5   : > { %v1101_v4 = vpop.xlane.xlu1 %1100 }
 0x2f6   : > { %v1119_v19 = vsub.f32 %v5034_v52, %v1101_v4 }
 0x2f8   : > { %v1129_v9 = vmul.f32 1.442695, %v1119_v19 }
 0x2f9   : > { %v1095_v28 = vpop.xlane.xlu1 %1094  ;;  %v1104_v14 = vpop.xlane.xlu0 %1103 }
 0x2fa   : > { %4321 = vpow2.f32 %v1129_v9  ;;  %v1117_v46 = vsub.f32 %v5040_v63, %v1095_v28  ;;  %v1120_v15 = vsub.f32 %v5044_v6, %v1104_v14 }
 0x2fc   : > { %v1125_v53 = vmul.f32 1.442695, %v1117_v46  ;;  %v1131_v41 = vmul.f32 1.442695, %v1120_v15 }
 0x2fd   : > { %v1113_v51 = vpop.xlane.xlu1 %1112  ;;  %v1098_v30 = vpop.xlane.xlu0 %1097 }
 0x2fe   : > { %4323 = vpow2.f32 %v1125_v53  ;;  %v1123_v13 = vsub.f32 %v5056_v20, %v1113_v51  ;;  %v1118_v18 = vsub.f32 %v5052_v16, %v1098_v30 }
 0x2ff   : > { %4325 = vpow2.f32 %v1131_v41 }
 0x300   : > { %v1137_v25 = vmul.f32 1.442695, %v1123_v13  ;;  %v1127_v52 = vmul.f32 1.442695, %v1118_v18 }
 0x301   : > { %v1107_v4 = vpop.xlane.xlu1 %1106  ;;  %v1116_v19 = vpop.xlane.xlu0 %1115 }
 0x302   : > { %4327 = vpow2.f32 %v1137_v25  ;;  %v1121_v9 = vsub.f32 %v5064_v29, %v1107_v4  ;;  %v1124_v63 = vsub.f32 %v5068_v34, %v1116_v19 }
 0x303   : > { %4329 = vpow2.f32 %v1127_v52 }
 0x304   : > { %v1133_v6 = vmul.f32 1.442695, %v1121_v9  ;;  %v1139_v28 = vmul.f32 1.442695, %v1124_v63 }
 0x305   : > { %v1110_v14 = vpop.xlane.xlu0 %1109 }
 0x306   : > { %4331 = vpow2.f32 %v1133_v6  ;;  %v1122_v46 = vsub.f32 %v5078_v61, %v1110_v14 }
 0x307   : > { %v5186_v20 = vpop.eup %4321  ;;  %4333 = vpow2.f32 %v1139_v28 }
 0x308   : > { %v1135_v16 = vmul.f32 1.442695, %v1122_v46  ;;  %v1147_v15 = vsel %vm794_vm2, %v5186_v20, 0.0 }
 0x309   : > { %1148 = vadd.xlane.f32.xlu1 %v1147_v15 }
 0x30a   : > { %4335 = vpow2.f32 %v1135_v16 }
 0x30b   : > { %v5190_v25 = vpop.eup %4323 }
 0x30c   : > { %v5192_v29 = vpop.eup %4325  ;;  %v1141_v34 = vsel %vm794_vm2, %v5190_v25, 0.0 }
 0x30d   : > { %1142 = vadd.xlane.f32.xlu1 %v1141_v34  ;;  %v1150_v61 = vsel %vm794_vm2, %v5192_v29, 0.0 }
 0x30e   : > { %1151 = vadd.xlane.f32.xlu0 %v1150_v61 }
 0x30f   : > { %v5198_v53 = vpop.eup %4327 }
 0x310   : > { %v5200_v41 = vpop.eup %4329  ;;  %v1159_v51 = vsel %vm794_vm2, %v5198_v53, 0.0 }
 0x311   : > { %1160 = vadd.xlane.f32.xlu1 %v1159_v51  ;;  %v1144_v30 = vsel %vm794_vm2, %v5200_v41, 0.0 }
 0x312   : > { %1145 = vadd.xlane.f32.xlu0 %v1144_v30 }
 0x313   : > { %v5206_v13 = vpop.eup %4331 }
 0x314   : > { %v5208_v18 = vpop.eup %4333  ;;  %v1153_v52 = vsel %vm794_vm2, %v5206_v13, 0.0 }
 0x315   : > { %1154 = vadd.xlane.f32.xlu1 %v1153_v52  ;;  %v1440_v4 = vpop.xlane.xlu1 %1439  ;;  %v1162_v19 = vsel %vm794_vm2, %v5208_v18, 0.0 }
 0x316   : > { %v1458_v9 = vsub.f32 %v5090_v33, %v1440_v4  ;;  %1163 = vadd.xlane.f32.xlu0 %v1162_v19 }
 0x317   : > { %v5215_v63 = vpop.eup %4335 }
 0x318   : > { %v1468_v6 = vmul.f32 1.442695, %v1458_v9  ;;  %v1156_v28 = vsel %vm794_vm2, %v5215_v63, 0.0 }
 0x319   : > { %v1434_v14 = vpop.xlane.xlu1 %1433  ;;  %v1443_v46 = vpop.xlane.xlu0 %1442 }
 0x31a   : > { %4337 = vpow2.f32 %v1468_v6  ;;  %v1456_v16 = vsub.f32 %v5098_v27, %v1434_v14  ;;  %1157 = vadd.xlane.f32.xlu0 %v1156_v28  ;;  %v1459_v15 = vsub.f32 %v5102_v26, %v1443_v46 }
 0x31c   : > { %v1464_v34 = vmul.f32 1.442695, %v1456_v16  ;;  %v1470_v61 = vmul.f32 1.442695, %v1459_v15 }
 0x31d   : > { %v1437_v51 = vpop.xlane.xlu0 %1436  ;;  %v5242_v28 = vpop.permute.xlu1 %1526 }
 0x31e   : > { %4339 = vpow2.f32 %v1464_v34  ;;  %v1457_v33 = vsub.f32 %v5111_v50, %v1437_v51 }
 0x31f   : > { %4341 = vpow2.f32 %v1470_v61 }
 0x320   : > { %v1466_v30 = vmul.f32 1.442695, %v1457_v33 }
 0x321   : > { %v1455_v6 = vpop.xlane.xlu0 %1454 }
 0x322   : > { %4343 = vpow2.f32 %v1466_v30  ;;  %v1463_v46 = vsub.f32 %v5118_v32, %v1455_v6 }
 0x324   : > { %v1478_v15 = vmul.f32 1.442695, %v1463_v46 }
 0x326   : > { %1668 = vrot.lane.b32.xlu1 %v4809_v54, %s4626_s6  ;;  %4345 = vpow2.f32 %v1478_v15 }
 0x327   : > { %v5224_v52 = vpop.eup %4337 }
 0x328   : > { %v1486_v27 = vsel %vm794_vm2, %v5224_v52, 0.0 }
 0x329   : > { %1487 = vadd.xlane.f32.xlu0 %v1486_v27 }
 0x32a   : > { %1666 = vrot.lane.b32.xlu1 %v4817_v56, %s4626_s6  ;;  %v1449_v56 = vpop.xlane.xlu0 %1448 }
 0x32b   : > { %v5230_v26 = vpop.eup %4339  ;;  %v1461_v30 = vsub.f32 %v5124_v24, %v1449_v56 }
 0x32c   : > { %v1480_v50 = vsel %vm794_vm2, %v5230_v26, 0.0  ;;  %v5234_v4 = vpop.eup %4341 }
 0x32d   : > { %1481 = vadd.xlane.f32.xlu0 %v1480_v50  ;;  %v1489_v54 = vsel %vm794_vm2, %v5234_v4, 0.0 }
 0x32e   : > { %v854_v14 = vpop.xlane.xlu0 %853 }
 0x32f   : > { %v5238_v19 = vpop.eup %4343 }
 0x330   : > { %v1483_v9 = vsel %vm794_vm2, %v5238_v19, 0.0 }
 0x331   : > { %1490 = vadd.xlane.f32.xlu0 %v1489_v54 }
 0x332   : > { %v848_v61 = vpop.xlane.xlu0 %847 }
 0x333   : > { %4347 = vrcp.f32 %v848_v61 }
 0x335   : > { %1484 = vadd.xlane.f32.xlu0 %v1483_v9 }
 0x336   : > { %v866_v9 = vpop.xlane.xlu0 %865 }
 0x34b   : > { %1524 = vrot.lane.b32.xlu0 %v4887_v43, %s4625_s5  ;;  %v1474_v43 = vmul.f32 1.442695, %v1461_v30 }
 0x34e   : > { %v1452_v16 = vpop.xlane.xlu1 %1451 }
 0x34f   : > { %v1462_v34 = vsub.f32 %v5152_v38, %v1452_v16  ;;  %v860_v38 = vpop.xlane.xlu0 %859 }
 0x351   : > { %v1476_v27 = vmul.f32 1.442695, %v1462_v34 }
 0x352   : > { %v1446_v51 = vpop.xlane.xlu1 %1445 }
 0x353   : > { %v1460_v33 = vsub.f32 %v5158_v2, %v1446_v51  ;;  %v5250_v2 = vpop.eup %4345 }
 0x354   : > { %v4348_v56 = vpop.eup %4347 }
 0x355   : > { %v1472_v50 = vmul.f32 1.442695, %v1460_v33  ;;  %v1501_v33 = vsel %vm794_vm2, %v5250_v2, 0.0 }
 0x356   : > { %v851_v54 = vpop.xlane.xlu1 %850 }
 0x357   : > { %4349 = vpow2.f32 %v1472_v50 }
 0x358   : > { %4351 = vrcp.f32 %v851_v54 }
 0x359   : > { %4353 = vpow2.f32 %v1476_v27  ;;  %v876_v27 = vmul.f32 %v4348_v56, %v5132_v36 }
 0x35a   : > { %4355 = vrcp.f32 %v854_v14  ;;  %v845_v32 = vpop.xlane.xlu1 %844 }
 0x35b   : > { %4357 = vrcp.f32 %v845_v32 }
 0x35c   : > { %4359 = vpow2.f32 %v1474_v43 }
 0x35e   : > { %v863_v6 = vpop.xlane.xlu1 %862 }
 0x35f   : > { %4361 = vrcp.f32 %v863_v6 }
 0x360   : > { %4363 = vrcp.f32 %v860_v38 }
 0x361   : > { %4365 = vrcp.f32 %v866_v9 }
 0x362   : > { %v857_v24 = vpop.xlane.xlu1 %856 }
 0x363   : > { %4367 = vrcp.f32 %v857_v24 }
 0x364   : > { %v5252_v46 = vpop.eup %4349 }
 0x365   : > { %v4352_v16 = vpop.eup %4351  ;;  %v1492_v15 = vsel %vm794_vm2, %v5252_v46, 0.0 }
 0x366   : > { %v5256_v14 = vpop.eup %4353  ;;  %1493 = vadd.xlane.f32.xlu1 %v1492_v15  ;;  %v877_v61 = vmul.f32 %v4352_v16, %v5162_v21 }
 0x367   : > { %v4356_v43 = vpop.eup %4355  ;;  %v1498_v51 = vsel %vm794_vm2, %v5256_v14, 0.0 }
 0x368   : > { %v4358_v34 = vpop.eup %4357  ;;  %v878_v54 = vmul.f32 %v4356_v43, %v5128_v37 }
 0x369   : > { %v875_v30 = vmul.f32 %v4358_v34, %v5166_v49  ;;  %v5265_v50 = vpop.eup %4359 }
 0x36a   : > { %1499 = vadd.xlane.f32.xlu0 %v1498_v51  ;;  %1502 = vadd.xlane.f32.xlu1 %v1501_v33  ;;  %v884_v32 = vpack.c.bf16 %v878_v54, %v877_v61  ;;  %v1495_v21 = vsel %vm794_vm2, %v5265_v50, 0.0 }
 0x36b   : > { %v883_v9 = vpack.c.bf16 %v876_v27, %v875_v30 }
 0x36c   : > { %v4362_v38 = vpop.eup %4361 }
 0x36d   : > { %3900 = vmatprep.mubr.msk.bf16.mxu1 %vm794_vm2, %v883_v9  ;;  %v4364_v6 = vpop.eup %4363  ;;  %v881_v37 = vmul.f32 %v4362_v38, %v5170_v31 }
 0x36e   : > { %1496 = vadd.xlane.f32.xlu0 %v1495_v21  ;;  %3901 = vmatmul.mubr.msk.bf16.vlgmr.msra.gmra.mxu1 %vm794_vm2, %v884_v32  ;;  %v4366_v49 = vpop.eup %4365  ;;  %v880_v56 = vmul.f32 %v4364_v6, %v5142_v8 }
 0x36f   : > { %3925 = vmatpush3.bf16.msra.mxu1 %v4961_v55  ;;  %v882_v16 = vmul.f32 %v4366_v49, %v5138_v35 }
 0x370   : > { %v4368_v36 = vpop.eup %4367  ;;  %3926 = vmatprep.subr.bf16.mxu1 %v5084_v11 }
 0x371   : > { %v879_v24 = vmul.f32 %v4368_v36, %v5174_v23  ;;  %v886_v43 = vpack.c.bf16 %v882_v16, %v881_v37 }
 0x373   : > { %3927 = vmatpush3.bf16.msra.mxu1 %v5084_v11  ;;  %v885_v15 = vpack.c.bf16 %v880_v56, %v879_v24 }
 0x374   : > { %3928 = vmatprep.subr.bf16.mxu1 %v5082_v7 }
 0x375   : > { %3904 = vmatprep.mubr.msk.bf16.mxu1 %vm794_vm2, %v885_v15 }
 0x376   : > { %3905 = vmatmul.mubr.msk.bf16.gmra.mxu1 %vm794_vm2, %v886_v43 }
 0x377   : > { %3929 = vmatpush3.bf16.msra.mxu1 %v5082_v7 }
 0x378   : > { %3930 = vmatprep.subr.bf16.mxu1 %v4947_v42 }
 0x37b   : > { %3931 = vmatpush3.bf16.msra.mxu1 %v4947_v42  ;;  %1662 = vrot.lane.b32.xlu1 %v4805_v47, %s4626_s6 }
 0x37c   : > { %3956 = vmatprep.subr.bf16.mxu1 %v5074_v58 }
 0x37f   : > { %1656 = vrot.lane.b32.xlu1 %v4835_v0, %s4626_s6 }
 0x383   : > { %1660 = vrot.lane.b32.xlu1 %v4853_v12, %s4626_s6 }
 0x384   : > { %1664 = vrot.lane.b32.xlu0 %v4801_v44, %s4626_s6 }
 0x388   : > { %1654 = vrot.lane.b32.xlu0 %v4797_v39, %s4626_s6 }
 0x38c   : > { %1658 = vrot.lane.b32.xlu0 %v4827_v60, %s4626_s6 }
 0x392   : > { %v1149_v42 = vpop.xlane.xlu1 %1148 }
 0x396   : > { %v1143_v55 = vpop.xlane.xlu1 %1142 }
 0x397   : > { %v1152_v47 = vpop.xlane.xlu0 %1151 }
 0x398   : > { %4369 = vrcp.f32 %v1152_v47 }
 0x399   : > { %4371 = vrcp.f32 %v1143_v55 }
 0x39a   : > { %v1161_v7 = vpop.xlane.xlu1 %1160  ;;  %4373 = vrcp.f32 %v1149_v42 }
 0x39b   : > { %v1146_v0 = vpop.xlane.xlu0 %1145 }
 0x39c   : > { %4375 = vrcp.f32 %v1146_v0 }
 0x39e   : > { %v1155_v11 = vpop.xlane.xlu1 %1154 }
 0x39f   : > { %v1164_v12 = vpop.xlane.xlu0 %1163 }
 0x3a0   : > { %4377 = vrcp.f32 %v1164_v12 }
 0x3a1   : > { %4379 = vrcp.f32 %v1155_v11 }
 0x3a2   : > { %4381 = vrcp.f32 %v1161_v7 }
 0x3a3   : > { %v1158_v44 = vpop.xlane.xlu0 %1157 }
 0x3a4   : > { %4383 = vrcp.f32 %v1158_v44 }
 0x3a5   : > { %v4370_v39 = vpop.eup %4369 }
 0x3a6   : > { %v4372_v35 = vpop.eup %4371  ;;  %v1176_v31 = vmul.f32 %v4370_v39, %v5192_v29 }
 0x3a7   : > { %v4374_v8 = vpop.eup %4373  ;;  %v1173_v23 = vmul.f32 %v4372_v35, %v5190_v25 }
 0x3a8   : > { %v1175_v61 = vmul.f32 %v4374_v8, %v5186_v20 }
 0x3a9   : > { %v4376_v60 = vpop.eup %4375 }
 0x3aa   : > { %v1174_v34 = vmul.f32 %v4376_v60, %v5200_v41  ;;  %v1182_v33 = vpack.c.bf16 %v1176_v31, %v1175_v61 }
 0x3ac   : > { %v1181_v51 = vpack.c.bf16 %v1174_v34, %v1173_v23 }
 0x3ad   : > { %v4378_v30 = vpop.eup %4377 }
 0x3ae   : > { %3932 = vmatprep.mubr.msk.bf16.mxu1 %vm794_vm2, %v1181_v51  ;;  %v4380_v27 = vpop.eup %4379  ;;  %v1180_v25 = vmul.f32 %v4378_v30, %v5208_v18 }
 0x3af   : > { %3933 = vmatmul.mubr.msk.bf16.vlgmr.msra.gmra.mxu1 %vm794_vm2, %v1182_v33  ;;  %v4382_v54 = vpop.eup %4381  ;;  %v1177_v41 = vmul.f32 %v4380_v27, %v5206_v13 }
 0x3b0   : > { %3957 = vmatpush3.bf16.msra.mxu1 %v5074_v58  ;;  %v1179_v32 = vmul.f32 %v4382_v54, %v5198_v53 }
 0x3b1   : > { %v4384_v9 = vpop.eup %4383  ;;  %3958 = vmatprep.subr.bf16.mxu1 %v5086_v17 }
 0x3b2   : > { %v1488_v29 = vpop.xlane.xlu0 %1487  ;;  %v1178_v20 = vmul.f32 %v4384_v9, %v5215_v63  ;;  %v1184_v21 = vpack.c.bf16 %v1180_v25, %v1179_v32 }
 0x3b4   : > { %3959 = vmatpush3.bf16.msra.mxu1 %v5086_v17  ;;  %v1183_v38 = vpack.c.bf16 %v1178_v20, %v1177_v41  ;;  %v1669_v17 = vpop.permute.xlu1 %1668 }
 0x3b5   : > { %3960 = vmatprep.subr.bf16.mxu1 %v5242_v28  ;;  %v1692_v43 = vsel %vm696_vm0, %v1669_v17, 0 }
 0x3b6   : > { %3936 = vmatprep.mubr.msk.bf16.mxu1 %vm794_vm2, %v1183_v38  ;;  %v1482_v58 = vpop.xlane.xlu0 %1481 }
 0x3b7   : > { %3937 = vmatmul.mubr.msk.bf16.gmra.mxu1 %vm794_vm2, %v1184_v21 }
 0x3b8   : > { %3961 = vmatpush3.bf16.msra.mxu1 %v5242_v28  ;;  %v1667_v42 = vpop.permute.xlu1 %1666 }
 0x3ba   : > { %v1491_v18 = vpop.xlane.xlu0 %1490 }
 0x3bb   : > { %4385 = vrcp.f32 %v1491_v18 }
 0x3bc   : > { %4387 = vrcp.f32 %v1482_v58 }
 0x3bd   : > { %4389 = vrcp.f32 %v1488_v29 }
 0x3be   : > { %v1485_v13 = vpop.xlane.xlu0 %1484 }
 0x3bf   : > { %4391 = vrcp.f32 %v1485_v13 }
 0x3c2   : > { %v1525_v53 = vpop.permute.xlu0 %1524 }
 0x3c3   : > { %3962 = vmatprep.subr.bf16.mxu1 %v1525_v53 }
 0x3c4   : > { %3963 = vmatpush3.bf16.msra.mxu1 %v1525_v53 }
 0x3c5   : > { %4192 = vmatprep.subr.msk.bf16.mxu1 %vm696_vm0, %v1669_v17 }
 0x3c8   : > { %v4386_v63 = vpop.eup %4385 }
 0x3c9   : > { %v4388_v6 = vpop.eup %4387  ;;  %v1515_v37 = vmul.f32 %v4386_v63, %v5234_v4  ;;  %v1689_v4 = vsel %vm696_vm0, %v1667_v42, 0 }
 0x3ca   : > { %v4390_v49 = vpop.eup %4389  ;;  %v1512_v28 = vmul.f32 %v4388_v6, %v5230_v26 }
 0x3cb   : > { %v1514_v56 = vmul.f32 %v4390_v49, %v5224_v52 }
 0x3cc   : > { %v4392_v36 = vpop.eup %4391 }
 0x3cd   : > { %v1513_v24 = vmul.f32 %v4392_v36, %v5238_v19  ;;  %v1521_v15 = vpack.c.bf16 %v1515_v37, %v1514_v56 }
 0x3cf   : > { %v1520_v16 = vpack.c.bf16 %v1513_v24, %v1512_v28 }
 0x3d1   : > { %3964 = vmatprep.mubr.msk.bf16.mxu1 %vm794_vm2, %v1520_v16 }
 0x3d2   : > { %3965 = vmatmul.mubr.msk.bf16.vlgmr.msra.gmra.mxu1 %vm794_vm2, %v1521_v15 }
 0x3d3   : > { %3973 = vmatpush3.bf16.xpose.msra.mxu1 %v1692_v43 }
 0x3d4   : > { %4193 = vmatprep.subr.msk.bf16.mxu1 %vm696_vm0, %v1667_v42 }
 0x3db   : > { %3975 = vmatpush3.bf16.xpose.msra.mxu1 %v1689_v4 }
 0x3ef   : > { %v1494_v26 = vpop.xlane.xlu1 %1493 }
 0x3f3   : > { %v1503_v55 = vpop.xlane.xlu1 %1502  ;;  %v1500_v19 = vpop.xlane.xlu0 %1499 }
 0x3f4   : > { %4393 = vrcp.f32 %v1503_v55 }
 0x3f5   : > { %4395 = vrcp.f32 %v1500_v19 }
 0x3f6   : > { %4397 = vrcp.f32 %v1494_v26 }
 0x3f7   : > { %v1497_v52 = vpop.xlane.xlu0 %1496  ;;  %v1663_v0 = vpop.permute.xlu1 %1662 }
 0x3f8   : > { %4399 = vrcp.f32 %v1497_v52  ;;  %v1683_v39 = vsel %vm696_vm0, %v1663_v0, 0 }
 0x3fb   : > { %v1665_v47 = vpop.permute.xlu0 %1664  ;;  %v1657_v33 = vpop.permute.xlu1 %1656 }
 0x3fc   : > { %4194 = vmatprep.subr.msk.bf16.mxu1 %vm696_vm0, %v1665_v47  ;;  %v1686_v7 = vsel %vm696_vm0, %v1665_v47, 0 }
 0x3fd   : > { %3977 = vmatpush3.bf16.xpose.msra.mxu1 %v1686_v7 }
 0x3fe   : > { %4195 = vmatprep.subr.msk.bf16.mxu1 %vm696_vm0, %v1663_v0 }
 0x3ff   : > { %v1655_v51 = vpop.permute.xlu0 %1654 }
 0x401   : > { %v4394_v11 = vpop.eup %4393 }
 0x402   : > { %v4396_v12 = vpop.eup %4395  ;;  %v1519_v60 = vmul.f32 %v4394_v11, %v5250_v2 }
 0x403   : > { %v4398_v44 = vpop.eup %4397  ;;  %v1518_v8 = vmul.f32 %v4396_v12, %v5256_v14  ;;  %v5339_v14 = vpack.c.bf16 %v4945_v40, %v4916_v62  ;;  %v1659_v2 = vpop.permute.xlu0 %1658 }
 0x404   : > { %v1516_v31 = vmul.f32 %v4398_v44, %v5252_v46  ;;  %v1661_v46 = vpop.permute.xlu1 %1660 }
 0x405   : > { %v4400_v35 = vpop.eup %4399  ;;  %3979 = vmatpush3.bf16.xpose.msra.mxu1 %v1683_v39  ;;  %v1523_v61 = vpack.c.bf16 %v1519_v60, %v1518_v8 }
 0x406   : > { %4020 = vmatprep.subr.bf16.mxu1 %v4919_v1  ;;  %v1517_v23 = vmul.f32 %v4400_v35, %v5265_v50 }
 0x408   : > { %v1522_v34 = vpack.c.bf16 %v1517_v23, %v1516_v31 }
 0x40a   : > { %3968 = vmatprep.mubr.msk.bf16.mxu1 %vm794_vm2, %v1522_v34 }
 0x40b   : > { %3969 = vmatmul.mubr.msk.bf16.gmra.mxu1 %vm794_vm2, %v1523_v61 }
 0x40c   : > { %3980 = vmatprep.mubr.msk.bf16.mxu1 %vm696_vm0, %v1655_v51  ;;  %v6159_v51 = vld [vmem:[#allocation16_spill] sm:$0xff] }
 0x413   : > { %3981 = vmatmul.mubr.msk.bf16.vlgmr.msra.gmra.mxu1 %vm696_vm0, %v1657_v33  ;;  %v6160_v33 = vld [vmem:[#allocation17_spill] sm:$0xff] }
 0x414   : > { %4021 = vmatpush3.bf16.msra.mxu1 %v4919_v1  ;;  %3984 = vmatprep.mubr.msk.bf16.mxu1 %vm696_vm0, %v1659_v2 }
 0x415   : > { %4022 = vmatprep.subr.bf16.mxu1 %v5339_v14 }
 0x418   : > { %4023 = vmatpush3.bf16.msra.mxu1 %v5339_v14 }
 0x419   : > { %4024 = vmatprep.subr.bf16.mxu1 %v4908_v57 }
 0x41b   : > { %3985 = vmatmul.mubr.msk.bf16.gmra.mxu1 %vm696_vm0, %v1661_v46 }
 0x41c   : > { %4025 = vmatpush3.bf16.msra.mxu1 %v4908_v57 }
 0x41d   : > { %4026 = vmatprep.subr.bf16.mxu1 %v4913_v59 }
 0x420   : > { %4027 = vmatpush3.bf16.msra.mxu1 %v4913_v59 }
 0x42e   : > { %v3902_v62 = vpop.f32.mrf.mxu1 }
 0x42f   : > { %966 = vst.msk [vmem:[#allocation2 + $0x10] sm:$0xff] %vm696_vm0, %v3902_v62 }
 0x430   : > { %v933_v40 = vpop.f32.mrf.mxu1 }
 0x431   : > { %964 = vst.msk [vmem:[#allocation2] sm:$0xff] %vm696_vm0, %v933_v40 }
 0x432   : > { %v3903_v50 = vpop.f32.mrf.mxu1 }
 0x433   : > { %967 = vst.msk [vmem:[#allocation2 + $0x18] sm:$0xff] %vm696_vm0, %v3903_v50 }
 0x434   : > { %v936_v30 = vpop.f32.mrf.mxu1 }
 0x435   : > { %965 = vst.msk [vmem:[#allocation2 + $0x8] sm:$0xff] %vm696_vm0, %v936_v30 }
 0x436   : > { %v3906_v27 = vpop.f32.mrf.mxu1 }
 0x437   : > { %970 = vst.msk [vmem:[#allocation2 + $0x30] sm:$0xff] %vm696_vm0, %v3906_v27 }
 0x438   : > { %v949_v54 = vpop.f32.mrf.mxu1 }
 0x439   : > { %968 = vst.msk [vmem:[#allocation2 + $0x20] sm:$0xff] %vm696_vm0, %v949_v54 }
 0x43a   : > { %v3907_v9 = vpop.f32.mrf.mxu1 }
 0x43b   : > { %971 = vst.msk [vmem:[#allocation2 + $0x38] sm:$0xff] %vm696_vm0, %v3907_v9 }
 0x43c   : > { %v952_v25 = vpop.f32.mrf.mxu1 }
 0x43d   : > { %969 = vst.msk [vmem:[#allocation2 + $0x28] sm:$0xff] %vm696_vm0, %v952_v25 }
 0x46f   : > { %v5359_v29 = vpop.f32.mrf.mxu1 }
 0x471   : > { %v5361_v41 = vpop.f32.mrf.mxu1 }
 0x473   : > { %v5363_v20 = vpop.f32.mrf.mxu1 }
 0x475   : > { %v5365_v32 = vpop.f32.mrf.mxu1 }
 0x477   : > { %v5367_v38 = vpop.f32.mrf.mxu1 }
 0x479   : > { %v5369_v21 = vpop.f32.mrf.mxu1 }
 0x47b   : > { %v5371_v58 = vpop.f32.mrf.mxu1 }
 0x47c   : > { %6153 = vst [vmem:[#allocation20_spill] sm:$0xff] %v5371_v58 }
 0x47d   : > { %v5373_v18 = vpop.f32.mrf.mxu1 }
 0x47e   : > { %6154 = vst [vmem:[#allocation21_spill] sm:$0xff] %v5373_v18 }
 0x492   : > { %v5375_v13 = vpop.f32.mrf.mxu1 }
 0x494   : > { %v5377_v53 = vpop.f32.mrf.mxu1 }
 0x496   : > { %v5379_v17 = vpop.f32.mrf.mxu1 }
 0x498   : > { %v5381_v63 = vpop.f32.mrf.mxu1 }
 0x4cb   : > { %v5383_v6 = vpop.f32.mrf.mxu1 }
 0x4cd   : > { %v5385_v49 = vpop.f32.mrf.mxu1 }
 0x4cf   : > { %v5387_v36 = vpop.f32.mrf.mxu1 }
 0x4d0   : > { %6155 = vst [vmem:[#allocation22_spill] sm:$0xff] %v5387_v36 }
 0x4d1   : > { %v5389_v37 = vpop.f32.mrf.mxu1 }
 0x4d2   : > { %6156 = vst [vmem:[#allocation23_spill] sm:$0xff] %v5389_v37 }
 0x4d3   : > { %v3982_v28 = vpop.f32.mrf.mxu1 }
 0x4d4   : > { %v1761_v24 = vsel %vm4949_vm1, %v3982_v28, -1e+30 }
 0x4d5   : > { %v1728_v56 = vpop.f32.mrf.mxu1  ;;  %v1773_v16 = vsel %vm794_vm2, %v1761_v24, -inf }
 0x4d6   : > { %v1759_v15 = vsel %vm4953_vm3, %v1728_v56, -1e+30  ;;  %1774 = vmax.xlane.f32.xlu0 %v1773_v16 }
 0x4d7   : > { %v3983_v43 = vpop.f32.mrf.mxu1  ;;  %v1767_v4 = vsel %vm794_vm2, %v1759_v15, -inf }
 0x4d8   : > { %v1762_v26 = vsel %vm4970_vm4, %v3983_v43, -1e+30 }
 0x4d9   : > { %v1731_v42 = vpop.f32.mrf.mxu1  ;;  %v1776_v0 = vsel %vm794_vm2, %v1762_v26, -inf }
 0x4da   : > { %v1760_v55 = vsel %vm4974_vm5, %v1731_v42, -1e+30  ;;  %1768 = vmax.xlane.f32.xlu0 %v1767_v4 }
 0x4db   : > { %v3986_v19 = vpop.f32.mrf.mxu1  ;;  %v1770_v52 = vsel %vm794_vm2, %v1760_v55, -inf }
 0x4dc   : > { %v1765_v47 = vsel %vm4980_vm6, %v3986_v19, -1e+30  ;;  %1771 = vmax.xlane.f32.xlu1 %v1770_v52 }
 0x4dd   : > { %v1744_v7 = vpop.f32.mrf.mxu1  ;;  %v1785_v12 = vsel %vm794_vm2, %v1765_v47, -inf }
 0x4de   : > { %1777 = vmax.xlane.f32.xlu0 %v1776_v0  ;;  %v5408_v44 = vsel %vm4998_vm7, %v1744_v7, -1e+30 }
 0x4df   : > { %v3987_v11 = vpop.f32.mrf.mxu1  ;;  %v1779_v34 = vsel %vm794_vm2, %v5408_v44, -inf }
 0x4e0   : > { %v5412_v35 = vsel %vm5004_vm8, %v3987_v11, -1e+30  ;;  %1786 = vmax.xlane.f32.xlu1 %v1785_v12 }
 0x4e1   : > { %v1747_v8 = vpop.f32.mrf.mxu1  ;;  %v1788_v60 = vsel %vm794_vm2, %v5412_v35, -inf }
 0x4e2   : > { %v1764_v23 = vsel %vm5010_vm9, %v1747_v8, -1e+30  ;;  %1789 = vmax.xlane.f32.xlu0 %v1788_v60 }
 0x4e3   : > { %v1782_v61 = vsel %vm794_vm2, %v1764_v23, -inf }
 0x4e4   : > { %1780 = vmax.xlane.f32.xlu1 %v1779_v34 }
 0x4e6   : > { %1783 = vmax.xlane.f32.xlu0 %v1782_v61 }
 0x4f5   : > { %1865 = vrot.lane.b32.xlu1 %v6159_v51, %s4626_s6 }
 0x4fc   : > { %1863 = vrot.lane.b32.xlu0 %v6160_v33, %s4626_s6 }
 0x55f   : > { %v1775_v2 = vpop.xlane.xlu0 %1774 }
 0x560   : > { %v1793_v46 = vsub.f32 %v1761_v24, %v1775_v2  ;;  %v6161_v2 = vld [vmem:[#allocation14_spill] sm:$0xff] }
 0x562   : > { %v1803_v62 = vmul.f32 1.442695, %v1793_v46 }
 0x563   : > { %v1769_v40 = vpop.xlane.xlu0 %1768 }
 0x564   : > { %4401 = vpow2.f32 %v1803_v62  ;;  %v1791_v50 = vsub.f32 %v1759_v15, %v1769_v40 }
 0x565   : > { %v1772_v30 = vpop.xlane.xlu1 %1771 }
 0x566   : > { %v1799_v27 = vmul.f32 1.442695, %v1791_v50  ;;  %v1792_v54 = vsub.f32 %v1760_v55, %v1772_v30  ;;  %v6162_v30 = vld [vmem:[#allocation15_spill] sm:$0xff] }
 0x567   : > { %v1778_v9 = vpop.xlane.xlu0 %1777 }
 0x568   : > { %4403 = vpow2.f32 %v1799_v27  ;;  %v1794_v25 = vsub.f32 %v1762_v26, %v1778_v9  ;;  %v1801_v56 = vmul.f32 1.442695, %v1792_v54 }
 0x569   : > { %v1787_v28 = vpop.xlane.xlu1 %1786 }
 0x56a   : > { %v1805_v16 = vmul.f32 1.442695, %v1794_v25  ;;  %v1797_v43 = vsub.f32 %v1765_v47, %v1787_v28 }
 0x56b   : > { %v1790_v42 = vpop.xlane.xlu0 %1789 }
 0x56c   : > { %4405 = vpow2.f32 %v1805_v16  ;;  %v1811_v19 = vmul.f32 1.442695, %v1797_v43  ;;  %v1798_v62 = vsub.f32 %v5412_v35, %v1790_v42 }
 0x56d   : > { %v1781_v4 = vpop.xlane.xlu1 %1780  ;;  %4407 = vpow2.f32 %v1801_v56 }
 0x56e   : > { %4409 = vpow2.f32 %v1811_v19  ;;  %v1795_v46 = vsub.f32 %v5408_v44, %v1781_v4  ;;  %v1813_v50 = vmul.f32 1.442695, %v1798_v62 }
 0x56f   : > { %v1784_v24 = vpop.xlane.xlu0 %1783 }
 0x570   : > { %v1796_v52 = vsub.f32 %v1764_v23, %v1784_v24  ;;  %v1807_v40 = vmul.f32 1.442695, %v1795_v46 }
 0x571   : > { %v5425_v7 = vpop.eup %4401  ;;  %v1866_v15 = vpop.permute.xlu1 %1865 }
 0x572   : > { %v1809_v0 = vmul.f32 1.442695, %v1796_v52  ;;  %3988 = vmatprep.subr.bf16.mxu0 %v1866_v15  ;;  %v1821_v26 = vsel %vm794_vm2, %v5425_v7, 0.0 }
 0x573   : > { %3989 = vmatpush3.bf16.msra.mxu0 %v1866_v15  ;;  %1822 = vadd.xlane.f32.xlu1 %v1821_v26  ;;  %v1864_v55 = vpop.permute.xlu0 %1863  ;;  %v6163_v26 = vld [vmem:[#allocation13_spill] sm:$0xff] }
 0x574   : > { %3990 = vmatprep.subr.bf16.mxu0 %v1864_v55  ;;  %4411 = vpow2.f32 %v1809_v0 }
 0x575   : > { %v4404_v47 = vpop.eup %4403  ;;  %4413 = vpow2.f32 %v1807_v40 }
 0x576   : > { %v1815_v11 = vsel %vm794_vm2, %v4404_v47, 0.0  ;;  %4415 = vpow2.f32 %v1813_v50 }
 0x577   : > { %1816 = vadd.xlane.f32.xlu1 %v1815_v11  ;;  %3991 = vmatpush3.bf16.msra.mxu0 %v1864_v55 }
 0x579   : > { %v4406_v12 = vpop.eup %4405 }
 0x57a   : > { %v1824_v8 = vsel %vm794_vm2, %v4406_v12, 0.0  ;;  %v4408_v60 = vpop.eup %4407 }
 0x57b   : > { %1825 = vadd.xlane.f32.xlu0 %v1824_v8  ;;  %v1818_v23 = vsel %vm794_vm2, %v4408_v60, 0.0  ;;  %v5432_v34 = vpop.eup %4409 }
 0x57c   : > { %v1833_v61 = vsel %vm794_vm2, %v5432_v34, 0.0 }
 0x57f   : > { %1819 = vadd.xlane.f32.xlu0 %v1818_v23 }
 0x581   : > { %v5436_v51 = vpop.eup %4411 }
 0x582   : > { %v1830_v33 = vsel %vm794_vm2, %v5436_v51, 0.0  ;;  %v4414_v27 = vpop.eup %4413 }
 0x583   : > { %1834 = vadd.xlane.f32.xlu0 %v1833_v61  ;;  %v1827_v54 = vsel %vm794_vm2, %v4414_v27, 0.0  ;;  %v4416_v9 = vpop.eup %4415 }
 0x584   : > { %v1836_v25 = vsel %vm794_vm2, %v4416_v9, 0.0 }
 0x587   : > { %1831 = vadd.xlane.f32.xlu0 %v1830_v33  ;;  %v2011_v33 = vsel %vm696_vm0, %v6163_v26, 0 }
 0x588   : > { %1861 = vrot.lane.b32.xlu1 %v6161_v2, %s4626_s6  ;;  %v6164_v2 = vld [vmem:[#allocation11_spill] sm:$0xff] }
 0x59d   : > { %1859 = vrot.lane.b32.xlu0 %v6162_v30, %s4626_s6 }
 0x5ac   : > { %1828 = vadd.xlane.f32.xlu1 %v1827_v54 }
 0x5b0   : > { %1837 = vadd.xlane.f32.xlu1 %v1836_v25 }
 0x5fc   : > { %v1823_v28 = vpop.xlane.xlu1 %1822 }
 0x600   : > { %v1817_v56 = vpop.xlane.xlu1 %1816 }
 0x604   : > { %v1862_v44 = vpop.permute.xlu1 %1861  ;;  %v1826_v16 = vpop.xlane.xlu0 %1825 }
 0x605   : > { %3992 = vmatprep.subr.bf16.mxu0 %v1862_v44  ;;  %4417 = vrcp.f32 %v1826_v16 }
 0x606   : > { %3993 = vmatpush3.bf16.msra.mxu0 %v1862_v44  ;;  %4419 = vrcp.f32 %v1817_v56 }
 0x607   : > { %4421 = vrcp.f32 %v1823_v28 }
 0x608   : > { %v1820_v35 = vpop.xlane.xlu0 %1819 }
 0x609   : > { %4423 = vrcp.f32 %v1820_v35 }
 0x60c   : > { %v1835_v43 = vpop.xlane.xlu0 %1834 }
 0x610   : > { %v1832_v42 = vpop.xlane.xlu0 %1831 }
 0x611   : > { %4425 = vrcp.f32 %v1832_v42 }
 0x612   : > { %v4418_v4 = vpop.eup %4417 }
 0x613   : > { %v4420_v19 = vpop.eup %4419  ;;  %v1850_v0 = vmul.f32 %v4418_v4, %v4406_v12  ;;  %v2008_v12 = vsel %vm696_vm0, %v6164_v2, 0  ;;  %v6167_v4 = vld [vmem:[#allocation6_spill] sm:$0xff] }
 0x614   : > { %v1860_v24 = vpop.permute.xlu0 %1859  ;;  %v4422_v52 = vpop.eup %4421  ;;  %v1847_v55 = vmul.f32 %v4420_v19, %v4404_v47  ;;  %v6165_v47 = vld [vmem:[#allocation9_spill] sm:$0xff] }
 0x615   : > { %3994 = vmatprep.subr.bf16.mxu0 %v1860_v24  ;;  %v1849_v8 = vmul.f32 %v4422_v52, %v5425_v7  ;;  %v2005_v7 = vsel %vm696_vm0, %v6165_v47, 0 }
 0x616   : > { %v4424_v15 = vpop.eup %4423  ;;  %3995 = vmatpush3.bf16.msra.mxu0 %v1860_v24 }
 0x617   : > { %4196 = vmatprep.subr.msk.bf16.mxu0 %vm696_vm0, %v6163_v26  ;;  %v1848_v11 = vmul.f32 %v4424_v15, %v4408_v60  ;;  %v1856_v61 = vpack.c.bf16 %v1850_v0, %v1849_v8  ;;  %v6166_v60 = vld [vmem:[#allocation7_spill] sm:$0xff] }
 0x618   : > { %v2002_v46 = vsel %vm696_vm0, %v6166_v60, 0 }
 0x619   : > { %v1855_v23 = vpack.c.bf16 %v1848_v11, %v1847_v55 }
 0x61b   : > { %3996 = vmatprep.mubr.msk.bf16.mxu0 %vm794_vm2, %v1855_v23 }
 0x61c   : > { %3997 = vmatmul.mubr.msk.bf16.vlgmr.msra.gmra.mxu0 %vm794_vm2, %v1856_v61 }
 0x61d   : > { %4005 = vmatpush3.bf16.xpose.msra.mxu0 %v2011_v33 }
 0x61e   : > { %4197 = vmatprep.subr.msk.bf16.mxu0 %vm696_vm0, %v6164_v2  ;;  %v4426_v50 = vpop.eup %4425 }
 0x61f   : > { %v1852_v25 = vmul.f32 %v4426_v50, %v5436_v51  ;;  %v6170_v51 = vld [vmem:[#allocation12_spill] sm:$0xff] }
 0x625   : > { %4007 = vmatpush3.bf16.xpose.msra.mxu0 %v2008_v12 }
 0x626   : > { %4198 = vmatprep.subr.msk.bf16.mxu0 %vm696_vm0, %v6165_v47 }
 0x62d   : > { %4009 = vmatpush3.bf16.xpose.msra.mxu0 %v2005_v7 }
 0x62e   : > { %4199 = vmatprep.subr.msk.bf16.mxu0 %vm696_vm0, %v6166_v60 }
 0x635   : > { %4011 = vmatpush3.bf16.xpose.msra.mxu0 %v2002_v46  ;;  %v1829_v62 = vpop.xlane.xlu1 %1828 }
 0x636   : > { %4427 = vrcp.f32 %v1829_v62 }
 0x637   : > { %4429 = vrcp.f32 %v1835_v43  ;;  %v6168_v43 = vld [vmem:[#allocation8_spill] sm:$0xff] }
 0x639   : > { %v1838_v40 = vpop.xlane.xlu1 %1837 }
 0x63a   : > { %4431 = vrcp.f32 %v1838_v40 }
 0x643   : > { %v4428_v30 = vpop.eup %4427 }
 0x644   : > { %v1851_v54 = vmul.f32 %v4428_v30, %v4414_v27  ;;  %v4430_v28 = vpop.eup %4429  ;;  %v6169_v27 = vld [vmem:[#allocation10_spill] sm:$0xff] }
 0x645   : > { %v1853_v16 = vmul.f32 %v4430_v28, %v5432_v34 }
 0x646   : > { %v1857_v56 = vpack.c.bf16 %v1852_v25, %v1851_v54 }
 0x647   : > { %v4432_v44 = vpop.eup %4431 }
 0x648   : > { %4000 = vmatprep.mubr.msk.bf16.mxu0 %vm794_vm2, %v1857_v56  ;;  %v1854_v35 = vmul.f32 %v4432_v44, %v4416_v9 }
 0x64a   : > { %v1858_v42 = vpack.c.bf16 %v1854_v35, %v1853_v16 }
 0x64c   : > { %4001 = vmatmul.mubr.msk.bf16.gmra.mxu0 %vm794_vm2, %v1858_v42 }
 0x64d   : > { %4012 = vmatprep.mubr.msk.bf16.mxu0 %vm696_vm0, %v6167_v4 }
 0x654   : > { %4013 = vmatmul.mubr.msk.bf16.vlgmr.msra.gmra.mxu0 %vm696_vm0, %v6168_v43 }
 0x655   : > { %4016 = vmatprep.mubr.msk.bf16.mxu0 %vm696_vm0, %v6169_v27 }
 0x65c   : > { %4017 = vmatmul.mubr.msk.bf16.gmra.mxu0 %vm696_vm0, %v6170_v51 }
 0x6dc   : > { %v5479_v19 = vpop.f32.mrf.mxu0 }
 0x6de   : > { %v5481_v24 = vpop.f32.mrf.mxu0 }
 0x6e0   : > { %v5483_v34 = vpop.f32.mrf.mxu0 }
 0x6e1   : > { %6171 = vst [vmem:[#allocation18_spill] sm:$0xff] %v5483_v34 }
 0x6e2   : > { %v5485_v9 = vpop.f32.mrf.mxu0 }
 0x6e3   : > { %6172 = vst [vmem:[#allocation19_spill] sm:$0xff] %v5485_v9 }
 0x70c   : > { %v5487_v52 = vpop.f32.mrf.mxu0 }
 0x70e   : > { %v5489_v15 = vpop.f32.mrf.mxu0 }
 0x710   : > { %v5491_v0 = vpop.f32.mrf.mxu0 }
 0x711   : > { %6173 = vst [vmem:[#allocation16_spill] sm:$0xff] %v5491_v0 }
 0x712   : > { %v5493_v55 = vpop.f32.mrf.mxu0 }
 0x713   : > { %6174 = vst [vmem:[#allocation17_spill] sm:$0xff] %v5493_v55 }
 0x714   : > { %v4014_v11 = vpop.f32.mrf.mxu0 }
 0x715   : > { %v2080_v8 = vsel %vm4949_vm1, %v4014_v11, -1e+30 }
 0x716   : > { %v2092_v23 = vsel %vm794_vm2, %v2080_v8, -inf  ;;  %v2047_v61 = vpop.f32.mrf.mxu0 }
 0x717   : > { %v2078_v33 = vsel %vm4953_vm3, %v2047_v61, -1e+30  ;;  %2093 = vmax.xlane.f32.xlu1 %v2092_v23 }
 0x718   : > { %v4015_v12 = vpop.f32.mrf.mxu0  ;;  %v2086_v7 = vsel %vm794_vm2, %v2078_v33, -inf }
 0x719   : > { %v2081_v28 = vsel %vm4970_vm4, %v4015_v12, -1e+30 }
 0x71a   : > { %v2050_v46 = vpop.f32.mrf.mxu0  ;;  %v2095_v44 = vsel %vm794_vm2, %v2081_v28, -inf }
 0x71b   : > { %v2079_v62 = vsel %vm4974_vm5, %v2050_v46, -1e+30  ;;  %2087 = vmax.xlane.f32.xlu1 %v2086_v7 }
 0x71c   : > { %v4018_v40 = vpop.f32.mrf.mxu0  ;;  %v2089_v30 = vsel %vm794_vm2, %v2079_v62, -inf }
 0x71d   : > { %v2084_v50 = vsel %vm4980_vm6, %v4018_v40, -1e+30 }
 0x71e   : > { %v2104_v54 = vsel %vm794_vm2, %v2084_v50, -inf  ;;  %v2063_v25 = vpop.f32.mrf.mxu0 }
 0x71f   : > { %2090 = vmax.xlane.f32.xlu1 %v2089_v30  ;;  %2105 = vmax.xlane.f32.xlu0 %v2104_v54  ;;  %v2082_v16 = vsel %vm4998_vm7, %v2063_v25, -1e+30 }
 0x720   : > { %v4019_v56 = vpop.f32.mrf.mxu0  ;;  %v2098_v42 = vsel %vm794_vm2, %v2082_v16, -inf }
 0x721   : > { %v2085_v61 = vsel %vm5004_vm8, %v4019_v56, -1e+30 }
 0x722   : > { %v2066_v35 = vpop.f32.mrf.mxu0  ;;  %v2107_v12 = vsel %vm794_vm2, %v2085_v61, -inf }
 0x723   : > { %2096 = vmax.xlane.f32.xlu1 %v2095_v44  ;;  %v2083_v11 = vsel %vm5010_vm9, %v2066_v35, -1e+30 }
 0x724   : > { %v2101_v23 = vsel %vm794_vm2, %v2083_v11, -inf }
 0x727   : > { %2099 = vmax.xlane.f32.xlu1 %v2098_v42 }
 0x72b   : > { %2102 = vmax.xlane.f32.xlu1 %v2101_v23 }
 0x72f   : > { %2108 = vmax.xlane.f32.xlu1 %v2107_v12 }
 0x7a0   : > { %v2094_v7 = vpop.xlane.xlu1 %2093 }
 0x7a1   : > { %v2112_v46 = vsub.f32 %v2080_v8, %v2094_v7 }
 0x7a3   : > { %v2122_v40 = vmul.f32 1.442695, %v2112_v46 }
 0x7a4   : > { %v2088_v30 = vpop.xlane.xlu1 %2087 }
 0x7a5   : > { %4433 = vpow2.f32 %v2122_v40  ;;  %v2110_v54 = vsub.f32 %v2078_v33, %v2088_v30 }
 0x7a7   : > { %v2118_v25 = vmul.f32 1.442695, %v2110_v54 }
 0x7a8   : > { %v2091_v44 = vpop.xlane.xlu1 %2090  ;;  %v2106_v0 = vpop.xlane.xlu0 %2105 }
 0x7a9   : > { %4435 = vpow2.f32 %v2118_v25  ;;  %v2116_v35 = vsub.f32 %v2084_v50, %v2106_v0  ;;  %v2111_v42 = vsub.f32 %v2079_v62, %v2091_v44 }
 0x7ab   : > { %v2130_v55 = vmul.f32 1.442695, %v2116_v35  ;;  %v2120_v56 = vmul.f32 1.442695, %v2111_v42 }
 0x7ac   : > { %v2097_v36 = vpop.xlane.xlu1 %2096 }
 0x7ad   : > { %v2113_v37 = vsub.f32 %v2081_v28, %v2097_v36  ;;  %4437 = vpow2.f32 %v2130_v55 }
 0x7af   : > { %v2124_v23 = vmul.f32 1.442695, %v2113_v37 }
 0x7b0   : > { %v2100_v28 = vpop.xlane.xlu1 %2099 }
 0x7b1   : > { %4439 = vpow2.f32 %v2124_v23  ;;  %v2114_v40 = vsub.f32 %v2082_v16, %v2100_v28 }
 0x7b2   : > { %v5519_v12 = vpop.eup %4433  ;;  %4441 = vpow2.f32 %v2120_v56 }
 0x7b3   : > { %v2140_v8 = vsel %vm794_vm2, %v5519_v12, 0.0  ;;  %v2126_v54 = vmul.f32 1.442695, %v2114_v40 }
 0x7b4   : > { %2141 = vadd.xlane.f32.xlu1 %v2140_v8  ;;  %v2103_v46 = vpop.xlane.xlu1 %2102 }
 0x7b5   : > { %4443 = vpow2.f32 %v2126_v54  ;;  %v2115_v44 = vsub.f32 %v2083_v11, %v2103_v46 }
 0x7b6   : > { %v4436_v33 = vpop.eup %4435 }
 0x7b7   : > { %v2134_v7 = vsel %vm794_vm2, %v4436_v33, 0.0  ;;  %v2128_v42 = vmul.f32 1.442695, %v2115_v44 }
 0x7b8   : > { %2135 = vadd.xlane.f32.xlu1 %v2134_v7  ;;  %v2109_v30 = vpop.xlane.xlu1 %2108 }
 0x7b9   : > { %v2117_v25 = vsub.f32 %v2085_v61, %v2109_v30 }
 0x7ba   : > { %v5524_v0 = vpop.eup %4437 }
 0x7bb   : > { %v2152_v36 = vsel %vm794_vm2, %v5524_v0, 0.0  ;;  %v2132_v35 = vmul.f32 1.442695, %v2117_v25 }
 0x7bc   : > { %2153 = vadd.xlane.f32.xlu0 %v2152_v36 }
 0x7bd   : > { %4445 = vpow2.f32 %v2132_v35 }
 0x7be   : > { %v4440_v55 = vpop.eup %4439  ;;  %4447 = vpow2.f32 %v2128_v42 }
 0x7bf   : > { %v2143_v37 = vsel %vm794_vm2, %v4440_v55, 0.0  ;;  %v4442_v62 = vpop.eup %4441 }
 0x7c0   : > { %2144 = vadd.xlane.f32.xlu1 %v2143_v37  ;;  %v2137_v50 = vsel %vm794_vm2, %v4442_v62, 0.0 }
 0x7c2   : > { %v4444_v56 = vpop.eup %4443 }
 0x7c3   : > { %v2146_v23 = vsel %vm794_vm2, %v4444_v56, 0.0 }
 0x7c4   : > { %2138 = vadd.xlane.f32.xlu1 %v2137_v50 }
 0x7ca   : > { %v4446_v8 = vpop.eup %4445 }
 0x7cb   : > { %v2155_v7 = vsel %vm794_vm2, %v4446_v8, 0.0  ;;  %v4448_v36 = vpop.eup %4447 }
 0x7cc   : > { %v2149_v16 = vsel %vm794_vm2, %v4448_v36, 0.0 }
 0x7d2   : > { %2285 = vrot.lane.b32.xlu0 %v6163_v26, %s4624_s28 }
 0x7d5   : > { %2283 = vrot.lane.b32.xlu1 %v6164_v2, %s4624_s28 }
 0x7d6   : > { %2267 = vrot.lane.b32.xlu0 %v6167_v4, %s4624_s28 }
 0x7d9   : > { %2281 = vrot.lane.b32.xlu1 %v6165_v47, %s4624_s28 }
 0x7da   : > { %2271 = vrot.lane.b32.xlu0 %v6169_v27, %s4624_s28 }
 0x7fd   : > { %2147 = vadd.xlane.f32.xlu1 %v2146_v23 }
 0x801   : > { %2156 = vadd.xlane.f32.xlu1 %v2155_v7 }
 0x805   : > { %2150 = vadd.xlane.f32.xlu1 %v2149_v16 }
 0x816   : > { %2279 = vrot.lane.b32.xlu1 %v6166_v60, %s4624_s28 }
 0x81a   : > { %2269 = vrot.lane.b32.xlu1 %v6168_v43, %s4624_s28 }
 0x81e   : > { %2273 = vrot.lane.b32.xlu1 %v6170_v51, %s4624_s28 }
 0x83d   : > { %v2142_v11 = vpop.xlane.xlu1 %2141 }
 0x841   : > { %v2136_v61 = vpop.xlane.xlu1 %2135 }
 0x845   : > { %v2154_v37 = vpop.xlane.xlu0 %2153 }
 0x849   : > { %v2145_v50 = vpop.xlane.xlu1 %2144  ;;  %v2286_v28 = vpop.permute.xlu0 %2285 }
 0x84a   : > { %4449 = vrcp.f32 %v2145_v50  ;;  %4200 = vmatprep.subr.msk.bf16.mxu1 %vm696_vm0, %v2286_v28 }
 0x84b   : > { %4451 = vrcp.f32 %v2136_v61  ;;  %v2309_v61 = vsel %vm696_vm0, %v2286_v28, 0 }
 0x84c   : > { %4453 = vrcp.f32 %v2142_v11 }
 0x84d   : > { %v2139_v46 = vpop.xlane.xlu1 %2138 }
 0x84e   : > { %4455 = vrcp.f32 %v2139_v46 }
 0x851   : > { %v2284_v11 = vpop.permute.xlu1 %2283 }
 0x852   : > { %v2306_v50 = vsel %vm696_vm0, %v2284_v11, 0 }
 0x855   : > { %v2282_v46 = vpop.permute.xlu1 %2281 }
 0x857   : > { %v4450_v40 = vpop.eup %4449 }
 0x858   : > { %v4452_v30 = vpop.eup %4451  ;;  %v2169_v44 = vmul.f32 %v4450_v40, %v4440_v55 }
 0x859   : > { %v4454_v54 = vpop.eup %4453  ;;  %v2166_v35 = vmul.f32 %v4452_v30, %v4436_v33 }
 0x85a   : > { %v2168_v23 = vmul.f32 %v4454_v54, %v5519_v12  ;;  %v2303_v12 = vsel %vm696_vm0, %v2282_v46, 0 }
 0x85b   : > { %v4456_v25 = vpop.eup %4455 }
 0x85c   : > { %v2167_v42 = vmul.f32 %v4456_v25, %v4442_v62  ;;  %v2175_v16 = vpack.c.bf16 %v2169_v44, %v2168_v23 }
 0x85e   : > { %v2174_v7 = vpack.c.bf16 %v2167_v42, %v2166_v35 }
 0x860   : > { %4028 = vmatprep.mubr.msk.bf16.mxu1 %vm794_vm2, %v2174_v7 }
 0x861   : > { %4029 = vmatmul.mubr.msk.bf16.vlgmr.msra.gmra.mxu1 %vm794_vm2, %v2175_v16 }
 0x862   : > { %4037 = vmatpush3.bf16.xpose.msra.mxu1 %v2309_v61 }
 0x863   : > { %4201 = vmatprep.subr.msk.bf16.mxu1 %vm696_vm0, %v2284_v11 }
 0x86a   : > { %4039 = vmatpush3.bf16.xpose.msra.mxu1 %v2306_v50 }
 0x86b   : > { %4202 = vmatprep.subr.msk.bf16.mxu1 %vm696_vm0, %v2282_v46 }
 0x872   : > { %4041 = vmatpush3.bf16.xpose.msra.mxu1 %v2303_v12 }
 0x886   : > { %v2148_v33 = vpop.xlane.xlu1 %2147 }
 0x88a   : > { %v2157_v55 = vpop.xlane.xlu1 %2156 }
 0x88b   : > { %4457 = vrcp.f32 %v2157_v55 }
 0x88c   : > { %4459 = vrcp.f32 %v2148_v33 }
 0x88d   : > { %4461 = vrcp.f32 %v2154_v37  ;;  %v2268_v37 = vpop.permute.xlu0 %2267 }
 0x88e   : > { %v2151_v62 = vpop.xlane.xlu1 %2150 }
 0x88f   : > { %4463 = vrcp.f32 %v2151_v62 }
 0x891   : > { %v2272_v50 = vpop.permute.xlu0 %2271 }
 0x892   : > { %v2280_v28 = vpop.permute.xlu1 %2279 }
 0x893   : > { %4203 = vmatprep.subr.msk.bf16.mxu1 %vm696_vm0, %v2280_v28  ;;  %v2300_v40 = vsel %vm696_vm0, %v2280_v28, 0 }
 0x894   : > { %4043 = vmatpush3.bf16.xpose.msra.mxu1 %v2300_v40 }
 0x896   : > { %v2270_v11 = vpop.permute.xlu1 %2269 }
 0x898   : > { %v4458_v30 = vpop.eup %4457 }
 0x899   : > { %v4460_v54 = vpop.eup %4459  ;;  %v2173_v35 = vmul.f32 %v4458_v30, %v4446_v8 }
 0x89a   : > { %v4462_v25 = vpop.eup %4461  ;;  %v2170_v42 = vmul.f32 %v4460_v54, %v4444_v56  ;;  %v2274_v8 = vpop.permute.xlu1 %2273 }
 0x89b   : > { %v2172_v7 = vmul.f32 %v4462_v25, %v5524_v0 }
 0x89c   : > { %v4464_v44 = vpop.eup %4463 }
 0x89d   : > { %v2171_v23 = vmul.f32 %v4464_v44, %v4448_v36  ;;  %v2177_v61 = vpack.c.bf16 %v2173_v35, %v2172_v7 }
 0x89f   : > { %v2176_v16 = vpack.c.bf16 %v2171_v23, %v2170_v42 }
 0x8a1   : > { %4032 = vmatprep.mubr.msk.bf16.mxu1 %vm794_vm2, %v2176_v16 }
 0x8a2   : > { %4033 = vmatmul.mubr.msk.bf16.gmra.mxu1 %vm794_vm2, %v2177_v61 }
 0x8a3   : > { %4044 = vmatprep.mubr.msk.bf16.mxu1 %vm696_vm0, %v2268_v37 }
 0x8aa   : > { %4045 = vmatmul.mubr.msk.bf16.vlgmr.msra.gmra.mxu1 %vm696_vm0, %v2270_v11 }
 0x8ab   : > { %4048 = vmatprep.mubr.msk.bf16.mxu1 %vm696_vm0, %v2272_v50 }
 0x8b2   : > { %4049 = vmatmul.mubr.msk.bf16.gmra.mxu1 %vm696_vm0, %v2274_v8 }
 0x921   : > { %v4030_v56 = vpop.f32.mrf.mxu1 }
 0x922   : > { %2257 = vst.msk [vmem:[#allocation2 + $0x50] sm:$0xff] %vm696_vm0, %v4030_v56 }
 0x923   : > { %v2224_v0 = vpop.f32.mrf.mxu1 }
 0x924   : > { %2255 = vst.msk [vmem:[#allocation2 + $0x40] sm:$0xff] %vm696_vm0, %v2224_v0 }
 0x925   : > { %v4031_v36 = vpop.f32.mrf.mxu1 }
 0x926   : > { %2258 = vst.msk [vmem:[#allocation2 + $0x58] sm:$0xff] %vm696_vm0, %v4031_v36 }
 0x927   : > { %v2227_v46 = vpop.f32.mrf.mxu1 }
 0x928   : > { %2256 = vst.msk [vmem:[#allocation2 + $0x48] sm:$0xff] %vm696_vm0, %v2227_v46 }
 0x962   : > { %v4034_v12 = vpop.f32.mrf.mxu1 }
 0x963   : > { %2261 = vst.msk [vmem:[#allocation2 + $0x70] sm:$0xff] %vm696_vm0, %v4034_v12 }
 0x964   : > { %v2240_v33 = vpop.f32.mrf.mxu1 }
 0x965   : > { %2259 = vst.msk [vmem:[#allocation2 + $0x60] sm:$0xff] %vm696_vm0, %v2240_v33 }
 0x966   : > { %v4035_v55 = vpop.f32.mrf.mxu1 }
 0x967   : > { %2262 = vst.msk [vmem:[#allocation2 + $0x78] sm:$0xff] %vm696_vm0, %v4035_v55 }
 0x968   : > { %v2243_v62 = vpop.f32.mrf.mxu1 }
 0x969   : > { %2260 = vst.msk [vmem:[#allocation2 + $0x68] sm:$0xff] %vm696_vm0, %v2243_v62 }
 0x96a   : > { %v4046_v28 = vpop.f32.mrf.mxu1 }
 0x96b   : > { %v2378_v44 = vsel %vm4949_vm1, %v4046_v28, -1e+30 }
 0x96c   : > { %v2345_v40 = vpop.f32.mrf.mxu1  ;;  %v2390_v23 = vsel %vm794_vm2, %v2378_v44, -inf }
 0x96d   : > { %v2376_v30 = vsel %vm4953_vm3, %v2345_v40, -1e+30 }
 0x96e   : > { %v2384_v54 = vsel %vm794_vm2, %v2376_v30, -inf  ;;  %v4047_v25 = vpop.f32.mrf.mxu1 }
 0x96f   : > { %2385 = vmax.xlane.f32.xlu0 %v2384_v54  ;;  %v2379_v61 = vsel %vm4970_vm4, %v4047_v25, -1e+30 }
 0x970   : > { %v2348_v35 = vpop.f32.mrf.mxu1  ;;  %v2393_v11 = vsel %vm794_vm2, %v2379_v61, -inf }
 0x971   : > { %v2377_v42 = vsel %vm4974_vm5, %v2348_v35, -1e+30 }
 0x972   : > { %v2387_v7 = vsel %vm794_vm2, %v2377_v42, -inf  ;;  %v4050_v16 = vpop.f32.mrf.mxu1 }
 0x973   : > { %2391 = vmax.xlane.f32.xlu0 %v2390_v23  ;;  %2388 = vmax.xlane.f32.xlu1 %v2387_v7  ;;  %v2382_v8 = vsel %vm4980_vm6, %v4050_v16, -1e+30 }
 0x974   : > { %v2361_v37 = vpop.f32.mrf.mxu1  ;;  %v2402_v12 = vsel %vm794_vm2, %v2382_v8, -inf }
 0x975   : > { %v2380_v33 = vsel %vm4998_vm7, %v2361_v37, -1e+30 }
 0x976   : > { %v4051_v50 = vpop.f32.mrf.mxu1  ;;  %v2396_v62 = vsel %vm794_vm2, %v2380_v33, -inf }
 0x977   : > { %v2383_v56 = vsel %vm5004_vm8, %v4051_v50, -1e+30  ;;  %2394 = vmax.xlane.f32.xlu0 %v2393_v11 }
 0x978   : > { %v2405_v0 = vsel %vm794_vm2, %v2383_v56, -inf  ;;  %v2364_v36 = vpop.f32.mrf.mxu1 }
 0x979   : > { %v2381_v46 = vsel %vm5010_vm9, %v2364_v36, -1e+30  ;;  %2406 = vmax.xlane.f32.xlu1 %v2405_v0 }
 0x97a   : > { %v2399_v55 = vsel %vm794_vm2, %v2381_v46, -inf }
 0x97b   : > { %2403 = vmax.xlane.f32.xlu0 %v2402_v12 }
 0x97d   : > { %2400 = vmax.xlane.f32.xlu1 %v2399_v55 }
 0x97f   : > { %2397 = vmax.xlane.f32.xlu0 %v2396_v62 }
 0x98e   : > { %2484 = vrot.lane.b32.xlu1 %v5339_v14, %s4624_s28 }
 0x992   : > { %2482 = vrot.lane.b32.xlu1 %v4908_v57, %s4624_s28 }
 0x995   : > { %2486 = vrot.lane.b32.xlu0 %v4919_v1, %s4624_s28 }
 0x996   : > { %2480 = vrot.lane.b32.xlu1 %v4913_v59, %s4624_s28 }
 0x9f8   : > { %v2386_v28 = vpop.xlane.xlu0 %2385 }
 0x9f9   : > { %v2408_v40 = vsub.f32 %v2376_v30, %v2386_v28 }
 0x9fb   : > { %v2416_v23 = vmul.f32 1.442695, %v2408_v40 }
 0x9fc   : > { %v2392_v54 = vpop.xlane.xlu0 %2391  ;;  %v2389_v25 = vpop.xlane.xlu1 %2388 }
 0x9fd   : > { %v2410_v35 = vsub.f32 %v2378_v44, %v2392_v54  ;;  %v2409_v16 = vsub.f32 %v2377_v42, %v2389_v25 }
 0x9ff   : > { %v2420_v7 = vmul.f32 1.442695, %v2410_v35  ;;  %v2418_v0 = vmul.f32 1.442695, %v2409_v16 }
 0xa00   : > { %v2395_v37 = vpop.xlane.xlu0 %2394 }
 0xa01   : > { %4465 = vpow2.f32 %v2420_v7  ;;  %v2411_v11 = vsub.f32 %v2379_v61, %v2395_v37 }
 0xa02   : > { %v2407_v50 = vpop.xlane.xlu1 %2406  ;;  %4467 = vpow2.f32 %v2416_v23 }
 0xa03   : > { %v2422_v36 = vmul.f32 1.442695, %v2411_v11  ;;  %v2415_v12 = vsub.f32 %v2383_v56, %v2407_v50 }
 0xa04   : > { %v2404_v55 = vpop.xlane.xlu0 %2403 }
 0xa05   : > { %4469 = vpow2.f32 %v2422_v36  ;;  %v2414_v62 = vsub.f32 %v2382_v8, %v2404_v55  ;;  %v2430_v30 = vmul.f32 1.442695, %v2415_v12 }
 0xa06   : > { %v2401_v58 = vpop.xlane.xlu1 %2400  ;;  %4471 = vpow2.f32 %v2418_v0 }
 0xa07   : > { %v2428_v28 = vmul.f32 1.442695, %v2414_v62  ;;  %v2413_v18 = vsub.f32 %v2381_v46, %v2401_v58 }
 0xa08   : > { %v2398_v44 = vpop.xlane.xlu0 %2397 }
 0xa09   : > { %4473 = vpow2.f32 %v2428_v28  ;;  %v2412_v40 = vsub.f32 %v2380_v33, %v2398_v44  ;;  %v2426_v54 = vmul.f32 1.442695, %v2413_v18 }
 0xa0a   : > { %v2485_v42 = vpop.permute.xlu1 %2484  ;;  %4475 = vpow2.f32 %v2430_v30 }
 0xa0b   : > { %v2424_v61 = vmul.f32 1.442695, %v2412_v40 }
 0xa0c   : > { %v2487_v25 = vpop.permute.xlu0 %2486 }
 0xa0d   : > { %4477 = vpow2.f32 %v2424_v61  ;;  %4052 = vmatprep.subr.bf16.mxu0 %v2487_v25 }
 0xa0e   : > { %v5607_v35 = vpop.eup %4465  ;;  %4053 = vmatpush3.bf16.msra.mxu0 %v2487_v25  ;;  %4479 = vpow2.f32 %v2426_v54  ;;  %v2483_v58 = vpop.permute.xlu1 %2482 }
 0xa0f   : > { %4054 = vmatprep.subr.bf16.mxu0 %v2485_v42  ;;  %v2438_v8 = vsel %vm794_vm2, %v5607_v35, 0.0  ;;  %v4468_v56 = vpop.eup %4467 }
 0xa10   : > { %2439 = vadd.xlane.f32.xlu0 %v2438_v8  ;;  %v2432_v18 = vsel %vm794_vm2, %v4468_v56, 0.0 }
 0xa12   : > { %v4470_v46 = vpop.eup %4469  ;;  %4055 = vmatpush3.bf16.msra.mxu0 %v2485_v42  ;;  %v2481_v16 = vpop.permute.xlu1 %2480 }
 0xa13   : > { %4056 = vmatprep.subr.bf16.mxu0 %v2483_v58  ;;  %v2441_v33 = vsel %vm794_vm2, %v4470_v46, 0.0  ;;  %v4472_v23 = vpop.eup %4471 }
 0xa14   : > { %2433 = vadd.xlane.f32.xlu0 %v2432_v18  ;;  %2442 = vadd.xlane.f32.xlu1 %v2441_v33  ;;  %v2435_v11 = vsel %vm794_vm2, %v4472_v23, 0.0 }
 0xa16   : > { %v5613_v7 = vpop.eup %4473  ;;  %4057 = vmatpush3.bf16.msra.mxu0 %v2483_v58 }
 0xa17   : > { %4058 = vmatprep.subr.bf16.mxu0 %v2481_v16  ;;  %v2450_v37 = vsel %vm794_vm2, %v5613_v7, 0.0  ;;  %v4476_v50 = vpop.eup %4475 }
 0xa18   : > { %2451 = vadd.xlane.f32.xlu0 %v2450_v37  ;;  %2436 = vadd.xlane.f32.xlu1 %v2435_v11  ;;  %v2453_v12 = vsel %vm794_vm2, %v4476_v50, 0.0 }
 0xa1a   : > { %v4478_v0 = vpop.eup %4477  ;;  %4059 = vmatpush3.bf16.msra.mxu0 %v2481_v16 }
 0xa1b   : > { %v2444_v36 = vsel %vm794_vm2, %v4478_v0, 0.0  ;;  %v4480_v55 = vpop.eup %4479 }
 0xa1c   : > { %2445 = vadd.xlane.f32.xlu1 %v2444_v36  ;;  %2454 = vadd.xlane.f32.xlu0 %v2453_v12  ;;  %v2447_v62 = vsel %vm794_vm2, %v4480_v55, 0.0 }
 0xa20   : > { %2448 = vadd.xlane.f32.xlu0 %v2447_v62 }
 0xa2d   : > { %2621 = vrot.lane.b32.xlu1 %v6164_v2, %s4625_s5 }
 0xa31   : > { %2619 = vrot.lane.b32.xlu1 %v6165_v47, %s4625_s5 }
 0xa35   : > { %2617 = vrot.lane.b32.xlu1 %v6166_v60, %s4625_s5 }
 0xa36   : > { %2623 = vrot.lane.b32.xlu0 %v6163_v26, %s4625_s5 }
 0xa39   : > { %2611 = vrot.lane.b32.xlu1 %v6168_v43, %s4625_s5 }
 0xa3a   : > { %2609 = vrot.lane.b32.xlu0 %v6167_v4, %s4625_s5 }
 0xa3d   : > { %2615 = vrot.lane.b32.xlu1 %v6170_v51, %s4625_s5 }
 0xa3e   : > { %2613 = vrot.lane.b32.xlu0 %v6169_v27, %s4625_s5 }
 0xa99   : > { %v2440_v30 = vpop.xlane.xlu0 %2439 }
 0xa9d   : > { %v2434_v28 = vpop.xlane.xlu0 %2433  ;;  %v2443_v44 = vpop.xlane.xlu1 %2442 }
 0xa9e   : > { %4481 = vrcp.f32 %v2443_v44 }
 0xa9f   : > { %4483 = vrcp.f32 %v2434_v28 }
 0xaa0   : > { %4485 = vrcp.f32 %v2440_v30 }
 0xaa1   : > { %v2452_v40 = vpop.xlane.xlu0 %2451  ;;  %v2437_v42 = vpop.xlane.xlu1 %2436 }
 0xaa2   : > { %4487 = vrcp.f32 %v2437_v42 }
 0xaa5   : > { %v2455_v54 = vpop.xlane.xlu0 %2454  ;;  %v2446_v61 = vpop.xlane.xlu1 %2445 }
 0xaa6   : > { %4489 = vrcp.f32 %v2455_v54 }
 0xaa7   : > { %4491 = vrcp.f32 %v2446_v61 }
 0xaa8   : > { %4493 = vrcp.f32 %v2452_v40 }
 0xaa9   : > { %v2449_v25 = vpop.xlane.xlu0 %2448  ;;  %v2622_v61 = vpop.permute.xlu1 %2621 }
 0xaaa   : > { %4495 = vrcp.f32 %v2449_v25 }
 0xaab   : > { %v4482_v8 = vpop.eup %4481 }
 0xaac   : > { %v4484_v18 = vpop.eup %4483  ;;  %v2467_v37 = vmul.f32 %v4482_v8, %v4470_v46 }
 0xaad   : > { %v2624_v58 = vpop.permute.xlu0 %2623  ;;  %v4486_v33 = vpop.eup %4485  ;;  %v2464_v11 = vmul.f32 %v4484_v18, %v4468_v56 }
 0xaae   : > { %4204 = vmatprep.subr.msk.bf16.mxu0 %vm696_vm0, %v2624_v58  ;;  %v2466_v12 = vmul.f32 %v4486_v33, %v5607_v35  ;;  %v2647_v42 = vsel %vm696_vm0, %v2624_v58, 0  ;;  %v2644_v33 = vsel %vm696_vm0, %v2622_v61, 0  ;;  %v2620_v58 = vpop.permute.xlu1 %2619 }
 0xaaf   : > { %v4488_v16 = vpop.eup %4487 }
 0xab0   : > { %v2465_v36 = vmul.f32 %v4488_v16, %v4472_v23  ;;  %v2473_v28 = vpack.c.bf16 %v2467_v37, %v2466_v12 }
 0xab1   : > { %v2610_v18 = vpop.permute.xlu0 %2609 }
 0xab2   : > { %v2472_v62 = vpack.c.bf16 %v2465_v36, %v2464_v11 }
 0xab3   : > { %v4490_v30 = vpop.eup %4489 }
 0xab4   : > { %v4492_v44 = vpop.eup %4491  ;;  %4060 = vmatprep.mubr.msk.bf16.mxu0 %vm794_vm2, %v2472_v62  ;;  %v2471_v23 = vmul.f32 %v4490_v30, %v4476_v50  ;;  %v2618_v50 = vpop.permute.xlu1 %2617 }
 0xab5   : > { %v4494_v40 = vpop.eup %4493  ;;  %4061 = vmatmul.mubr.msk.bf16.vlgmr.msra.gmra.mxu0 %vm794_vm2, %v2473_v28  ;;  %v2468_v56 = vmul.f32 %v4492_v44, %v4478_v0  ;;  %v2641_v0 = vsel %vm696_vm0, %v2620_v58, 0  ;;  %v2614_v16 = vpop.permute.xlu0 %2613 }
 0xab6   : > { %4069 = vmatpush3.bf16.xpose.msra.mxu0 %v2647_v42  ;;  %v2470_v25 = vmul.f32 %v4494_v40, %v5613_v7  ;;  %v2638_v7 = vsel %vm696_vm0, %v2618_v50, 0 }
 0xab7   : > { %v4496_v54 = vpop.eup %4495  ;;  %4205 = vmatprep.subr.msk.bf16.mxu0 %vm696_vm0, %v2622_v61 }
 0xab8   : > { %v2469_v46 = vmul.f32 %v4496_v54, %v4480_v55  ;;  %v2475_v8 = vpack.c.bf16 %v2471_v23, %v2470_v25  ;;  %v2612_v55 = vpop.permute.xlu1 %2611 }
 0xaba   : > { %v2474_v35 = vpack.c.bf16 %v2469_v46, %v2468_v56 }
 0xabc   : > { %4064 = vmatprep.mubr.msk.bf16.mxu0 %vm794_vm2, %v2474_v35  ;;  %v2616_v37 = vpop.permute.xlu1 %2615 }
 0xabd   : > { %4065 = vmatmul.mubr.msk.bf16.gmra.mxu0 %vm794_vm2, %v2475_v8 }
 0xabe   : > { %4071 = vmatpush3.bf16.xpose.msra.mxu0 %v2644_v33  ;;  %4076 = vmatprep.mubr.msk.bf16.mxu0 %vm696_vm0, %v2610_v18 }
 0xabf   : > { %4206 = vmatprep.subr.msk.bf16.mxu0 %vm696_vm0, %v2620_v58 }
 0xac6   : > { %4073 = vmatpush3.bf16.xpose.msra.mxu0 %v2641_v0 }
 0xac7   : > { %4207 = vmatprep.subr.msk.bf16.mxu0 %vm696_vm0, %v2618_v50 }
 0xace   : > { %4075 = vmatpush3.bf16.xpose.msra.mxu0 %v2638_v7 }
 0xad5   : > { %4077 = vmatmul.mubr.msk.bf16.vlgmr.msra.gmra.mxu0 %vm696_vm0, %v2612_v55 }
 0xad6   : > { %4080 = vmatprep.mubr.msk.bf16.mxu0 %vm696_vm0, %v2614_v16 }
 0xadd   : > { %4081 = vmatmul.mubr.msk.bf16.gmra.mxu0 %vm696_vm0, %v2616_v37 }
 0xb75   : > { %v5655_v11 = vpop.f32.mrf.mxu0 }
 0xb77   : > { %v5657_v36 = vpop.f32.mrf.mxu0 }
 0xb79   : > { %v5659_v12 = vpop.f32.mrf.mxu0 }
 0xb7a   : > { %6175 = vst [vmem:[#allocation14_spill] sm:$0xff] %v5659_v12 }
 0xb7b   : > { %v5661_v62 = vpop.f32.mrf.mxu0 }
 0xb7c   : > { %6176 = vst [vmem:[#allocation15_spill] sm:$0xff] %v5661_v62 }
 0xb7d   : > { %v5663_v30 = vpop.f32.mrf.mxu0 }
 0xb7e   : > { %6177 = vst [vmem:[#allocation13_spill] sm:$0xff] %v5663_v30 }
 0xb7f   : > { %v5665_v28 = vpop.f32.mrf.mxu0 }
 0xb80   : > { %6178 = vst [vmem:[#allocation11_spill] sm:$0xff] %v5665_v28 }
 0xb81   : > { %v5667_v44 = vpop.f32.mrf.mxu0 }
 0xb82   : > { %6179 = vst [vmem:[#allocation9_spill] sm:$0xff] %v5667_v44 }
 0xb83   : > { %v5669_v40 = vpop.f32.mrf.mxu0 }
 0xb84   : > { %6180 = vst [vmem:[#allocation7_spill] sm:$0xff] %v5669_v40 }
 0xb95   : > { %v4078_v42 = vpop.f32.mrf.mxu0 }
 0xb96   : > { %v2716_v23 = vsel %vm4949_vm1, %v4078_v42, -1e+30 }
 0xb97   : > { %v2683_v54 = vpop.f32.mrf.mxu0  ;;  %v2728_v8 = vsel %vm794_vm2, %v2716_v23, -inf }
 0xb98   : > { %v2714_v61 = vsel %vm4953_vm3, %v2683_v54, -1e+30 }
 0xb99   : > { %v2722_v56 = vsel %vm794_vm2, %v2714_v61, -inf  ;;  %v4079_v46 = vpop.f32.mrf.mxu0 }
 0xb9a   : > { %2723 = vmax.xlane.f32.xlu0 %v2722_v56  ;;  %v2717_v58 = vsel %vm4970_vm4, %v4079_v46, -1e+30 }
 0xb9b   : > { %v2686_v35 = vpop.f32.mrf.mxu0  ;;  %v2731_v50 = vsel %vm794_vm2, %v2717_v58, -inf }
 0xb9c   : > { %v2715_v25 = vsel %vm4974_vm5, %v2686_v35, -1e+30 }
 0xb9d   : > { %v2725_v18 = vsel %vm794_vm2, %v2715_v25, -inf  ;;  %v4082_v33 = vpop.f32.mrf.mxu0 }
 0xb9e   : > { %2729 = vmax.xlane.f32.xlu0 %v2728_v8  ;;  %2726 = vmax.xlane.f32.xlu1 %v2725_v18  ;;  %v2720_v55 = vsel %vm4980_vm6, %v4082_v33, -1e+30 }
 0xb9f   : > { %v2699_v0 = vpop.f32.mrf.mxu0  ;;  %v2740_v56 = vsel %vm794_vm2, %v2720_v55, -inf }
 0xba0   : > { %v2718_v46 = vsel %vm4998_vm7, %v2699_v0, -1e+30 }
 0xba1   : > { %v4083_v7 = vpop.f32.mrf.mxu0  ;;  %v2734_v8 = vsel %vm794_vm2, %v2718_v46, -inf }
 0xba2   : > { %v2721_v16 = vsel %vm5004_vm8, %v4083_v7, -1e+30  ;;  %2732 = vmax.xlane.f32.xlu0 %v2731_v50 }
 0xba3   : > { %v2743_v37 = vsel %vm794_vm2, %v2721_v16, -inf  ;;  %v2702_v42 = vpop.f32.mrf.mxu0 }
 0xba4   : > { %v2719_v54 = vsel %vm5010_vm9, %v2702_v42, -1e+30  ;;  %2744 = vmax.xlane.f32.xlu1 %v2743_v37 }
 0xba5   : > { %v2737_v35 = vsel %vm794_vm2, %v2719_v54, -inf }
 0xba6   : > { %2741 = vmax.xlane.f32.xlu0 %v2740_v56 }
 0xba8   : > { %2738 = vmax.xlane.f32.xlu1 %v2737_v35 }
 0xbaa   : > { %2735 = vmax.xlane.f32.xlu0 %v2734_v8 }
 0xbb9   : > { %2818 = vrot.lane.b32.xlu1 %v5339_v14, %s4625_s5 }
 0xbbd   : > { %2816 = vrot.lane.b32.xlu1 %v4908_v57, %s4625_s5 }
 0xbc0   : > { %2820 = vrot.lane.b32.xlu0 %v4919_v1, %s4625_s5 }
 0xbc1   : > { %2814 = vrot.lane.b32.xlu1 %v4913_v59, %s4625_s5 }
 0xc23   : > { %v2724_v18 = vpop.xlane.xlu0 %2723 }
 0xc24   : > { %v2746_v33 = vsub.f32 %v2714_v61, %v2724_v18 }
 0xc26   : > { %v2754_v37 = vmul.f32 1.442695, %v2746_v33 }
 0xc27   : > { %v2730_v0 = vpop.xlane.xlu0 %2729  ;;  %v2727_v50 = vpop.xlane.xlu1 %2726 }
 0xc28   : > { %v2748_v7 = vsub.f32 %v2716_v23, %v2730_v0  ;;  %v2747_v56 = vsub.f32 %v2715_v25, %v2727_v50 }
 0xc2a   : > { %v2758_v42 = vmul.f32 1.442695, %v2748_v7  ;;  %v2756_v40 = vmul.f32 1.442695, %v2747_v56 }
 0xc2b   : > { %v2733_v35 = vpop.xlane.xlu0 %2732 }
 0xc2c   : > { %4497 = vpow2.f32 %v2758_v42  ;;  %v2749_v8 = vsub.f32 %v2717_v58, %v2733_v35 }
 0xc2d   : > { %v2745_v44 = vpop.xlane.xlu1 %2744  ;;  %4499 = vpow2.f32 %v2754_v37 }
 0xc2e   : > { %v2760_v12 = vmul.f32 1.442695, %v2749_v8  ;;  %v2753_v62 = vsub.f32 %v2721_v16, %v2745_v44 }
 0xc2f   : > { %v2742_v34 = vpop.xlane.xlu0 %2741 }
 0xc30   : > { %4501 = vpow2.f32 %v2760_v12  ;;  %v2752_v30 = vsub.f32 %v2720_v55, %v2742_v34  ;;  %v2768_v61 = vmul.f32 1.442695, %v2753_v62 }
 0xc31   : > { %v2739_v9 = vpop.xlane.xlu1 %2738  ;;  %4503 = vpow2.f32 %v2756_v40 }
 0xc32   : > { %v2766_v18 = vmul.f32 1.442695, %v2752_v30  ;;  %v2751_v28 = vsub.f32 %v2719_v54, %v2739_v9 }
 0xc33   : > { %v2736_v23 = vpop.xlane.xlu0 %2735 }
 0xc34   : > { %4505 = vpow2.f32 %v2766_v18  ;;  %v2750_v33 = vsub.f32 %v2718_v46, %v2736_v23  ;;  %v2764_v0 = vmul.f32 1.442695, %v2751_v28 }
 0xc35   : > { %v2819_v25 = vpop.permute.xlu1 %2818  ;;  %4507 = vpow2.f32 %v2768_v61 }
 0xc36   : > { %v2762_v58 = vmul.f32 1.442695, %v2750_v33 }
 0xc37   : > { %v2821_v50 = vpop.permute.xlu0 %2820 }
 0xc38   : > { %4509 = vpow2.f32 %v2762_v58  ;;  %4084 = vmatprep.subr.bf16.mxu1 %v2821_v50 }
 0xc39   : > { %v5703_v7 = vpop.eup %4497  ;;  %4085 = vmatpush3.bf16.msra.mxu1 %v2821_v50  ;;  %4511 = vpow2.f32 %v2764_v0  ;;  %v2817_v9 = vpop.permute.xlu1 %2816 }
 0xc3a   : > { %4086 = vmatprep.subr.bf16.mxu1 %v2819_v25  ;;  %v2776_v34 = vsel %vm794_vm2, %v5703_v7, 0.0  ;;  %v4500_v12 = vpop.eup %4499 }
 0xc3b   : > { %2777 = vadd.xlane.f32.xlu0 %v2776_v34  ;;  %v2770_v30 = vsel %vm794_vm2, %v4500_v12, 0.0 }
 0xc3d   : > { %v4502_v62 = vpop.eup %4501  ;;  %4087 = vmatpush3.bf16.msra.mxu1 %v2819_v25  ;;  %v2815_v55 = vpop.permute.xlu1 %2814 }
 0xc3e   : > { %4088 = vmatprep.subr.bf16.mxu1 %v2817_v9  ;;  %v2779_v28 = vsel %vm794_vm2, %v4502_v62, 0.0  ;;  %v4504_v44 = vpop.eup %4503 }
 0xc3f   : > { %2771 = vadd.xlane.f32.xlu0 %v2770_v30  ;;  %2780 = vadd.xlane.f32.xlu1 %v2779_v28  ;;  %v2773_v54 = vsel %vm794_vm2, %v4504_v44, 0.0 }
 0xc41   : > { %v5709_v40 = vpop.eup %4505  ;;  %4089 = vmatpush3.bf16.msra.mxu1 %v2817_v9 }
 0xc42   : > { %4090 = vmatprep.subr.bf16.mxu1 %v2815_v55  ;;  %v2788_v16 = vsel %vm794_vm2, %v5709_v40, 0.0  ;;  %v4508_v46 = vpop.eup %4507 }
 0xc43   : > { %2789 = vadd.xlane.f32.xlu0 %v2788_v16  ;;  %2774 = vadd.xlane.f32.xlu1 %v2773_v54  ;;  %v2791_v56 = vsel %vm794_vm2, %v4508_v46, 0.0 }
 0xc45   : > { %v4510_v37 = vpop.eup %4509  ;;  %4091 = vmatpush3.bf16.msra.mxu1 %v2815_v55 }
 0xc46   : > { %v2782_v42 = vsel %vm794_vm2, %v4510_v37, 0.0  ;;  %v4512_v35 = vpop.eup %4511 }
 0xc47   : > { %2783 = vadd.xlane.f32.xlu1 %v2782_v42  ;;  %2792 = vadd.xlane.f32.xlu0 %v2791_v56  ;;  %v2785_v8 = vsel %vm794_vm2, %v4512_v35, 0.0 }
 0xc4b   : > { %2786 = vadd.xlane.f32.xlu0 %v2785_v8 }
 0xc58   : > { %2955 = vrot.lane.b32.xlu1 %v6164_v2, %s4626_s6 }
 0xc5c   : > { %2953 = vrot.lane.b32.xlu1 %v6165_v47, %s4626_s6 }
 0xc60   : > { %2951 = vrot.lane.b32.xlu1 %v6166_v60, %s4626_s6 }
 0xc61   : > { %2957 = vrot.lane.b32.xlu0 %v6163_v26, %s4626_s6 }
 0xc64   : > { %2945 = vrot.lane.b32.xlu1 %v6168_v43, %s4626_s6 }
 0xc65   : > { %2943 = vrot.lane.b32.xlu0 %v6167_v4, %s4626_s6 }
 0xc68   : > { %2949 = vrot.lane.b32.xlu1 %v6170_v51, %s4626_s6 }
 0xc69   : > { %2947 = vrot.lane.b32.xlu0 %v6169_v27, %s4626_s6 }
 0xcc4   : > { %v2778_v2 = vpop.xlane.xlu0 %2777 }
 0xcc8   : > { %v2772_v47 = vpop.xlane.xlu0 %2771  ;;  %v2781_v61 = vpop.xlane.xlu1 %2780 }
 0xcc9   : > { %4513 = vrcp.f32 %v2781_v61 }
 0xcca   : > { %4515 = vrcp.f32 %v2772_v47 }
 0xccb   : > { %4517 = vrcp.f32 %v2778_v2 }
 0xccc   : > { %v2790_v60 = vpop.xlane.xlu0 %2789  ;;  %v2775_v18 = vpop.xlane.xlu1 %2774 }
 0xccd   : > { %4519 = vrcp.f32 %v2775_v18 }
 0xcd0   : > { %v2793_v26 = vpop.xlane.xlu0 %2792  ;;  %v2784_v43 = vpop.xlane.xlu1 %2783 }
 0xcd1   : > { %4521 = vrcp.f32 %v2793_v26 }
 0xcd2   : > { %4523 = vrcp.f32 %v2784_v43 }
 0xcd3   : > { %4525 = vrcp.f32 %v2790_v60 }
 0xcd4   : > { %v2787_v4 = vpop.xlane.xlu0 %2786  ;;  %v2956_v56 = vpop.permute.xlu1 %2955 }
 0xcd5   : > { %4527 = vrcp.f32 %v2787_v4  ;;  %v2978_v47 = vsel %vm696_vm0, %v2956_v56, 0 }
 0xcd6   : > { %v4514_v51 = vpop.eup %4513 }
 0xcd7   : > { %v4516_v33 = vpop.eup %4515  ;;  %v2805_v0 = vmul.f32 %v4514_v51, %v4502_v62 }
 0xcd8   : > { %v2958_v23 = vpop.permute.xlu0 %2957  ;;  %v4518_v27 = vpop.eup %4517  ;;  %v2802_v58 = vmul.f32 %v4516_v33, %v4500_v12 }
 0xcd9   : > { %4208 = vmatprep.subr.msk.bf16.mxu1 %vm696_vm0, %v2958_v23  ;;  %v2804_v34 = vmul.f32 %v4518_v27, %v5703_v7  ;;  %v2981_v54 = vsel %vm696_vm0, %v2958_v23, 0  ;;  %v2954_v60 = vpop.permute.xlu1 %2953 }
 0xcda   : > { %v4520_v25 = vpop.eup %4519 }
 0xcdb   : > { %v2803_v50 = vmul.f32 %v4520_v25, %v4504_v44  ;;  %v2811_v28 = vpack.c.bf16 %v2805_v0, %v2804_v34 }
 0xcdc   : > { %v2944_v61 = vpop.permute.xlu0 %2943 }
 0xcdd   : > { %v2810_v9 = vpack.c.bf16 %v2803_v50, %v2802_v58 }
 0xcde   : > { %v4522_v30 = vpop.eup %4521 }
 0xcdf   : > { %v4524_v55 = vpop.eup %4523  ;;  %4092 = vmatprep.mubr.msk.bf16.mxu1 %vm794_vm2, %v2810_v9  ;;  %v2809_v44 = vmul.f32 %v4522_v30, %v4508_v46  ;;  %v2952_v46 = vpop.permute.xlu1 %2951 }
 0xce0   : > { %v4526_v16 = vpop.eup %4525  ;;  %4093 = vmatmul.mubr.msk.bf16.vlgmr.msra.gmra.mxu1 %vm794_vm2, %v2811_v28  ;;  %v2806_v12 = vmul.f32 %v4524_v55, %v4510_v37  ;;  %v2975_v37 = vsel %vm696_vm0, %v2954_v60, 0  ;;  %v2948_v18 = vpop.permute.xlu0 %2947 }
 0xce1   : > { %4101 = vmatpush3.bf16.xpose.msra.mxu1 %v2981_v54  ;;  %v2808_v8 = vmul.f32 %v4526_v16, %v5709_v40  ;;  %v2972_v40 = vsel %vm696_vm0, %v2952_v46, 0 }
 0xce2   : > { %v4528_v42 = vpop.eup %4527  ;;  %4209 = vmatprep.subr.msk.bf16.mxu1 %vm696_vm0, %v2956_v56 }
 0xce3   : > { %v2807_v62 = vmul.f32 %v4528_v42, %v4512_v35  ;;  %v2813_v2 = vpack.c.bf16 %v2809_v44, %v2808_v8  ;;  %v2946_v35 = vpop.permute.xlu1 %2945 }
 0xce5   : > { %v2812_v7 = vpack.c.bf16 %v2807_v62, %v2806_v12 }
 0xce7   : > { %4096 = vmatprep.mubr.msk.bf16.mxu1 %vm794_vm2, %v2812_v7  ;;  %v2950_v26 = vpop.permute.xlu1 %2949 }
 0xce8   : > { %4097 = vmatmul.mubr.msk.bf16.gmra.mxu1 %vm794_vm2, %v2813_v2 }
 0xce9   : > { %4103 = vmatpush3.bf16.xpose.msra.mxu1 %v2978_v47  ;;  %4108 = vmatprep.mubr.msk.bf16.mxu1 %vm696_vm0, %v2944_v61 }
 0xcea   : > { %4210 = vmatprep.subr.msk.bf16.mxu1 %vm696_vm0, %v2954_v60 }
 0xcf1   : > { %4105 = vmatpush3.bf16.xpose.msra.mxu1 %v2975_v37 }
 0xcf2   : > { %4211 = vmatprep.subr.msk.bf16.mxu1 %vm696_vm0, %v2952_v46 }
 0xcf9   : > { %4107 = vmatpush3.bf16.xpose.msra.mxu1 %v2972_v40 }
 0xd00   : > { %4109 = vmatmul.mubr.msk.bf16.vlgmr.msra.gmra.mxu1 %vm696_vm0, %v2946_v35 }
 0xd01   : > { %4112 = vmatprep.mubr.msk.bf16.mxu1 %vm696_vm0, %v2948_v18 }
 0xd08   : > { %4113 = vmatmul.mubr.msk.bf16.gmra.mxu1 %vm696_vm0, %v2950_v26 }
 0xda0   : > { %v5751_v43 = vpop.f32.mrf.mxu1 }
 0xda2   : > { %v5753_v4 = vpop.f32.mrf.mxu1 }
 0xda4   : > { %v5755_v51 = vpop.f32.mrf.mxu1 }
 0xda6   : > { %v5757_v23 = vpop.f32.mrf.mxu1 }
 0xda8   : > { %v5759_v33 = vpop.f32.mrf.mxu1 }
 0xdaa   : > { %v5761_v27 = vpop.f32.mrf.mxu1 }
 0xdac   : > { %v5763_v25 = vpop.f32.mrf.mxu1 }
 0xdae   : > { %v5765_v0 = vpop.f32.mrf.mxu1 }
 0xdc0   : > { %v4110_v58 = vpop.f32.mrf.mxu1 }
 0xdc1   : > { %v3050_v28 = vsel %vm4949_vm1, %v4110_v58, -1e+30 }
 0xdc2   : > { %v3017_v50 = vpop.f32.mrf.mxu1  ;;  %v3062_v54 = vsel %vm794_vm2, %v3050_v28, -inf }
 0xdc3   : > { %v3048_v34 = vsel %vm4953_vm3, %v3017_v50, -1e+30 }
 0xdc4   : > { %v3056_v9 = vsel %vm794_vm2, %v3048_v34, -inf  ;;  %v4111_v30 = vpop.f32.mrf.mxu1 }
 0xdc5   : > { %3057 = vmax.xlane.f32.xlu0 %v3056_v9  ;;  %v3051_v48 = vsel %vm4970_vm4, %v4111_v30, -1e+30 }
 0xdc6   : > { %v3020_v55 = vpop.f32.mrf.mxu1  ;;  %v3065_v62 = vsel %vm794_vm2, %v3051_v48, -inf }
 0xdc7   : > { %v3049_v16 = vsel %vm4974_vm5, %v3020_v55, -1e+30 }
 0xdc8   : > { %v3059_v42 = vsel %vm794_vm2, %v3049_v16, -inf  ;;  %v4114_v56 = vpop.f32.mrf.mxu1 }
 0xdc9   : > { %3063 = vmax.xlane.f32.xlu0 %v3062_v54  ;;  %3060 = vmax.xlane.f32.xlu1 %v3059_v42  ;;  %v3054_v2 = vsel %vm4980_vm6, %v4114_v56, -1e+30 }
 0xdca   : > { %v3033_v12 = vpop.f32.mrf.mxu1  ;;  %v3074_v22 = vsel %vm794_vm2, %v3054_v2, -inf }
 0xdcb   : > { %v3052_v44 = vsel %vm4998_vm7, %v3033_v12, -1e+30 }
 0xdcc   : > { %v4115_v45 = vpop.f32.mrf.mxu1  ;;  %v3068_v8 = vsel %vm794_vm2, %v3052_v44, -inf }
 0xdcd   : > { %3066 = vmax.xlane.f32.xlu0 %v3065_v62  ;;  %v3055_v47 = vsel %vm5004_vm8, %v4115_v45, -1e+30 }
 0xdce   : > { %v3036_v5 = vpop.f32.mrf.mxu1  ;;  %v3077_v61 = vsel %vm794_vm2, %v3055_v47, -inf }
 0xdcf   : > { %v5783_v7 = vsel %vm5010_vm9, %v3036_v5, -1e+30 }
 0xdd0   : > { %v3071_v3 = vsel %vm794_vm2, %v5783_v7, -inf }
 0xdd1   : > { %3069 = vmax.xlane.f32.xlu0 %v3068_v8  ;;  %3072 = vmax.xlane.f32.xlu1 %v3071_v3 }
 0xdd5   : > { %3075 = vmax.xlane.f32.xlu0 %v3074_v22  ;;  %3078 = vmax.xlane.f32.xlu1 %v3077_v61 }
 0xe4e   : > { %v3058_v31 = vpop.xlane.xlu0 %3057 }
 0xe4f   : > { %v3080_v60 = vsub.f32 %v3048_v34, %v3058_v31 }
 0xe51   : > { %v3088_v35 = vmul.f32 1.442695, %v3080_v60 }
 0xe52   : > { %v3064_v37 = vpop.xlane.xlu0 %3063  ;;  %v3061_v46 = vpop.xlane.xlu1 %3060 }
 0xe53   : > { %v3082_v40 = vsub.f32 %v3050_v28, %v3064_v37  ;;  %v3081_v10 = vsub.f32 %v3049_v16, %v3061_v46 }
 0xe55   : > { %v3092_v18 = vmul.f32 1.442695, %v3082_v40  ;;  %v3090_v58 = vmul.f32 1.442695, %v3081_v10 }
 0xe56   : > { %v3067_v26 = vpop.xlane.xlu0 %3066 }
 0xe57   : > { %4529 = vpow2.f32 %v3092_v18  ;;  %v3083_v39 = vsub.f32 %v3051_v48, %v3067_v26 }
 0xe58   : > { %4531 = vpow2.f32 %v3088_v35 }
 0xe59   : > { %v3094_v50 = vmul.f32 1.442695, %v3083_v39 }
 0xe5a   : > { %v3070_v9 = vpop.xlane.xlu0 %3069  ;;  %v3073_v22 = vpop.xlane.xlu1 %3072 }
 0xe5b   : > { %4533 = vpow2.f32 %v3094_v50  ;;  %v3084_v30 = vsub.f32 %v3052_v44, %v3070_v9  ;;  %v3085_v60 = vsub.f32 %v5783_v7, %v3073_v22 }
 0xe5c   : > { %4535 = vpow2.f32 %v3090_v58 }
 0xe5d   : > { %v3096_v42 = vmul.f32 1.442695, %v3084_v30  ;;  %v3098_v46 = vmul.f32 1.442695, %v3085_v60  ;;  %v4298_v60 = vld [vmem:[%s6102_s2 + $0x30] sm:$0xff]  }
 0xe5e   : > { %v3076_v55 = vpop.xlane.xlu0 %3075  ;;  %v3079_v61 = vpop.xlane.xlu1 %3078 }
 0xe5f   : > { %v3086_v54 = vsub.f32 %v3054_v2, %v3076_v55  ;;  %v3087_v31 = vsub.f32 %v3055_v47, %v3079_v61  ;;  %v6194_v47 = vld [vmem:[#allocation9_spill] sm:$0xff] }
 0xe61   : > { %v3100_v34 = vmul.f32 1.442695, %v3086_v54  ;;  %v3102_v37 = vmul.f32 1.442695, %v3087_v31 }
 0xe63   : > { %4537 = vpow2.f32 %v3100_v34 }
 0xe64   : > { %v5794_v56 = vpop.eup %4529  ;;  %4539 = vpow2.f32 %v3096_v42 }
 0xe65   : > { %v3110_v28 = vsel %vm794_vm2, %v5794_v56, 0.0  ;;  %v5798_v16 = vpop.eup %4531  ;;  %4541 = vpow2.f32 %v3102_v37 }
 0xe66   : > { %3111 = vadd.xlane.f32.xlu0 %v3110_v28  ;;  %v3104_v12 = vsel %vm794_vm2, %v5798_v16, 0.0  ;;  %4543 = vpow2.f32 %v3098_v46 }
 0xe68   : > { %v5800_v48 = vpop.eup %4533 }
 0xe69   : > { %v3113_v62 = vsel %vm794_vm2, %v5800_v48, 0.0  ;;  %v5806_v45 = vpop.eup %4535 }
 0xe6a   : > { %3105 = vadd.xlane.f32.xlu0 %v3104_v12  ;;  %3114 = vadd.xlane.f32.xlu1 %v3113_v62  ;;  %v3107_v44 = vsel %vm794_vm2, %v5806_v45, 0.0 }
 0xe6e   : > { %3108 = vadd.xlane.f32.xlu1 %v3107_v44 }
 0xe70   : > { %v5810_v5 = vpop.eup %4537 }
 0xe71   : > { %v3122_v8 = vsel %vm794_vm2, %v5810_v5, 0.0  ;;  %v5814_v3 = vpop.eup %4539 }
 0xe72   : > { %3123 = vadd.xlane.f32.xlu0 %v3122_v8  ;;  %v3116_v2 = vsel %vm794_vm2, %v5814_v3, 0.0  ;;  %v4297_v8 = vld [vmem:[%s6102_s2 + $0x38] sm:$0xff]  }
 0xe76   : > { %3117 = vadd.xlane.f32.xlu0 %v3116_v2 }
 0xe7f   : > { %3152 = vrot.lane.b32.xlu1 %v5339_v14, %s4626_s6 }
 0xe83   : > { %3150 = vrot.lane.b32.xlu1 %v4908_v57, %s4626_s6  ;;  %v5835_v57 = vpop.eup %4541 }
 0xe84   : > { %v5841_v14 = vpop.eup %4543 }
 0xe8c   : > { %3154 = vrot.lane.b32.xlu0 %v4919_v1, %s4626_s6  ;;  %v3125_v1 = vsel %vm794_vm2, %v5835_v57, 0.0 }
 0xe90   : > { %1286 = vrot.lane.b32.xlu0 %v5361_v41, %s4626_s6  ;;  %v6182_v41 = vld [vmem:[#allocation19_spill] sm:$0xff] }
 0xe94   : > { %1290 = vrot.lane.b32.xlu0 %v5359_v29, %s4626_s6  ;;  %v3119_v29 = vsel %vm794_vm2, %v5841_v14, 0.0 }
 0xe98   : > { %1621 = vrot.lane.b32.xlu0 %v5377_v53, %s4625_s5  ;;  %v6188_v53 = vld [vmem:[#allocation22_spill] sm:$0xff] }
 0xe9c   : > { %1625 = vrot.lane.b32.xlu0 %v5375_v13, %s4625_s5  ;;  %v6187_v13 = vld [vmem:[#allocation23_spill] sm:$0xff] }
 0xea0   : > { %1956 = vrot.lane.b32.xlu0 %v5481_v24, %s4624_s28 }
 0xea4   : > { %1960 = vrot.lane.b32.xlu0 %v5479_v19, %s4624_s28 }
 0xea7   : > { %3126 = vadd.xlane.f32.xlu1 %v3125_v1 }
 0xea8   : > { %1294 = vrot.lane.b32.xlu0 %v5369_v21, %s4626_s6  ;;  %v6186_v21 = vld [vmem:[#allocation20_spill] sm:$0xff] }
 0xeab   : > { %3120 = vadd.xlane.f32.xlu1 %v3119_v29 }
 0xeac   : > { %1298 = vrot.lane.b32.xlu0 %v5367_v38, %s4626_s6  ;;  %v6185_v38 = vld [vmem:[#allocation21_spill] sm:$0xff] }
 0xeb0   : > { %1629 = vrot.lane.b32.xlu0 %v5385_v49, %s4625_s5  ;;  %v6191_v49 = vld [vmem:[#allocation15_spill] sm:$0xff] }
 0xeb4   : > { %1633 = vrot.lane.b32.xlu0 %v5383_v6, %s4625_s5 }
 0xeb8   : > { %1964 = vrot.lane.b32.xlu0 %v5489_v15, %s4624_s28 }
 0xebc   : > { %1968 = vrot.lane.b32.xlu0 %v5487_v52, %s4624_s28  ;;  %3148 = vrot.lane.b32.xlu1 %v4913_v59, %s4626_s6  ;;  %v6181_v59 = vld [vmem:[#allocation11_spill] sm:$0xff]  ;;  %v6192_v52 = vld [vmem:[#allocation14_spill] sm:$0xff] }
 0xec0   : > { %2577 = vrot.lane.b32.xlu0 %v5657_v36, %s4626_s6  ;;  %1288 = vrot.lane.b32.xlu1 %v5365_v32, %s4626_s6  ;;  %v6184_v32 = vld [vmem:[#allocation18_spill] sm:$0xff] }
 0xec4   : > { %2581 = vrot.lane.b32.xlu0 %v5655_v11, %s4626_s6  ;;  %1292 = vrot.lane.b32.xlu1 %v5363_v20, %s4626_s6  ;;  %v6183_v20 = vld [vmem:[#allocation13_spill] sm:$0xff] }
 0xec8   : > { %2911 = vrot.lane.b32.xlu0 %v5753_v4, %s4625_s5  ;;  %1623 = vrot.lane.b32.xlu1 %v5381_v63, %s4625_s5  ;;  %v6190_v63 = vld [vmem:[#allocation16_spill] sm:$0xff] }
 0xecc   : > { %2915 = vrot.lane.b32.xlu0 %v5751_v43, %s4625_s5  ;;  %1627 = vrot.lane.b32.xlu1 %v5379_v17, %s4625_s5  ;;  %v6189_v17 = vld [vmem:[#allocation17_spill] sm:$0xff]  ;;  %v6193_v43 = vld [vmem:[#allocation7_spill] sm:$0xff] }
 0xed0   : > { %2585 = vrot.lane.b32.xlu0 %v6181_v59, %s4626_s6  ;;  %1958 = vrot.lane.b32.xlu1 %v6182_v41, %s4624_s28 }
 0xed4   : > { %2589 = vrot.lane.b32.xlu0 %v6183_v20, %s4626_s6  ;;  %1962 = vrot.lane.b32.xlu1 %v6184_v32, %s4624_s28 }
 0xed8   : > { %2919 = vrot.lane.b32.xlu0 %v5761_v27, %s4625_s5  ;;  %1296 = vrot.lane.b32.xlu1 %v6185_v38, %s4626_s6 }
 0xedc   : > { %1300 = vrot.lane.b32.xlu1 %v6186_v21, %s4626_s6 }
 0xee0   : > { %1631 = vrot.lane.b32.xlu1 %v6187_v13, %s4625_s5  ;;  %v4300_v13 = vld [vmem:[%s6102_s2 + $0x20] sm:$0xff]  }
 0xee4   : > { %1635 = vrot.lane.b32.xlu1 %v6188_v53, %s4625_s5 }
 0xee8   : > { %1966 = vrot.lane.b32.xlu1 %v6189_v17, %s4624_s28 }
 0xeec   : > { %1970 = vrot.lane.b32.xlu1 %v6190_v63, %s4624_s28 }
 0xeef   : > { %v3112_v6 = vpop.xlane.xlu0 %3111 }
 0xef0   : > { %2579 = vrot.lane.b32.xlu1 %v6191_v49, %s4626_s6  ;;  %v4302_v49 = vld [vmem:[%s6102_s2 + $0x10] sm:$0xff]  }
 0xef3   : > { %v3106_v19 = vpop.xlane.xlu0 %3105  ;;  %v3115_v24 = vpop.xlane.xlu1 %3114 }
 0xef4   : > { %2583 = vrot.lane.b32.xlu1 %v6192_v52, %s4626_s6  ;;  %4545 = vrcp.f32 %v3106_v19  ;;  %v4303_v52 = vld [vmem:[%s6102_s2 + $0x8] sm:$0xff]  }
 0xef7   : > { %v3109_v15 = vpop.xlane.xlu1 %3108 }
 0xef8   : > { %4547 = vrcp.f32 %v3109_v15  ;;  %2913 = vrot.lane.b32.xlu1 %v5757_v23, %s4625_s5 }
 0xef9   : > { %4549 = vrcp.f32 %v3115_v24 }
 0xefa   : > { %4551 = vrcp.f32 %v3112_v6 }
 0xefb   : > { %v3124_v11 = vpop.xlane.xlu0 %3123  ;;  %v3153_v27 = vpop.permute.xlu1 %3152 }
 0xefc   : > { %2917 = vrot.lane.b32.xlu1 %v5755_v51, %s4625_s5 }
 0xeff   : > { %v3118_v36 = vpop.xlane.xlu0 %3117  ;;  %v3151_v10 = vpop.permute.xlu1 %3150 }
 0xf00   : > { %2587 = vrot.lane.b32.xlu1 %v6193_v43, %s4626_s6 }
 0xf01   : > { %v4546_v4 = vpop.eup %4545 }
 0xf02   : > { %v3136_v23 = vmul.f32 %v4546_v4, %v5798_v16 }
 0xf03   : > { %v3155_v7 = vpop.permute.xlu0 %3154 }
 0xf04   : > { %4116 = vmatprep.subr.bf16.mxu0 %v3155_v7  ;;  %2591 = vrot.lane.b32.xlu1 %v6194_v47, %s4626_s6 }
 0xf05   : > { %v4548_v40 = vpop.eup %4547  ;;  %4117 = vmatpush3.bf16.msra.mxu0 %v3155_v7 }
 0xf06   : > { %4118 = vmatprep.subr.bf16.mxu0 %v3153_v27  ;;  %v3137_v35 = vmul.f32 %v4548_v40, %v5806_v45  ;;  %v4550_v16 = vpop.eup %4549 }
 0xf07   : > { %v1287_v51 = vpop.permute.xlu0 %1286  ;;  %v4552_v62 = vpop.eup %4551  ;;  %v3139_v45 = vmul.f32 %v4550_v16, %v5800_v48 }
 0xf08   : > { %1311 = vst.msk [vmem:[#allocation2] sm:$0xff] %vm1310_vm10, %v1287_v51  ;;  %2921 = vrot.lane.b32.xlu1 %v5765_v0, %s4625_s5  ;;  %v3144_v18 = vpack.c.bf16 %v3137_v35, %v3136_v23  ;;  %v3138_v22 = vmul.f32 %v4552_v62, %v5794_v56  ;;  %v4299_v56 = vld [vmem:[%s6102_s2 + $0x28] sm:$0xff]  }
 0xf09   : > { %4119 = vmatpush3.bf16.msra.mxu0 %v3153_v27 }
 0xf0a   : > { %4120 = vmatprep.subr.bf16.mxu0 %v3151_v10  ;;  %4124 = vmatprep.mubr.msk.bf16.mxu0 %vm794_vm2, %v3144_v18  ;;  %v3145_v61 = vpack.c.bf16 %v3139_v45, %v3138_v22 }
 0xf0b   : > { %v1291_v26 = vpop.permute.xlu0 %1290 }
 0xf0c   : > { %1313 = vst.msk [vmem:[#allocation2 + $0x10] sm:$0xff] %vm1310_vm10, %v1291_v26 }
 0xf0d   : > { %4121 = vmatpush3.bf16.msra.mxu0 %v3151_v10 }
 0xf0f   : > { %v1622_v39 = vpop.permute.xlu0 %1621 }
 0xf10   : > { %1646 = vst.msk [vmem:[#allocation2] sm:$0xff] %vm1645_vm11, %v1622_v39 }
 0xf13   : > { %v1626_v58 = vpop.permute.xlu0 %1625 }
 0xf14   : > { %1648 = vst.msk [vmem:[#allocation2 + $0x10] sm:$0xff] %vm1645_vm11, %v1626_v58 }
 0xf17   : > { %v1957_v50 = vpop.permute.xlu0 %1956 }
 0xf18   : > { %1981 = vst.msk [vmem:[#allocation2] sm:$0xff] %vm1980_vm12, %v1957_v50 }
 0xf1b   : > { %v1961_v0 = vpop.permute.xlu0 %1960 }
 0xf1c   : > { %1983 = vst.msk [vmem:[#allocation2 + $0x10] sm:$0xff] %vm1980_vm12, %v1961_v0 }
 0xf1f   : > { %v1295_v9 = vpop.permute.xlu0 %1294  ;;  %v3277_v43 = vld [vmem:[#allocation2] sm:$0xff] }
 0xf20   : > { %1315 = vst.msk [vmem:[#allocation2 + $0x20] sm:$0xff] %vm1310_vm10, %v1295_v9 }
 0xf23   : > { %v1299_v30 = vpop.permute.xlu0 %1298  ;;  %v3279_v40 = vld [vmem:[#allocation2 + $0x10] sm:$0xff] }
 0xf24   : > { %1317 = vst.msk [vmem:[#allocation2 + $0x30] sm:$0xff] %vm1310_vm10, %v1299_v30 }
 0xf27   : > { %v1630_v55 = vpop.permute.xlu0 %1629 }
 0xf28   : > { %1650 = vst.msk [vmem:[#allocation2 + $0x20] sm:$0xff] %vm1645_vm11, %v1630_v55 }
 0xf2b   : > { %v1634_v54 = vpop.permute.xlu0 %1633 }
 0xf2c   : > { %1652 = vst.msk [vmem:[#allocation2 + $0x30] sm:$0xff] %vm1645_vm11, %v1634_v54 }
 0xf2f   : > { %v1965_v42 = vpop.permute.xlu0 %1964 }
 0xf30   : > { %1985 = vst.msk [vmem:[#allocation2 + $0x20] sm:$0xff] %vm1980_vm12, %v1965_v42  ;;  %v3127_v34 = vpop.xlane.xlu1 %3126 }
 0xf31   : > { %4553 = vrcp.f32 %v3127_v34 }
 0xf32   : > { %4555 = vrcp.f32 %v3118_v36 }
 0xf33   : > { %v1969_v28 = vpop.permute.xlu0 %1968  ;;  %4557 = vrcp.f32 %v3124_v11  ;;  %v4304_v11 = vld [vmem:[%s6102_s2] sm:$0xff]  }
 0xf34   : > { %1987 = vst.msk [vmem:[#allocation2 + $0x30] sm:$0xff] %vm1980_vm12, %v1969_v28  ;;  %v3121_v12 = vpop.xlane.xlu1 %3120 }
 0xf35   : > { %4559 = vrcp.f32 %v3121_v12 }
 0xf37   : > { %v2578_v44 = vpop.permute.xlu0 %2577  ;;  %v3281_v39 = vld [vmem:[#allocation2 + $0x20] sm:$0xff] }
 0xf38   : > { %2601 = vst.msk [vmem:[#allocation2 + $0x40] sm:$0xff] %vm1310_vm10, %v2578_v44  ;;  %v3149_v2 = vpop.permute.xlu1 %3148 }
 0xf39   : > { %4122 = vmatprep.subr.bf16.mxu0 %v3149_v2 }
 0xf3a   : > { %4123 = vmatpush3.bf16.msra.mxu0 %v3149_v2 }
 0xf3b   : > { %v2582_v31 = vpop.permute.xlu0 %2581  ;;  %4132 = vmatprep.subr.bf16.mxu0 %v4297_v8  ;;  %v3283_v9 = vld [vmem:[#allocation2 + $0x30] sm:$0xff] }
 0xf3c   : > { %2603 = vst.msk [vmem:[#allocation2 + $0x50] sm:$0xff] %vm1310_vm10, %v2582_v31  ;;  %v1289_v48 = vpop.permute.xlu1 %1288 }
 0xf3d   : > { %1312 = vst.msk [vmem:[#allocation2 + $0x8] sm:$0xff] %vm1310_vm10, %v1289_v48  ;;  %4125 = vmatmul.mubr.msk.bf16.vlgmr.msra.gmra.mxu0 %vm794_vm2, %v3145_v61 }
 0xf3e   : > { %4133 = vmatpush3.bf16.msra.mxu0 %v4297_v8  ;;  %v4554_v37 = vpop.eup %4553 }
 0xf3f   : > { %v2912_v46 = vpop.permute.xlu0 %2911  ;;  %4134 = vmatprep.subr.bf16.mxu0 %v4298_v60  ;;  %v4556_v1 = vpop.eup %4555  ;;  %v3143_v20 = vmul.f32 %v4554_v37, %v5835_v57 }
 0xf40   : > { %2935 = vst.msk [vmem:[#allocation2 + $0x40] sm:$0xff] %vm1645_vm11, %v2912_v46  ;;  %v1293_v29 = vpop.permute.xlu1 %1292  ;;  %v4558_v59 = vpop.eup %4557  ;;  %v3140_v38 = vmul.f32 %v4556_v1, %v5814_v3  ;;  %v4301_v3 = vld [vmem:[%s6102_s2 + $0x18] sm:$0xff]  }
 0xf41   : > { %1314 = vst.msk [vmem:[#allocation2 + $0x18] sm:$0xff] %vm1310_vm10, %v1293_v29  ;;  %v3142_v17 = vmul.f32 %v4558_v59, %v5810_v5 }
 0xf42   : > { %v4560_v41 = vpop.eup %4559  ;;  %4135 = vmatpush3.bf16.msra.mxu0 %v4298_v60 }
 0xf43   : > { %v2916_v32 = vpop.permute.xlu0 %2915  ;;  %4136 = vmatprep.subr.bf16.mxu0 %v4299_v56  ;;  %v3141_v21 = vmul.f32 %v4560_v41, %v5841_v14  ;;  %v3147_v57 = vpack.c.bf16 %v3143_v20, %v3142_v17 }
 0xf44   : > { %2937 = vst.msk [vmem:[#allocation2 + $0x50] sm:$0xff] %vm1645_vm11, %v2916_v32  ;;  %v1624_v53 = vpop.permute.xlu1 %1623 }
 0xf45   : > { %1647 = vst.msk [vmem:[#allocation2 + $0x8] sm:$0xff] %vm1645_vm11, %v1624_v53  ;;  %v3146_v63 = vpack.c.bf16 %v3141_v21, %v3140_v38 }
 0xf46   : > { %4137 = vmatpush3.bf16.msra.mxu0 %v4299_v56 }
 0xf47   : > { %v2586_v6 = vpop.permute.xlu0 %2585  ;;  %4128 = vmatprep.mubr.msk.bf16.mxu0 %vm794_vm2, %v3146_v63  ;;  %4138 = vmatprep.subr.bf16.mxu0 %v4300_v13 }
 0xf48   : > { %2605 = vst.msk [vmem:[#allocation2 + $0x60] sm:$0xff] %vm1310_vm10, %v2586_v6  ;;  %4129 = vmatmul.mubr.msk.bf16.gmra.mxu0 %vm794_vm2, %v3147_v57  ;;  %v1628_v14 = vpop.permute.xlu1 %1627 }
 0xf49   : > { %1649 = vst.msk [vmem:[#allocation2 + $0x18] sm:$0xff] %vm1645_vm11, %v1628_v14 }
 0xf4a   : > { %4139 = vmatpush3.bf16.msra.mxu0 %v4300_v13 }
 0xf4b   : > { %v2590_v5 = vpop.permute.xlu0 %2589  ;;  %4140 = vmatprep.subr.bf16.mxu0 %v4301_v3 }
 0xf4c   : > { %2607 = vst.msk [vmem:[#allocation2 + $0x70] sm:$0xff] %vm1310_vm10, %v2590_v5  ;;  %v1959_v19 = vpop.permute.xlu1 %1958 }
 0xf4d   : > { %1982 = vst.msk [vmem:[#allocation2 + $0x8] sm:$0xff] %vm1980_vm12, %v1959_v19 }
 0xf4e   : > { %4141 = vmatpush3.bf16.msra.mxu0 %v4301_v3 }
 0xf4f   : > { %v2920_v24 = vpop.permute.xlu0 %2919  ;;  %4142 = vmatprep.subr.bf16.mxu0 %v4302_v49 }
 0xf50   : > { %2939 = vst.msk [vmem:[#allocation2 + $0x60] sm:$0xff] %vm1645_vm11, %v2920_v24  ;;  %v1963_v15 = vpop.permute.xlu1 %1962 }
 0xf51   : > { %1984 = vst.msk [vmem:[#allocation2 + $0x18] sm:$0xff] %vm1980_vm12, %v1963_v15 }
 0xf52   : > { %4143 = vmatpush3.bf16.msra.mxu0 %v4302_v49 }
 0xf53   : > { %4144 = vmatprep.subr.bf16.mxu0 %v4303_v52 }
 0xf54   : > { %v1297_v36 = vpop.permute.xlu1 %1296  ;;  %v3278_v4 = vld [vmem:[#allocation2 + $0x8] sm:$0xff] }
 0xf55   : > { %1316 = vst.msk [vmem:[#allocation2 + $0x28] sm:$0xff] %vm1310_vm10, %v1297_v36  ;;  %v3293_v27 = vpack.c.bf16 %v3278_v4, %v3277_v43 }
 0xf56   : > { %4145 = vmatpush3.bf16.msra.mxu0 %v4303_v52 }
 0xf57   : > { %4148 = vmatprep.mubr.bf16.mxu0 %v3293_v27  ;;  %4146 = vmatprep.subr.bf16.mxu0 %v4304_v11 }
 0xf58   : > { %v1301_v7 = vpop.permute.xlu1 %1300  ;;  %v3280_v47 = vld [vmem:[#allocation2 + $0x18] sm:$0xff] }
 0xf59   : > { %1318 = vst.msk [vmem:[#allocation2 + $0x38] sm:$0xff] %vm1310_vm10, %v1301_v7  ;;  %v3294_v23 = vpack.c.bf16 %v3280_v47, %v3279_v40 }
 0xf5a   : > { %4147 = vmatpush3.bf16.msra.mxu0 %v4304_v11 }
 0xf5c   : > { %v1632_v35 = vpop.permute.xlu1 %1631 }
 0xf5d   : > { %1651 = vst.msk [vmem:[#allocation2 + $0x28] sm:$0xff] %vm1645_vm11, %v1632_v35  ;;  %4149 = vmatmul.mubr.bf16.vlgmr.msra.gmra.mxu0 %v3294_v23 }
 0xf60   : > { %v1636_v51 = vpop.permute.xlu1 %1635 }
 0xf61   : > { %1653 = vst.msk [vmem:[#allocation2 + $0x38] sm:$0xff] %vm1645_vm11, %v1636_v51 }
 0xf64   : > { %v1967_v18 = vpop.permute.xlu1 %1966 }
 0xf65   : > { %1986 = vst.msk [vmem:[#allocation2 + $0x28] sm:$0xff] %vm1980_vm12, %v1967_v18 }
 0xf68   : > { %v1971_v10 = vpop.permute.xlu1 %1970 }
 0xf69   : > { %1988 = vst.msk [vmem:[#allocation2 + $0x38] sm:$0xff] %vm1980_vm12, %v1971_v10 }
 0xf6c   : > { %v2580_v26 = vpop.permute.xlu1 %2579  ;;  %v3282_v58 = vld [vmem:[#allocation2 + $0x28] sm:$0xff] }
 0xf6d   : > { %2602 = vst.msk [vmem:[#allocation2 + $0x48] sm:$0xff] %vm1310_vm10, %v2580_v26  ;;  %v3295_v50 = vpack.c.bf16 %v3282_v58, %v3281_v39 }
 0xf6f   : > { %4152 = vmatprep.mubr.bf16.mxu0 %v3295_v50 }
 0xf70   : > { %v2584_v0 = vpop.permute.xlu1 %2583  ;;  %v3284_v30 = vld [vmem:[#allocation2 + $0x38] sm:$0xff] }
 0xf71   : > { %2604 = vst.msk [vmem:[#allocation2 + $0x58] sm:$0xff] %vm1310_vm10, %v2584_v0  ;;  %v3296_v55 = vpack.c.bf16 %v3284_v30, %v3283_v9 }
 0xf73   : > { %4153 = vmatmul.mubr.bf16.gmra.mxu0 %v3296_v55 }
 0xf74   : > { %v2914_v54 = vpop.permute.xlu1 %2913 }
 0xf75   : > { %2936 = vst.msk [vmem:[#allocation2 + $0x48] sm:$0xff] %vm1645_vm11, %v2914_v54 }
 0xf78   : > { %v2918_v42 = vpop.permute.xlu1 %2917 }
 0xf79   : > { %2938 = vst.msk [vmem:[#allocation2 + $0x58] sm:$0xff] %vm1645_vm11, %v2918_v42 }
 0xf7c   : > { %v2588_v34 = vpop.permute.xlu1 %2587 }
 0xf7d   : > { %2606 = vst.msk [vmem:[#allocation2 + $0x68] sm:$0xff] %vm1310_vm10, %v2588_v34 }
 0xf80   : > { %v2592_v28 = vpop.permute.xlu1 %2591 }
 0xf81   : > { %2608 = vst.msk [vmem:[#allocation2 + $0x78] sm:$0xff] %vm1310_vm10, %v2592_v28 }
 0xf84   : > { %v2922_v16 = vpop.permute.xlu1 %2921 }
 0xf85   : > { %2940 = vst.msk [vmem:[#allocation2 + $0x68] sm:$0xff] %vm1645_vm11, %v2922_v16 }
 0xffd   : > { %v4126_v12 = vpop.f32.mrf.mxu0 }
 0xffe   : > { %3249 = vrot.lane.b32.xlu0 %v4126_v12, %s4624_s28 }
 0xfff   : > { %v3206_v62 = vpop.f32.mrf.mxu0 }
0x1001   : > { %v4127_v45 = vpop.f32.mrf.mxu0 }
0x1002   : > { %3245 = vrot.lane.b32.xlu0 %v3206_v62, %s4624_s28  ;;  %3251 = vrot.lane.b32.xlu1 %v4127_v45, %s4624_s28 }
0x1003   : > { %v3209_v44 = vpop.f32.mrf.mxu0 }
0x1006   : > { %2923 = vrot.lane.b32.xlu0 %v5759_v33, %s4625_s5  ;;  %3247 = vrot.lane.b32.xlu1 %v3209_v44, %s4624_s28  ;;  %v6003_v33 = vld [vmem:[%s6103_s3] ss:$0 sm:$0xff] }
0x1008   : > { %v4130_v8 = vpop.f32.mrf.mxu0 }
0x100a   : > { %2925 = vrot.lane.b32.xlu1 %v5763_v25, %s4625_s5  ;;  %v3222_v2 = vpop.f32.mrf.mxu0  ;;  %s6006_s5 = scalar_lea.vmem [#allocation3], %s3566_s9 }
0x100b   : > { %3253 = vrot.lane.b32.xlu0 %v3222_v2, %s4624_s28  ;;  %s3500_s12 = sshll.u32 %s6006_s5, 4  ;;  %s6053_s12 = int_to_ptr.vmem [resolvable:$true] %s3500_s12 }
0x100c   : > { %v4131_v22 = vpop.f32.mrf.mxu0  ;;  %s4561_s22 = scalar_lea.vmem %s6053_s12, 2048  ;;  %p4568_p0 = scmp.lt.s32.totalorder %s6053_s12, %s4566_s27 }
0x100d   : > { %p4562_p11 = scmp.ne.s32.totalorder %s6053_s12, %s4561_s22  ;;  %p4569_p1 = scmp.lt.s32.totalorder %s4567_s30, %s4561_s22 }
0x100e   : > { %v3225_v61 = vpop.f32.mrf.mxu0 }
0x100f   : > { %3257 = vrot.lane.b32.xlu0 %v4130_v8, %s4624_s28  ;;  %3255 = vrot.lane.b32.xlu1 %v3225_v61, %s4624_s28  ;;  %p4563_p12 = pnand %p4562_p11, %p4693_p5  ;;  %p4570_p2 = por %p4569_p1, %p4568_p0 }
0x1011   : > { %p4564_p13 = pneg %p4563_p12 }
0x1013   : > { %3259 = vrot.lane.b32.xlu1 %v4131_v22, %s4624_s28  ;;  %s3683_s28 = sshll.u32 %s4676_s19, 11  ;;  %s6060_s19 = scalar_lea.sflag [#allocation4], %s191_s8 }
0x1014   : > { %s6051_s20 = scalar_lea.hbm %s6104_s4, %s3683_s28  ;;  %p4571_p3 = pnand %p4570_p2, %p4564_p13 }
0x101d   : > { %v4150_v25 = vpop.f32.mrf.mxu0 }
0x101e   : > { %v3415_v31 = vadd.f32 %v4150_v25, %v6003_v33 }
0x101f   : > { %v3406_v60 = vpop.f32.mrf.mxu0 }
0x1020   : > { %3471 = vst [vmem:[%s6006_s5 + $0x10] sm:$0xff] %v3415_v31  ;;  %v3407_v48 = vadd.f32 %v6003_v33, %v3406_v60 }
0x1021   : > { %v4151_v37 = vpop.f32.mrf.mxu0 }
0x1022   : > { %3469 = vst [vmem:[%s6006_s5] sm:$0xff] %v3407_v48  ;;  %v3418_v46 = vadd.f32 %v4151_v37, %v6003_v33 }
0x1023   : > { %v3409_v56 = vpop.f32.mrf.mxu0 }
0x1024   : > { %3472 = vst [vmem:[%s6006_s5 + $0x18] sm:$0xff] %v3418_v46  ;;  %v3410_v1 = vadd.f32 %v6003_v33, %v3409_v56 }
0x1026   : > { %3470 = vst [vmem:[%s6006_s5 + $0x8] sm:$0xff] %v3410_v1 }
0x1033   : > { %v4154_v29 = vpop.f32.mrf.mxu0 }
0x1034   : > { %v3431_v59 = vadd.f32 %v4154_v29, %v6003_v33 }
0x1035   : > { %v3422_v41 = vpop.f32.mrf.mxu0 }
0x1036   : > { %3475 = vst [vmem:[%s6006_s5 + $0x30] sm:$0xff] %v3431_v59  ;;  %v3423_v20 = vadd.f32 %v6003_v33, %v3422_v41 }
0x1037   : > { %v4155_v32 = vpop.f32.mrf.mxu0 }
0x1038   : > { %3473 = vst [vmem:[%s6006_s5 + $0x20] sm:$0xff] %v3423_v20  ;;  %v3434_v38 = vadd.f32 %v4155_v32, %v6003_v33 }
0x1039   : > { %v3425_v21 = vpop.f32.mrf.mxu0 }
0x103a   : > { %3476 = vst [vmem:[%s6006_s5 + $0x38] sm:$0xff] %v3434_v38  ;;  %v3426_v13 = vadd.f32 %v6003_v33, %v3425_v21 }
0x103c   : > { %3474 = vst [vmem:[%s6006_s5 + $0x28] sm:$0xff] %v3426_v13 }
0x1070   : > { %v3250_v53 = vpop.permute.xlu0 %3249 }
0x1071   : > { %3271 = vst.msk [vmem:[#allocation2 + $0x50] sm:$0xff] %vm1980_vm12, %v3250_v53 }
0x1074   : > { %v3246_v17 = vpop.permute.xlu0 %3245  ;;  %v3252_v63 = vpop.permute.xlu1 %3251 }
0x1075   : > { %3269 = vst.msk [vmem:[#allocation2 + $0x40] sm:$0xff] %vm1980_vm12, %v3246_v17  ;;  %3272 = vst.msk [vmem:[#allocation2 + $0x58] sm:$0xff] %vm1980_vm12, %v3252_v63 }
0x1078   : > { %v2924_v57 = vpop.permute.xlu0 %2923  ;;  %v3248_v6 = vpop.permute.xlu1 %3247  ;;  %v3287_v11 = vld [vmem:[#allocation2 + $0x50] sm:$0xff] }
0x1079   : > { %2941 = vst.msk [vmem:[#allocation2 + $0x70] sm:$0xff] %vm1645_vm11, %v2924_v57 }
0x107a   : > { %3270 = vst.msk [vmem:[#allocation2 + $0x48] sm:$0xff] %vm1980_vm12, %v3248_v6 }
0x107c   : > { %v2926_v3 = vpop.permute.xlu1 %2925  ;;  %v3288_v5 = vld [vmem:[#allocation2 + $0x58] sm:$0xff]  ;;  %v3285_v49 = vld [vmem:[#allocation2 + $0x40] sm:$0xff] }
0x107d   : > { %2942 = vst.msk [vmem:[#allocation2 + $0x78] sm:$0xff] %vm1645_vm11, %v2926_v3  ;;  %v3254_v14 = vpop.permute.xlu0 %3253  ;;  %v3298_v36 = vpack.c.bf16 %v3288_v5, %v3287_v11 }
0x107e   : > { %3273 = vst.msk [vmem:[#allocation2 + $0x60] sm:$0xff] %vm1980_vm12, %v3254_v14 }
0x1081   : > { %v3286_v19 = vld [vmem:[#allocation2 + $0x48] sm:$0xff]  ;;  %v3258_v24 = vpop.permute.xlu0 %3257  ;;  %v3256_v52 = vpop.permute.xlu1 %3255 }
0x1082   : > { %v3297_v15 = vpack.c.bf16 %v3286_v19, %v3285_v49  ;;  %3275 = vst.msk [vmem:[#allocation2 + $0x70] sm:$0xff] %vm1980_vm12, %v3258_v24  ;;  %3274 = vst.msk [vmem:[#allocation2 + $0x68] sm:$0xff] %vm1980_vm12, %v3256_v52 }
0x1084   : > { %4156 = vmatprep.mubr.bf16.mxu0 %v3297_v15 }
0x1085   : > { %4157 = vmatmul.mubr.bf16.gmra.mxu0 %v3298_v36  ;;  %v3260_v43 = vpop.permute.xlu1 %3259  ;;  %v3289_v4 = vld [vmem:[#allocation2 + $0x60] sm:$0xff] }
0x1086   : > { %3276 = vst.msk [vmem:[#allocation2 + $0x78] sm:$0xff] %vm1980_vm12, %v3260_v43 }
0x1089   : > { %v3290_v27 = vld [vmem:[#allocation2 + $0x68] sm:$0xff]  ;;  %v3291_v47 = vld [vmem:[#allocation2 + $0x70] sm:$0xff] }
0x108a   : > { %v3299_v7 = vpack.c.bf16 %v3290_v27, %v3289_v4 }
0x108c   : > { %4160 = vmatprep.mubr.bf16.mxu0 %v3299_v7 }
0x108d   : > { %v3292_v40 = vld [vmem:[#allocation2 + $0x78] sm:$0xff] }
0x108e   : > { %v3300_v23 = vpack.c.bf16 %v3292_v40, %v3291_v47 }
0x1090   : > { %4161 = vmatmul.mubr.bf16.gmra.mxu0 %v3300_v23 }
0x1145   : > { %v4158_v35 = vpop.f32.mrf.mxu0 }
0x1146   : > { %v3447_v51 = vadd.f32 %v4158_v35, %v6003_v33 }
0x1147   : > { %v3438_v18 = vpop.f32.mrf.mxu0 }
0x1148   : > { %3479 = vst [vmem:[%s6006_s5 + $0x50] sm:$0xff] %v3447_v51  ;;  %v3439_v10 = vadd.f32 %v6003_v33, %v3438_v18 }
0x1149   : > { %v4159_v26 = vpop.f32.mrf.mxu0 }
0x114a   : > { %3477 = vst [vmem:[%s6006_s5 + $0x40] sm:$0xff] %v3439_v10  ;;  %v3450_v39 = vadd.f32 %v4159_v26, %v6003_v33 }
0x114b   : > { %v3441_v58 = vpop.f32.mrf.mxu0 }
0x114c   : > { %3480 = vst [vmem:[%s6006_s5 + $0x58] sm:$0xff] %v3450_v39  ;;  %v3442_v50 = vadd.f32 %v6003_v33, %v3441_v58 }
0x114e   : > { %3478 = vst [vmem:[%s6006_s5 + $0x48] sm:$0xff] %v3442_v50 }
0x1150   : > { %v4162_v0 = vpop.f32.mrf.mxu0 }
0x1151   : > { %v3463_v9 = vadd.f32 %v4162_v0, %v6003_v33 }
0x1152   : > { %v3454_v30 = vpop.f32.mrf.mxu0 }
0x1153   : > { %3483 = vst [vmem:[%s6006_s5 + $0x70] sm:$0xff] %v3463_v9  ;;  %v3455_v55 = vadd.f32 %v6003_v33, %v3454_v30 }
0x1154   : > { %v4163_v54 = vpop.f32.mrf.mxu0 }
0x1155   : > { %3481 = vst [vmem:[%s6006_s5 + $0x60] sm:$0xff] %v3455_v55  ;;  %v3466_v42 = vadd.f32 %v4163_v54, %v6003_v33 }
0x1156   : > { %v3457_v34 = vpop.f32.mrf.mxu0 }
0x1157   : > { %3484 = vst [vmem:[%s6006_s5 + $0x78] sm:$0xff] %v3466_v42  ;;  %v3458_v28 = vadd.f32 %v6003_v33, %v3457_v34 }
0x1159   : > { %3482 = vst [vmem:[%s6006_s5 + $0x68] sm:$0xff] %v3458_v28 }
0x115a   : > { %4574 = shalt.err (!%p4571_p3)
}
0x115b   : > { %s4575_s29 = scalar_lea.hbm %s6051_s20, 2048  ;;  %s4579_s8 = scalar_lea.hbm %s6104_s4, 4096 }
0x115c   : > { %p4576_p4 = scmp.ne.s32.totalorder %s6051_s20, %s4575_s29  ;;  %p4580_p9 = scmp.lt.s32.totalorder %s6051_s20, %s6104_s4 }
0x115d   : > { %p4581_p10 = scmp.lt.s32.totalorder %s4579_s8, %s4575_s29 }
0x115e   : > { %p4577_p7 = pnand %p4576_p4, %p4693_p5 }
0x115f   : > { %p4582_p11 = por %p4581_p10, %p4580_p9 }
0x1160   : > { %p4578_p8 = pneg %p4577_p7 }
0x1162   : > { %p4583_p12 = pnand %p4582_p11, %p4578_p8 }
0x1164   : > { %4586 = shalt.err (!%p4583_p12)
}
0x1165   : > { %s4628_s11 = smov 128   ;;  %s4629_s5 = smov 8  }
0x1166   : > { %4212 = dma.vmem_to_hbm [thread:$0]  (%p4693_p5), %s6053_s12, 2048, %s6051_s20, %s6060_s19, %s4628_s11, %s4628_s11, %s4629_s5  }
0x1167 PF: > { %p4218_p13 = scmp.ge.s32.totalorder %s4621_s18, 2  ;;  %s3515_s28 = sand.u32 1, %s4609_s15  }
0x1168   : > { %s3516_s13 = scalar_lea.sflag [#allocation4], %s3515_s28 }
0x1169   : > { %p4215_p0 = pnand %p4218_p13, %p4697_p6 }
0x116b   : > { %p4216_p1 = pneg %p4215_p0 }
0x116d   : > { %4604 = dma.done.wait (%p4216_p1), %s3516_s13, 2048  }
0x116e   : > { %4606 = vsyncadd (%p4216_p1), %s3516_s13, 4294965248  ;;  %p14_p2 = scmp.ge.s32.totalorder %s4680_s21, 4   ;;  %s6195_s15 = smov %s4613_s16 }
0x116f   : > { %s6196_s16 = smov %s4617_s17  ;;  %s6197_s17 = smov %s4691_s24 }
0x1170   : > { %s6198_s18 = smov %s4680_s21  ;;  %16 = sbr.rel (!%p14_p2) target bundleno = 3 (0x3), region = 71 }
0x1175   :  { %3521 = vsyncpa [#allocation4], 1 }
0x1176   :  { %3523 = vsyncpa [#allocation4 + $0x1], 1 }

</bundles_post_ra>
